<compile_context>
chip_gen: v7x
topology: tpu7x:2x2x1
jax: 0.10.0
libtpu: 0.0.40
codegen_flags: <defaults>
</compile_context>

<pallas_src>
import math

import jax
import jax.numpy as jnp
from jax.experimental import pallas as pl
from jax.experimental.pallas import tpu as pltpu

# ----------------------------- small test config ----------------------------
NUM_MELS = 16
UPSAMPLE_INITIAL_CHANNEL = 32
UPSAMPLE_RATES = (2, 2, 2)
UPSAMPLE_KERNEL_SIZES = (4, 4, 4)
HOP_LENGTH = 8  # == prod(UPSAMPLE_RATES)
RESBLOCK_KERNEL_SIZES = (3, 7)
RESBLOCK_DILATION_SIZES = ((1, 3), (1, 3))
PRE_CONV_KERNEL_SIZE = 7
POST_CONV_KERNEL_SIZE = 7
NUM_UPSAMPLES = len(UPSAMPLE_RATES)

ACT_DTYPE = jnp.bfloat16   # inter-stage activation dtype (HBM traffic)
MM_DTYPE = jnp.bfloat16    # MXU operand dtype (full rate on v5e/v6e/v7x)
VMEM_LIMIT_BYTES = 32 * 1024 * 1024

assert math.prod(UPSAMPLE_RATES) == HOP_LENGTH


def get_padding(k, d=1):
    return (k * d - d) // 2


# --------------------------- in-kernel value helpers -------------------------
def _silu(x):
    # x*sigmoid(x) == 0.5*x*(1 + tanh(x/2)): a single EUP op (tanh) instead of
    # exp + reciprocal through the one EUP slot.
    return 0.5 * x * (1.0 + jnp.tanh(0.5 * x))


def _zpad_t(h, left, right):
    """Zero-pad a (C, T) value along the time (lane) axis."""
    parts = []
    if left:
        parts.append(jnp.zeros((h.shape[0], left), h.dtype))
    parts.append(h)
    if right:
        parts.append(jnp.zeros((h.shape[0], right), h.dtype))
    if len(parts) == 1:
        return h
    return jnp.concatenate(parts, axis=1)


def _conv1d(h, w_flat, b, k, dilation, pad):
    """Stride-1 dilated Conv1d as ONE tap-stacked bf16 MXU matmul.

    h:      (Ci, T) f32 value, lane-dense time axis.
    w_flat: (Co, k*Ci) bf16, column index = tap*Ci + ci.
    b:      (Co, 1) f32.
    Returns (Co, T + 2*pad - dilation*(k-1)) f32.
    """
    _, t = h.shape
    t_out = t + 2 * pad - dilation * (k - 1)
    hp = _zpad_t(h, pad, pad)
    if k == 1:
        op = hp[:, :t_out]
    else:
        # k lane-shifted copies stacked on sublanes -> contraction dim k*Ci
        # (raises MXU utilization vs. k tiny matmuls with contraction Ci).
        op = jnp.concatenate(
            [hp[:, j * dilation:j * dilation + t_out] for j in range(k)],
            axis=0)
    y = jnp.dot(w_flat, op.astype(MM_DTYPE),
                preferred_element_type=jnp.float32)
    return y + b


# ------------------------------ BlockSpec helpers ----------------------------
def _bcast_spec(arr):
    # Weights: constant block across the (batch) grid.
    # TODO(synk): at production channel counts add pipeline_mode=pl.Buffered(1)
    # here so resident weights are not double-buffered (v7x 64 MiB VMEM).
    nd = arr.ndim
    return pl.BlockSpec(arr.shape, lambda b, _nd=nd: (0,) * _nd)


def _batch_spec(arr):
    nd = arr.ndim
    return pl.BlockSpec((None,) + tuple(arr.shape[1:]),
                        lambda b, _nd=nd: (b,) + (0,) * (_nd - 1))


_COMPILER_PARAMS = pltpu.CompilerParams(
    dimension_semantics=("parallel",),
    vmem_limit_bytes=VMEM_LIMIT_BYTES,
)


# -------------------------------- conv_pre kernel ----------------------------
def conv_pre_pallas(mel, w_flat, b):
    """mel: (B, num_mels, T); w_flat: (Co, K*Ci) bf16; b: (Co, 1) f32."""
    B, _, T = mel.shape
    Co = w_flat.shape[0]
    K = PRE_CONV_KERNEL_SIZE
    pad = get_padding(K)

    def kernel(x_ref, w_ref, b_ref, o_ref):
        y = _conv1d(x_ref[...], w_ref[...], b_ref[...], K, 1, pad)
        o_ref[...] = y.astype(o_ref.dtype)

    return pl.pallas_call(
        kernel,
        out_shape=jax.ShapeDtypeStruct((B, Co, T), ACT_DTYPE),
        grid=(B,),
        in_specs=[_batch_spec(mel), _bcast_spec(w_flat), _bcast_spec(b)],
        out_specs=pl.BlockSpec((None, Co, T), lambda bb: (bb, 0, 0)),
        compiler_params=_COMPILER_PARAMS,
    )(mel, w_flat, b)


# ---------------------------- fused upsample-stage kernel --------------------
def _make_stage_kernel(cfg):
    """One full upsample stage in a single kernel.

    refs (in order):
      x (Ci, T_stuffed)                 zero-stuffed stage input (bf16)
      ph (s, q_len)                     template phases for the noise conv
      up_w (Co, K_up*Ci), up_b (Co, 1)  flipped transpose-conv taps, flattened
      nz_w (Co, kn), nz_b (Co, 1)
      per ResBlock j: c1w (D, Co, rk*Co), c1b (D, Co, 1), c2w, c2b
      [post_w (1, K_post*Co), post_b (1, 1)]   (last stage only)
      out (Co_out, T_up)
    """
    rblocks = cfg["rblocks"]
    n_blocks = len(rblocks)

    def kernel(*refs):
        it = iter(refs)
        x_ref = next(it)
        ph_ref = next(it)
        up_w = next(it)[...]
        up_b = next(it)[...]
        nz_w = next(it)[...]
        nz_b = next(it)[...]
        rb = [tuple(next(it)[...] for _ in range(4)) for _ in range(n_blocks)]
        if cfg["has_post"]:
            post_w = next(it)[...]
            post_b = next(it)[...]
        o_ref = next(it)

        t_up = cfg["t_up"]

        # x = silu(x); x = ups[i](x)
        # ConvTranspose1d == stride-1 conv with flipped taps over the
        # zero-stuffed input (stuffed in the wrapper; silu(0) == 0 so the
        # in-kernel activation of the stuffed signal is exact).
        h = _silu(x_ref[...].astype(jnp.float32))
        y = _conv1d(h, up_w, up_b, cfg["k_up"], 1, cfg["pad_up"])  # (Co, T_up)

        # x = x + noise_convs[i](template)
        # strided Conv1d(1, Co, kn, stride=s): gather the kn phase-shifted tap
        # rows and contract them with the (Co, kn) weight in one matmul.
        ph = ph_ref[...].astype(jnp.float32)                        # (s, q_len)
        s, kn = cfg["s_noise"], cfg["kn"]
        taps = jnp.concatenate(
            [ph[k % s:k % s + 1, k // s:k // s + t_up] for k in range(kn)],
            axis=0)                                                 # (kn, T_up)
        y = y + jnp.dot(nz_w, taps.astype(MM_DTYPE),
                        preferred_element_type=jnp.float32) + nz_b

        # ParralelBlock: mean over ResBlock1(rk, dils)
        sy = _silu(y)  # shared operand of both blocks' first conv
        acc = None
        for (rk, dils), (c1w, c1b, c2w, c2b) in zip(rblocks, rb):
            xb = y
            for di, d in enumerate(dils):
                src = sy if di == 0 else _silu(xb)
                t = _conv1d(src, c1w[di], c1b[di], rk, d, get_padding(rk, d))
                xb = xb + _conv1d(_silu(t), c2w[di], c2b[di], rk, 1,
                                  get_padding(rk, 1))
            acc = xb if acc is None else acc + xb
        y = acc * (1.0 / n_blocks)

        if cfg["has_post"]:
            # x = silu(x); x = conv_post(x); x = tanh(x)
            y = jnp.tanh(_conv1d(_silu(y), post_w, post_b, cfg["k_post"], 1,
                                 cfg["pad_post"]))

        o_ref[...] = y.astype(o_ref.dtype)

    return kernel


def _stage_pallas(x_st, phases, weights, cfg, out_dtype):
    B = x_st.shape[0]
    co_out = 1 if cfg["has_post"] else cfg["co"]
    in_specs = ([_batch_spec(x_st), _batch_spec(phases)]
                + [_bcast_spec(w) for w in weights])
    return pl.pallas_call(
        _make_stage_kernel(cfg),
        out_shape=jax.ShapeDtypeStruct((B, co_out, cfg["t_up"]), out_dtype),
        grid=(B,),
        in_specs=in_specs,
        out_specs=pl.BlockSpec((None, co_out, cfg["t_up"]),
                               lambda bb: (bb, 0, 0)),
        compiler_params=_COMPILER_PARAMS,
    )(x_st, phases, *weights)


# ------------------------------- parameters ----------------------------------
def init_params(key):
    """Synthetic weights in the PyTorch layouts.  weight_norm at fresh init is
    the identity (g == ||v||), so v is used directly."""
    keys = iter(jax.random.split(key, 512))

    def nrm(shape, scale=0.1):
        return scale * jax.random.normal(next(keys), shape, jnp.float32)

    p = {}
    c0 = UPSAMPLE_INITIAL_CHANNEL
    p["pre_w"] = nrm((c0, NUM_MELS, PRE_CONV_KERNEL_SIZE))   # Conv1d (Co,Ci,K)
    p["pre_b"] = nrm((c0,))

    ups_w, ups_b, noise_w, noise_b, res = [], [], [], [], []
    for i, (u, k) in enumerate(zip(UPSAMPLE_RATES, UPSAMPLE_KERNEL_SIZES)):
        ci = UPSAMPLE_INITIAL_CHANNEL // (2 ** i)
        co = UPSAMPLE_INITIAL_CHANNEL // (2 ** (i + 1))
        ups_w.append(nrm((ci, co, k)))                        # ConvT (Ci,Co,K)
        ups_b.append(nrm((co,)))
        if i + 1 < NUM_UPSAMPLES:
            kn = 2 * int(math.prod(UPSAMPLE_RATES[i + 1:]))
        else:
            kn = 1
        noise_w.append(nrm((co, 1, kn)))
        noise_b.append(nrm((co,)))
        blocks = []
        for rk, dils in zip(RESBLOCK_KERNEL_SIZES, RESBLOCK_DILATION_SIZES):
            c1 = [(nrm((co, co, rk)), nrm((co,))) for _ in dils]
            c2 = [(nrm((co, co, rk)), nrm((co,))) for _ in dils]
            blocks.append({"c1": c1, "c2": c2})
        res.append(blocks)

    p["ups_w"], p["ups_b"] = ups_w, ups_b
    p["noise_w"], p["noise_b"] = noise_w, noise_b
    p["res"] = res

    ch_last = UPSAMPLE_INITIAL_CHANNEL // (2 ** NUM_UPSAMPLES)
    p["post_w"] = nrm((1, ch_last, POST_CONV_KERNEL_SIZE))
    p["post_b"] = nrm((1,))
    return p


def prepare_params(p):
    """One-time re-layout into the kernel layout (hoisted out of the forward):
    tap-flattened (Co, K*Ci) bf16 matrices (flipped taps for the transpose
    conv) and (C, 1) f32 biases."""
    def conv_w(w):      # torch Conv1d (Co, Ci, K) -> (Co, K*Ci) bf16
        co, ci, k = w.shape
        return jnp.transpose(w, (0, 2, 1)).reshape(co, k * ci).astype(MM_DTYPE)

    def convT_w(w):     # torch ConvT (Ci, Co, K): flip K, swap -> (Co, K*Ci)
        ci, co, k = w.shape
        wf = jnp.flip(w, axis=-1)
        return jnp.transpose(wf, (1, 2, 0)).reshape(co, k * ci).astype(MM_DTYPE)

    def bias(b):
        return b.reshape(-1, 1).astype(jnp.float32)

    kp = {
        "pre_w": conv_w(p["pre_w"]), "pre_b": bias(p["pre_b"]),
        "post_w": conv_w(p["post_w"]), "post_b": bias(p["post_b"]),
        "ups_w": [convT_w(w) for w in p["ups_w"]],
        "ups_b": [bias(b) for b in p["ups_b"]],
        "noise_w": [w[:, 0, :].astype(MM_DTYPE) for w in p["noise_w"]],
        "noise_b": [bias(b) for b in p["noise_b"]],
        "res": [],
    }
    for blocks in p["res"]:
        blist = []
        for blk in blocks:
            blist.append({
                "c1w": jnp.stack([conv_w(w) for (w, _) in blk["c1"]]),
                "c1b": jnp.stack([bias(b) for (_, b) in blk["c1"]]),
                "c2w": jnp.stack([conv_w(w) for (w, _) in blk["c2"]]),
                "c2b": jnp.stack([bias(b) for (_, b) in blk["c2"]]),
            })
        kp["res"].append(blist)
    return kp


# --------------------------------- forward -----------------------------------
def hifigan_forward(kp, mel_ncl, template_ncl):
    """mel_ncl: (B, num_mels, T_mel)   template_ncl: (B, 1, T_mel*hop)."""
    tmpl = template_ncl[:, 0, :]
    B, _, T_audio = template_ncl.shape

    # conv_pre (own small kernel; its output is zero-stuffed before stage 0)
    x = conv_pre_pallas(mel_ncl, kp["pre_w"], kp["pre_b"])    # (B, C0, T_mel)

    for i in range(NUM_UPSAMPLES):
        u, k_up = UPSAMPLE_RATES[i], UPSAMPLE_KERNEL_SIZES[i]
        Ci, T_in = x.shape[1], x.shape[2]
        Co = UPSAMPLE_INITIAL_CHANNEL // (2 ** (i + 1))
        p_up = (k_up - u) // 2
        T_up = (T_in - 1) * u - 2 * p_up + k_up

        if i + 1 < NUM_UPSAMPLES:
            s = int(math.prod(UPSAMPLE_RATES[i + 1:]))
            kn, pn = 2 * s, s // 2
        else:
            s, kn, pn = 1, 1, 0
        assert (T_audio + 2 * pn - kn) // s + 1 == T_up

        # glue: zero-stuff the time axis for the transpose conv
        T_stuff = (T_in - 1) * u + 1
        x_st = jnp.zeros((B, Ci, T_stuff), x.dtype).at[:, :, ::u].set(x)

        # glue: split the (padded) template into its `s` stride-phases
        # (same-size reshape; no im2col expansion, no gather)
        E = -(-kn // s)
        q_len = T_up + E - 1
        total = s * q_len
        t_pad = jnp.pad(tmpl, ((0, 0),
                               (pn, max(0, total - T_audio - pn))))[:, :total]
        phases = jnp.transpose(t_pad.reshape(B, q_len, s),
                               (0, 2, 1)).astype(ACT_DTYPE)

        cfg = dict(
            co=Co, t_up=T_up, k_up=k_up, pad_up=k_up - 1 - p_up,
            s_noise=s, kn=kn,
            rblocks=tuple(zip(RESBLOCK_KERNEL_SIZES, RESBLOCK_DILATION_SIZES)),
            has_post=(i == NUM_UPSAMPLES - 1),
            k_post=POST_CONV_KERNEL_SIZE,
            pad_post=get_padding(POST_CONV_KERNEL_SIZE),
        )
        weights = [kp["ups_w"][i], kp["ups_b"][i],
                   kp["noise_w"][i], kp["noise_b"][i]]
        for j in range(len(RESBLOCK_KERNEL_SIZES)):
            blk = kp["res"][i][j]
            weights += [blk["c1w"], blk["c1b"], blk["c2w"], blk["c2b"]]
        if cfg["has_post"]:
            weights += [kp["post_w"], kp["post_b"]]

        out_dtype = jnp.float32 if cfg["has_post"] else ACT_DTYPE
        x = _stage_pallas(x_st, phases, weights, cfg, out_dtype)

    return x  # (B, 1, T_audio) float32


# --------------------------- pure-JAX reference (f32) ------------------------
def _ref_conv1d(x, w, b, stride=1, padding=0, dilation=1):
    y = jax.lax.conv_general_dilated(
        x, w, window_strides=(stride,), padding=[(padding, padding)],
        rhs_dilation=(dilation,), dimension_numbers=("NCH", "OIH", "NCH"))
    return y + b[None, :, None]


def _ref_conv_transpose1d(x, w, b, stride, padding):
    ci, co, k = w.shape
    w_eff = jnp.transpose(jnp.flip(w, axis=-1), (1, 0, 2))    # (Co, Ci, K)
    y = jax.lax.conv_general_dilated(
        x, w_eff, window_strides=(1,),
        padding=[(k - 1 - padding, k - 1 - padding)],
        lhs_dilation=(stride,), dimension_numbers=("NCH", "OIH", "NCH"))
    return y + b[None, :, None]


def _ref_silu(x):
    return x * jax.nn.sigmoid(x)


def hifigan_reference(p, mel, template):
    x = _ref_conv1d(mel, p["pre_w"], p["pre_b"],
                    padding=get_padding(PRE_CONV_KERNEL_SIZE))
    for i in range(NUM_UPSAMPLES):
        u, k = UPSAMPLE_RATES[i], UPSAMPLE_KERNEL_SIZES[i]
        x = _ref_silu(x)
        x = _ref_conv_transpose1d(x, p["ups_w"][i], p["ups_b"][i], u,
                                  (k - u) // 2)
        if i + 1 < NUM_UPSAMPLES:
            s = int(math.prod(UPSAMPLE_RATES[i + 1:]))
            kn, pn = 2 * s, s // 2
        else:
            s, kn, pn = 1, 1, 0
        x = x + _ref_conv1d(template, p["noise_w"][i], p["noise_b"][i],
                            stride=s, padding=pn)
        acc = None
        for j, (rk, dils) in enumerate(zip(RESBLOCK_KERNEL_SIZES,
                                           RESBLOCK_DILATION_SIZES)):
            xb = x
            blk = p["res"][i][j]
            for di, d in enumerate(dils):
                w1, b1 = blk["c1"][di]
                w2, b2 = blk["c2"][di]
                t = _ref_conv1d(_ref_silu(xb), w1, b1,
                                padding=get_padding(rk, d), dilation=d)
                xb = xb + _ref_conv1d(_ref_silu(t), w2, b2,
                                      padding=get_padding(rk, 1))
            acc = xb if acc is None else acc + xb
        x = acc / len(RESBLOCK_KERNEL_SIZES)
    x = _ref_silu(x)
    x = _ref_conv1d(x, p["post_w"], p["post_b"],
                    padding=get_padding(POST_CONV_KERNEL_SIZE))
    return jnp.tanh(x)


# ----------------------------------- main -------------------------------------
if __name__ == "__main__":
    key = jax.random.PRNGKey(0)
    pkey, xkey, tkey = jax.random.split(key, 3)

    raw_params = init_params(pkey)
    params = prepare_params(raw_params)

    B, T_MEL = 2, 8
    mel = jax.random.normal(xkey, (B, NUM_MELS, T_MEL), jnp.float32)
    template = jax.random.normal(tkey, (B, 1, T_MEL * HOP_LENGTH), jnp.float32)

    fwd = jax.jit(hifigan_forward)
    audio = jax.block_until_ready(fwd(params, mel, template))

    assert audio.shape == (B, 1, T_MEL * HOP_LENGTH), audio.shape
    assert bool(jnp.all(jnp.isfinite(audio)))
    assert bool(jnp.all(jnp.abs(audio) <= 1.000001))  # tanh output range

    # tolerance check vs. a pure-JAX f32 reference (gap set by bf16
    # inter-stage activations and bf16 MXU operands).
    ref = jax.block_until_ready(
        jax.jit(hifigan_reference)(raw_params, mel, template))
    assert float(jnp.max(jnp.abs(ref))) > 1e-3
    max_err = float(jnp.max(jnp.abs(audio - ref)))
    assert max_err < 1e-2, max_err

    print("KERNEL_OK")
</pallas_src>

<mosaic_0001>
module attributes {stable_mosaic.version = 11 : i64} {
  func.func @kernel(%arg0: i32, %arg1: memref<1x16x8xf32, #tpu.memory_space<vmem>>, %arg2: memref<32x112xbf16, #tpu.memory_space<vmem>>, %arg3: memref<32x1xf32, #tpu.memory_space<vmem>>, %arg4: memref<1x32x8xbf16, #tpu.memory_space<vmem>>) attributes {dimension_semantics = [#tpu.dimension_semantics<parallel>], iteration_bounds = array<i64: 2>, scalar_prefetch = 0 : i64, scratch_operands = 0 : i64, tpu.core_type = #tpu.core_type<tc>, window_params = [{transform_indices = @transform_0, window_bounds = array<i64: 1, 16, 8>}, {pipeline_mode = #tpu.pipeline_mode<synchronous>, transform_indices = @transform_1, window_bounds = array<i64: 32, 112>}, {pipeline_mode = #tpu.pipeline_mode<synchronous>, transform_indices = @transform_2, window_bounds = array<i64: 32, 1>}, {transform_indices = @transform_3, window_bounds = array<i64: 1, 32, 8>}]} {
    %c0 = arith.constant 0 : index
    %c0_0 = arith.constant 0 : index
    %c0_1 = arith.constant 0 : index
    %0 = vector.load %arg1[%c0, %c0_0, %c0_1] : memref<1x16x8xf32, #tpu.memory_space<vmem>>, vector<1x16x8xf32>
    %1 = vector.shape_cast %0 : vector<1x16x8xf32> to vector<16x8xf32>
    %c0_2 = arith.constant 0 : index
    %c0_3 = arith.constant 0 : index
    %2 = vector.load %arg2[%c0_2, %c0_3] : memref<32x112xbf16, #tpu.memory_space<vmem>>, vector<32x112xbf16>
    %c0_4 = arith.constant 0 : index
    %c0_5 = arith.constant 0 : index
    %3 = vector.load %arg3[%c0_4, %c0_5] : memref<32x1xf32, #tpu.memory_space<vmem>>, vector<32x1xf32>
    %cst = arith.constant 0.000000e+00 : f32
    %4 = vector.broadcast %cst : f32 to vector<16x3xf32>
    %cst_6 = arith.constant 0.000000e+00 : f32
    %5 = vector.broadcast %cst_6 : f32 to vector<16x3xf32>
    %6 = tpu.concatenate %4, %1, %5 in 1 : vector<16x3xf32>, vector<16x8xf32>, vector<16x3xf32> -> vector<16x14xf32>
    %7 = vector.extract_strided_slice %6 {offsets = [0, 0], sizes = [16, 8], strides = [1, 1]} : vector<16x14xf32> to vector<16x8xf32>
    %8 = vector.extract_strided_slice %6 {offsets = [0, 1], sizes = [16, 8], strides = [1, 1]} : vector<16x14xf32> to vector<16x8xf32>
    %9 = vector.extract_strided_slice %6 {offsets = [0, 2], sizes = [16, 8], strides = [1, 1]} : vector<16x14xf32> to vector<16x8xf32>
    %10 = vector.extract_strided_slice %6 {offsets = [0, 3], sizes = [16, 8], strides = [1, 1]} : vector<16x14xf32> to vector<16x8xf32>
    %11 = vector.extract_strided_slice %6 {offsets = [0, 4], sizes = [16, 8], strides = [1, 1]} : vector<16x14xf32> to vector<16x8xf32>
    %12 = vector.extract_strided_slice %6 {offsets = [0, 5], sizes = [16, 8], strides = [1, 1]} : vector<16x14xf32> to vector<16x8xf32>
    %13 = vector.extract_strided_slice %6 {offsets = [0, 6], sizes = [16, 8], strides = [1, 1]} : vector<16x14xf32> to vector<16x8xf32>
    %14 = tpu.concatenate %7, %8, %9, %10, %11, %12, %13 in 0 : vector<16x8xf32>, vector<16x8xf32>, vector<16x8xf32>, vector<16x8xf32>, vector<16x8xf32>, vector<16x8xf32>, vector<16x8xf32> -> vector<112x8xf32>
    %15 = arith.truncf %14 : vector<112x8xf32> to vector<112x8xbf16>
    %cst_7 = arith.constant dense<0.000000e+00> : vector<32x8xf32>
    %16 = tpu.matmul %2, %15, %cst_7 {dimension_numbers = #tpu.dot_dimension_numbers<[1], [0], [0], [1], [0, 0, 1, 1], [], []>} : vector<32x112xbf16>, vector<112x8xbf16>, vector<32x8xf32> -> vector<32x8xf32>
    %17 = vector.broadcast %3 : vector<32x1xf32> to vector<32x8xf32>
    %18 = arith.addf %16, %17 : vector<32x8xf32>
    %19 = arith.truncf %18 : vector<32x8xf32> to vector<32x8xbf16>
    %c0_8 = arith.constant 0 : index
    %c0_9 = arith.constant 0 : index
    %c0_10 = arith.constant 0 : index
    %20 = vector.load %arg4[%c0_8, %c0_9, %c0_10] : memref<1x32x8xbf16, #tpu.memory_space<vmem>>, vector<1x32x8xbf16>
    %21 = vector.shape_cast %20 : vector<1x32x8xbf16> to vector<32x8xbf16>
    %22 = vector.shape_cast %19 : vector<32x8xbf16> to vector<1x32x8xbf16>
    tpu.vector_store %arg4[%c0_8, %c0_9, %c0_10], %22 {strides = array<i32>} : memref<1x32x8xbf16, #tpu.memory_space<vmem>>, vector<1x32x8xbf16>,
    return
  }
  func.func @transform_0(%arg0: i32) -> (i32, i32, i32) {
    %c0_i32 = arith.constant 0 : i32
    %c0_i32_0 = arith.constant 0 : i32
    %c0_i32_1 = arith.constant 0 : i32
    return %arg0, %c0_i32, %c0_i32_0 : i32, i32, i32
  }
  func.func @transform_1(%arg0: i32) -> (i32, i32) {
    %c0_i32 = arith.constant 0 : i32
    %c0_i32_0 = arith.constant 0 : i32
    %c0_i32_1 = arith.constant 0 : i32
    return %c0_i32, %c0_i32_0 : i32, i32
  }
  func.func @transform_2(%arg0: i32) -> (i32, i32) {
    %c0_i32 = arith.constant 0 : i32
    %c0_i32_0 = arith.constant 0 : i32
    %c0_i32_1 = arith.constant 0 : i32
    return %c0_i32, %c0_i32_0 : i32, i32
  }
  func.func @transform_3(%arg0: i32) -> (i32, i32, i32) {
    %c0_i32 = arith.constant 0 : i32
    %c0_i32_0 = arith.constant 0 : i32
    %c0_i32_1 = arith.constant 0 : i32
    return %arg0, %c0_i32, %c0_i32_0 : i32, i32, i32
  }
}

module attributes {stable_mosaic.version = 11 : i64} {
  func.func @kernel(%arg0: i32, %arg1: memref<1x32x15xbf16, #tpu.memory_space<vmem>>, %arg2: memref<1x4x17xbf16, #tpu.memory_space<vmem>>, %arg3: memref<16x128xbf16, #tpu.memory_space<vmem>>, %arg4: memref<16x1xf32, #tpu.memory_space<vmem>>, %arg5: memref<16x8xbf16, #tpu.memory_space<vmem>>, %arg6: memref<16x1xf32, #tpu.memory_space<vmem>>, %arg7: memref<2x16x48xbf16, #tpu.memory_space<vmem>>, %arg8: memref<2x16x1xf32, #tpu.memory_space<vmem>>, %arg9: memref<2x16x48xbf16, #tpu.memory_space<vmem>>, %arg10: memref<2x16x1xf32, #tpu.memory_space<vmem>>, %arg11: memref<2x16x112xbf16, #tpu.memory_space<vmem>>, %arg12: memref<2x16x1xf32, #tpu.memory_space<vmem>>, %arg13: memref<2x16x112xbf16, #tpu.memory_space<vmem>>, %arg14: memref<2x16x1xf32, #tpu.memory_space<vmem>>, %arg15: memref<1x16x16xbf16, #tpu.memory_space<vmem>>) attributes {dimension_semantics = [#tpu.dimension_semantics<parallel>], iteration_bounds = array<i64: 2>, scalar_prefetch = 0 : i64, scratch_operands = 0 : i64, tpu.core_type = #tpu.core_type<tc>, window_params = [{transform_indices = @transform_0, window_bounds = array<i64: 1, 32, 15>}, {transform_indices = @transform_1, window_bounds = array<i64: 1, 4, 17>}, {pipeline_mode = #tpu.pipeline_mode<synchronous>, transform_indices = @transform_2, window_bounds = array<i64: 16, 128>}, {pipeline_mode = #tpu.pipeline_mode<synchronous>, transform_indices = @transform_3, window_bounds = array<i64: 16, 1>}, {pipeline_mode = #tpu.pipeline_mode<synchronous>, transform_indices = @transform_4, window_bounds = array<i64: 16, 8>}, {pipeline_mode = #tpu.pipeline_mode<synchronous>, transform_indices = @transform_5, window_bounds = array<i64: 16, 1>}, {pipeline_mode = #tpu.pipeline_mode<synchronous>, transform_indices = @transform_6, window_bounds = array<i64: 2, 16, 48>}, {pipeline_mode = #tpu.pipeline_mode<synchronous>, transform_indices = @transform_7, window_bounds = array<i64: 2, 16, 1>}, {pipeline_mode = #tpu.pipeline_mode<synchronous>, transform_indices = @transform_8, window_bounds = array<i64: 2, 16, 48>}, {pipeline_mode = #tpu.pipeline_mode<synchronous>, transform_indices = @transform_9, window_bounds = array<i64: 2, 16, 1>}, {pipeline_mode = #tpu.pipeline_mode<synchronous>, transform_indices = @transform_10, window_bounds = array<i64: 2, 16, 112>}, {pipeline_mode = #tpu.pipeline_mode<synchronous>, transform_indices = @transform_11, window_bounds = array<i64: 2, 16, 1>}, {pipeline_mode = #tpu.pipeline_mode<synchronous>, transform_indices = @transform_12, window_bounds = array<i64: 2, 16, 112>}, {pipeline_mode = #tpu.pipeline_mode<synchronous>, transform_indices = @transform_13, window_bounds = array<i64: 2, 16, 1>}, {transform_indices = @transform_14, window_bounds = array<i64: 1, 16, 16>}]} {
    %c0 = arith.constant 0 : index
    %c0_0 = arith.constant 0 : index
    %0 = vector.load %arg3[%c0, %c0_0] : memref<16x128xbf16, #tpu.memory_space<vmem>>, vector<16x128xbf16>
    %c0_1 = arith.constant 0 : index
    %c0_2 = arith.constant 0 : index
    %1 = vector.load %arg4[%c0_1, %c0_2] : memref<16x1xf32, #tpu.memory_space<vmem>>, vector<16x1xf32>
    %c0_3 = arith.constant 0 : index
    %c0_4 = arith.constant 0 : index
    %2 = vector.load %arg5[%c0_3, %c0_4] : memref<16x8xbf16, #tpu.memory_space<vmem>>, vector<16x8xbf16>
    %c0_5 = arith.constant 0 : index
    %c0_6 = arith.constant 0 : index
    %3 = vector.load %arg6[%c0_5, %c0_6] : memref<16x1xf32, #tpu.memory_space<vmem>>, vector<16x1xf32>
    %c0_7 = arith.constant 0 : index
    %c0_8 = arith.constant 0 : index
    %c0_9 = arith.constant 0 : index
    %4 = vector.load %arg7[%c0_7, %c0_8, %c0_9] : memref<2x16x48xbf16, #tpu.memory_space<vmem>>, vector<2x16x48xbf16>
    %c0_10 = arith.constant 0 : index
    %c0_11 = arith.constant 0 : index
    %c0_12 = arith.constant 0 : index
    %5 = vector.load %arg8[%c0_10, %c0_11, %c0_12] : memref<2x16x1xf32, #tpu.memory_space<vmem>>, vector<2x16x1xf32>
    %c0_13 = arith.constant 0 : index
    %c0_14 = arith.constant 0 : index
    %c0_15 = arith.constant 0 : index
    %6 = vector.load %arg9[%c0_13, %c0_14, %c0_15] : memref<2x16x48xbf16, #tpu.memory_space<vmem>>, vector<2x16x48xbf16>
    %c0_16 = arith.constant 0 : index
    %c0_17 = arith.constant 0 : index
    %c0_18 = arith.constant 0 : index
    %7 = vector.load %arg10[%c0_16, %c0_17, %c0_18] : memref<2x16x1xf32, #tpu.memory_space<vmem>>, vector<2x16x1xf32>
    %c0_19 = arith.constant 0 : index
    %c0_20 = arith.constant 0 : index
    %c0_21 = arith.constant 0 : index
    %8 = vector.load %arg11[%c0_19, %c0_20, %c0_21] : memref<2x16x112xbf16, #tpu.memory_space<vmem>>, vector<2x16x112xbf16>
    %c0_22 = arith.constant 0 : index
    %c0_23 = arith.constant 0 : index
    %c0_24 = arith.constant 0 : index
    %9 = vector.load %arg12[%c0_22, %c0_23, %c0_24] : memref<2x16x1xf32, #tpu.memory_space<vmem>>, vector<2x16x1xf32>
    %c0_25 = arith.constant 0 : index
    %c0_26 = arith.constant 0 : index
    %c0_27 = arith.constant 0 : index
    %10 = vector.load %arg13[%c0_25, %c0_26, %c0_27] : memref<2x16x112xbf16, #tpu.memory_space<vmem>>, vector<2x16x112xbf16>
    %c0_28 = arith.constant 0 : index
    %c0_29 = arith.constant 0 : index
    %c0_30 = arith.constant 0 : index
    %11 = vector.load %arg14[%c0_28, %c0_29, %c0_30] : memref<2x16x1xf32, #tpu.memory_space<vmem>>, vector<2x16x1xf32>
    %c0_31 = arith.constant 0 : index
    %c0_32 = arith.constant 0 : index
    %c0_33 = arith.constant 0 : index
    %12 = vector.load %arg1[%c0_31, %c0_32, %c0_33] : memref<1x32x15xbf16, #tpu.memory_space<vmem>>, vector<1x32x15xbf16>
    %13 = vector.shape_cast %12 : vector<1x32x15xbf16> to vector<32x15xbf16>
    %14 = arith.extf %13 : vector<32x15xbf16> to vector<32x15xf32>
    %cst = arith.constant 5.000000e-01 : f32
    %15 = vector.broadcast %cst : f32 to vector<32x15xf32>
    %16 = arith.mulf %15, %14 : vector<32x15xf32>
    %cst_34 = arith.constant 5.000000e-01 : f32
    %17 = vector.broadcast %cst_34 : f32 to vector<32x15xf32>
    %18 = arith.mulf %17, %14 : vector<32x15xf32>
    %19 = math.tanh %18 : vector<32x15xf32>
    %cst_35 = arith.constant 1.000000e+00 : f32
    %20 = vector.broadcast %cst_35 : f32 to vector<32x15xf32>
    %21 = arith.addf %20, %19 : vector<32x15xf32>
    %22 = arith.mulf %16, %21 : vector<32x15xf32>
    %cst_36 = arith.constant 0.000000e+00 : f32
    %23 = vector.broadcast %cst_36 : f32 to vector<32x2xf32>
    %cst_37 = arith.constant 0.000000e+00 : f32
    %24 = vector.broadcast %cst_37 : f32 to vector<32x2xf32>
    %25 = tpu.concatenate %23, %22, %24 in 1 : vector<32x2xf32>, vector<32x15xf32>, vector<32x2xf32> -> vector<32x19xf32>
    %26 = vector.extract_strided_slice %25 {offsets = [0, 0], sizes = [32, 16], strides = [1, 1]} : vector<32x19xf32> to vector<32x16xf32>
    %27 = vector.extract_strided_slice %25 {offsets = [0, 1], sizes = [32, 16], strides = [1, 1]} : vector<32x19xf32> to vector<32x16xf32>
    %28 = vector.extract_strided_slice %25 {offsets = [0, 2], sizes = [32, 16], strides = [1, 1]} : vector<32x19xf32> to vector<32x16xf32>
    %29 = vector.extract_strided_slice %25 {offsets = [0, 3], sizes = [32, 16], strides = [1, 1]} : vector<32x19xf32> to vector<32x16xf32>
    %30 = tpu.concatenate %26, %27, %28, %29 in 0 : vector<32x16xf32>, vector<32x16xf32>, vector<32x16xf32>, vector<32x16xf32> -> vector<128x16xf32>
    %31 = arith.truncf %30 : vector<128x16xf32> to vector<128x16xbf16>
    %cst_38 = arith.constant dense<0.000000e+00> : vector<16x16xf32>
    %32 = tpu.matmul %0, %31, %cst_38 {dimension_numbers = #tpu.dot_dimension_numbers<[1], [0], [0], [1], [0, 0, 1, 1], [], []>} : vector<16x128xbf16>, vector<128x16xbf16>, vector<16x16xf32> -> vector<16x16xf32>
    %33 = vector.broadcast %1 : vector<16x1xf32> to vector<16x16xf32>
    %34 = arith.addf %32, %33 : vector<16x16xf32>
    %c0_39 = arith.constant 0 : index
    %c0_40 = arith.constant 0 : index
    %c0_41 = arith.constant 0 : index
    %35 = vector.load %arg2[%c0_39, %c0_40, %c0_41] : memref<1x4x17xbf16, #tpu.memory_space<vmem>>, vector<1x4x17xbf16>
    %36 = vector.shape_cast %35 : vector<1x4x17xbf16> to vector<4x17xbf16>
    %37 = arith.extf %36 : vector<4x17xbf16> to vector<4x17xf32>
    %38 = vector.extract_strided_slice %37 {offsets = [0, 0], sizes = [1, 16], strides = [1, 1]} : vector<4x17xf32> to vector<1x16xf32>
    %39 = vector.extract_strided_slice %37 {offsets = [1, 0], sizes = [1, 16], strides = [1, 1]} : vector<4x17xf32> to vector<1x16xf32>
    %40 = vector.extract_strided_slice %37 {offsets = [2, 0], sizes = [1, 16], strides = [1, 1]} : vector<4x17xf32> to vector<1x16xf32>
    %41 = vector.extract_strided_slice %37 {offsets = [3, 0], sizes = [1, 16], strides = [1, 1]} : vector<4x17xf32> to vector<1x16xf32>
    %42 = vector.extract_strided_slice %37 {offsets = [0, 1], sizes = [1, 16], strides = [1, 1]} : vector<4x17xf32> to vector<1x16xf32>
    %43 = vector.extract_strided_slice %37 {offsets = [1, 1], sizes = [1, 16], strides = [1, 1]} : vector<4x17xf32> to vector<1x16xf32>
    %44 = vector.extract_strided_slice %37 {offsets = [2, 1], sizes = [1, 16], strides = [1, 1]} : vector<4x17xf32> to vector<1x16xf32>
    %45 = vector.extract_strided_slice %37 {offsets = [3, 1], sizes = [1, 16], strides = [1, 1]} : vector<4x17xf32> to vector<1x16xf32>
    %46 = tpu.concatenate %38, %39, %40, %41, %42, %43, %44, %45 in 0 : vector<1x16xf32>, vector<1x16xf32>, vector<1x16xf32>, vector<1x16xf32>, vector<1x16xf32>, vector<1x16xf32>, vector<1x16xf32>, vector<1x16xf32> -> vector<8x16xf32>
    %47 = arith.truncf %46 : vector<8x16xf32> to vector<8x16xbf16>
    %cst_42 = arith.constant dense<0.000000e+00> : vector<16x16xf32>
    %48 = tpu.matmul %2, %47, %cst_42 {dimension_numbers = #tpu.dot_dimension_numbers<[1], [0], [0], [1], [0, 0, 1, 1], [], []>} : vector<16x8xbf16>, vector<8x16xbf16>, vector<16x16xf32> -> vector<16x16xf32>
    %49 = arith.addf %34, %48 : vector<16x16xf32>
    %50 = vector.broadcast %3 : vector<16x1xf32> to vector<16x16xf32>
    %51 = arith.addf %49, %50 : vector<16x16xf32>
    %cst_43 = arith.constant 5.000000e-01 : f32
    %52 = vector.broadcast %cst_43 : f32 to vector<16x16xf32>
    %53 = arith.mulf %52, %51 : vector<16x16xf32>
    %cst_44 = arith.constant 5.000000e-01 : f32
    %54 = vector.broadcast %cst_44 : f32 to vector<16x16xf32>
    %55 = arith.mulf %54, %51 : vector<16x16xf32>
    %56 = math.tanh %55 : vector<16x16xf32>
    %cst_45 = arith.constant 1.000000e+00 : f32
    %57 = vector.broadcast %cst_45 : f32 to vector<16x16xf32>
    %58 = arith.addf %57, %56 : vector<16x16xf32>
    %59 = arith.mulf %53, %58 : vector<16x16xf32>
    %60 = vector.extract_strided_slice %4 {offsets = [0, 0, 0], sizes = [1, 16, 48], strides = [1, 1, 1]} : vector<2x16x48xbf16> to vector<1x16x48xbf16>
    %61 = vector.shape_cast %60 : vector<1x16x48xbf16> to vector<16x48xbf16>
    %62 = vector.extract_strided_slice %5 {offsets = [0, 0, 0], sizes = [1, 16, 1], strides = [1, 1, 1]} : vector<2x16x1xf32> to vector<1x16x1xf32>
    %63 = vector.shape_cast %62 : vector<1x16x1xf32> to vector<16x1xf32>
    %cst_46 = arith.constant 0.000000e+00 : f32
    %64 = vector.broadcast %cst_46 : f32 to vector<16x1xf32>
    %cst_47 = arith.constant 0.000000e+00 : f32
    %65 = vector.broadcast %cst_47 : f32 to vector<16x1xf32>
    %66 = tpu.concatenate %64, %59, %65 in 1 : vector<16x1xf32>, vector<16x16xf32>, vector<16x1xf32> -> vector<16x18xf32>
    %67 = vector.extract_strided_slice %66 {offsets = [0, 0], sizes = [16, 16], strides = [1, 1]} : vector<16x18xf32> to vector<16x16xf32>
    %68 = vector.extract_strided_slice %66 {offsets = [0, 1], sizes = [16, 16], strides = [1, 1]} : vector<16x18xf32> to vector<16x16xf32>
    %69 = vector.extract_strided_slice %66 {offsets = [0, 2], sizes = [16, 16], strides = [1, 1]} : vector<16x18xf32> to vector<16x16xf32>
    %70 = tpu.concatenate %67, %68, %69 in 0 : vector<16x16xf32>, vector<16x16xf32>, vector<16x16xf32> -> vector<48x16xf32>
    %71 = arith.truncf %70 : vector<48x16xf32> to vector<48x16xbf16>
    %cst_48 = arith.constant dense<0.000000e+00> : vector<16x16xf32>
    %72 = tpu.matmul %61, %71, %cst_48 {dimension_numbers = #tpu.dot_dimension_numbers<[1], [0], [0], [1], [0, 0, 1, 1], [], []>} : vector<16x48xbf16>, vector<48x16xbf16>, vector<16x16xf32> -> vector<16x16xf32>
    %73 = vector.broadcast %63 : vector<16x1xf32> to vector<16x16xf32>
    %74 = arith.addf %72, %73 : vector<16x16xf32>
    %cst_49 = arith.constant 5.000000e-01 : f32
    %75 = vector.broadcast %cst_49 : f32 to vector<16x16xf32>
    %76 = arith.mulf %75, %74 : vector<16x16xf32>
    %cst_50 = arith.constant 5.000000e-01 : f32
    %77 = vector.broadcast %cst_50 : f32 to vector<16x16xf32>
    %78 = arith.mulf %77, %74 : vector<16x16xf32>
    %79 = math.tanh %78 : vector<16x16xf32>
    %cst_51 = arith.constant 1.000000e+00 : f32
    %80 = vector.broadcast %cst_51 : f32 to vector<16x16xf32>
    %81 = arith.addf %80, %79 : vector<16x16xf32>
    %82 = arith.mulf %76, %81 : vector<16x16xf32>
    %83 = vector.extract_strided_slice %6 {offsets = [0, 0, 0], sizes = [1, 16, 48], strides = [1, 1, 1]} : vector<2x16x48xbf16> to vector<1x16x48xbf16>
    %84 = vector.shape_cast %83 : vector<1x16x48xbf16> to vector<16x48xbf16>
    %85 = vector.extract_strided_slice %7 {offsets = [0, 0, 0], sizes = [1, 16, 1], strides = [1, 1, 1]} : vector<2x16x1xf32> to vector<1x16x1xf32>
    %86 = vector.shape_cast %85 : vector<1x16x1xf32> to vector<16x1xf32>
    %cst_52 = arith.constant 0.000000e+00 : f32
    %87 = vector.broadcast %cst_52 : f32 to vector<16x1xf32>
    %cst_53 = arith.constant 0.000000e+00 : f32
    %88 = vector.broadcast %cst_53 : f32 to vector<16x1xf32>
    %89 = tpu.concatenate %87, %82, %88 in 1 : vector<16x1xf32>, vector<16x16xf32>, vector<16x1xf32> -> vector<16x18xf32>
    %90 = vector.extract_strided_slice %89 {offsets = [0, 0], sizes = [16, 16], strides = [1, 1]} : vector<16x18xf32> to vector<16x16xf32>
    %91 = vector.extract_strided_slice %89 {offsets = [0, 1], sizes = [16, 16], strides = [1, 1]} : vector<16x18xf32> to vector<16x16xf32>
    %92 = vector.extract_strided_slice %89 {offsets = [0, 2], sizes = [16, 16], strides = [1, 1]} : vector<16x18xf32> to vector<16x16xf32>
    %93 = tpu.concatenate %90, %91, %92 in 0 : vector<16x16xf32>, vector<16x16xf32>, vector<16x16xf32> -> vector<48x16xf32>
    %94 = arith.truncf %93 : vector<48x16xf32> to vector<48x16xbf16>
    %cst_54 = arith.constant dense<0.000000e+00> : vector<16x16xf32>
    %95 = tpu.matmul %84, %94, %cst_54 {dimension_numbers = #tpu.dot_dimension_numbers<[1], [0], [0], [1], [0, 0, 1, 1], [], []>} : vector<16x48xbf16>, vector<48x16xbf16>, vector<16x16xf32> -> vector<16x16xf32>
    %96 = vector.broadcast %86 : vector<16x1xf32> to vector<16x16xf32>
    %97 = arith.addf %95, %96 : vector<16x16xf32>
    %98 = arith.addf %51, %97 : vector<16x16xf32>
    %cst_55 = arith.constant 5.000000e-01 : f32
    %99 = vector.broadcast %cst_55 : f32 to vector<16x16xf32>
    %100 = arith.mulf %99, %98 : vector<16x16xf32>
    %cst_56 = arith.constant 5.000000e-01 : f32
    %101 = vector.broadcast %cst_56 : f32 to vector<16x16xf32>
    %102 = arith.mulf %101, %98 : vector<16x16xf32>
    %103 = math.tanh %102 : vector<16x16xf32>
    %cst_57 = arith.constant 1.000000e+00 : f32
    %104 = vector.broadcast %cst_57 : f32 to vector<16x16xf32>
    %105 = arith.addf %104, %103 : vector<16x16xf32>
    %106 = arith.mulf %100, %105 : vector<16x16xf32>
    %107 = vector.extract_strided_slice %4 {offsets = [1, 0, 0], sizes = [1, 16, 48], strides = [1, 1, 1]} : vector<2x16x48xbf16> to vector<1x16x48xbf16>
    %108 = vector.shape_cast %107 : vector<1x16x48xbf16> to vector<16x48xbf16>
    %109 = vector.extract_strided_slice %5 {offsets = [1, 0, 0], sizes = [1, 16, 1], strides = [1, 1, 1]} : vector<2x16x1xf32> to vector<1x16x1xf32>
    %110 = vector.shape_cast %109 : vector<1x16x1xf32> to vector<16x1xf32>
    %cst_58 = arith.constant 0.000000e+00 : f32
    %111 = vector.broadcast %cst_58 : f32 to vector<16x3xf32>
    %cst_59 = arith.constant 0.000000e+00 : f32
    %112 = vector.broadcast %cst_59 : f32 to vector<16x3xf32>
    %113 = tpu.concatenate %111, %106, %112 in 1 : vector<16x3xf32>, vector<16x16xf32>, vector<16x3xf32> -> vector<16x22xf32>
    %114 = vector.extract_strided_slice %113 {offsets = [0, 0], sizes = [16, 16], strides = [1, 1]} : vector<16x22xf32> to vector<16x16xf32>
    %115 = vector.extract_strided_slice %113 {offsets = [0, 3], sizes = [16, 16], strides = [1, 1]} : vector<16x22xf32> to vector<16x16xf32>
    %116 = vector.extract_strided_slice %113 {offsets = [0, 6], sizes = [16, 16], strides = [1, 1]} : vector<16x22xf32> to vector<16x16xf32>
    %117 = tpu.concatenate %114, %115, %116 in 0 : vector<16x16xf32>, vector<16x16xf32>, vector<16x16xf32> -> vector<48x16xf32>
    %118 = arith.truncf %117 : vector<48x16xf32> to vector<48x16xbf16>
    %cst_60 = arith.constant dense<0.000000e+00> : vector<16x16xf32>
    %119 = tpu.matmul %108, %118, %cst_60 {dimension_numbers = #tpu.dot_dimension_numbers<[1], [0], [0], [1], [0, 0, 1, 1], [], []>} : vector<16x48xbf16>, vector<48x16xbf16>, vector<16x16xf32> -> vector<16x16xf32>
    %120 = vector.broadcast %110 : vector<16x1xf32> to vector<16x16xf32>
    %121 = arith.addf %119, %120 : vector<16x16xf32>
    %cst_61 = arith.constant 5.000000e-01 : f32
    %122 = vector.broadcast %cst_61 : f32 to vector<16x16xf32>
    %123 = arith.mulf %122, %121 : vector<16x16xf32>
    %cst_62 = arith.constant 5.000000e-01 : f32
    %124 = vector.broadcast %cst_62 : f32 to vector<16x16xf32>
    %125 = arith.mulf %124, %121 : vector<16x16xf32>
    %126 = math.tanh %125 : vector<16x16xf32>
    %cst_63 = arith.constant 1.000000e+00 : f32
    %127 = vector.broadcast %cst_63 : f32 to vector<16x16xf32>
    %128 = arith.addf %127, %126 : vector<16x16xf32>
    %129 = arith.mulf %123, %128 : vector<16x16xf32>
    %130 = vector.extract_strided_slice %6 {offsets = [1, 0, 0], sizes = [1, 16, 48], strides = [1, 1, 1]} : vector<2x16x48xbf16> to vector<1x16x48xbf16>
    %131 = vector.shape_cast %130 : vector<1x16x48xbf16> to vector<16x48xbf16>
    %132 = vector.extract_strided_slice %7 {offsets = [1, 0, 0], sizes = [1, 16, 1], strides = [1, 1, 1]} : vector<2x16x1xf32> to vector<1x16x1xf32>
    %133 = vector.shape_cast %132 : vector<1x16x1xf32> to vector<16x1xf32>
    %cst_64 = arith.constant 0.000000e+00 : f32
    %134 = vector.broadcast %cst_64 : f32 to vector<16x1xf32>
    %cst_65 = arith.constant 0.000000e+00 : f32
    %135 = vector.broadcast %cst_65 : f32 to vector<16x1xf32>
    %136 = tpu.concatenate %134, %129, %135 in 1 : vector<16x1xf32>, vector<16x16xf32>, vector<16x1xf32> -> vector<16x18xf32>
    %137 = vector.extract_strided_slice %136 {offsets = [0, 0], sizes = [16, 16], strides = [1, 1]} : vector<16x18xf32> to vector<16x16xf32>
    %138 = vector.extract_strided_slice %136 {offsets = [0, 1], sizes = [16, 16], strides = [1, 1]} : vector<16x18xf32> to vector<16x16xf32>
    %139 = vector.extract_strided_slice %136 {offsets = [0, 2], sizes = [16, 16], strides = [1, 1]} : vector<16x18xf32> to vector<16x16xf32>
    %140 = tpu.concatenate %137, %138, %139 in 0 : vector<16x16xf32>, vector<16x16xf32>, vector<16x16xf32> -> vector<48x16xf32>
    %141 = arith.truncf %140 : vector<48x16xf32> to vector<48x16xbf16>
    %cst_66 = arith.constant dense<0.000000e+00> : vector<16x16xf32>
    %142 = tpu.matmul %131, %141, %cst_66 {dimension_numbers = #tpu.dot_dimension_numbers<[1], [0], [0], [1], [0, 0, 1, 1], [], []>} : vector<16x48xbf16>, vector<48x16xbf16>, vector<16x16xf32> -> vector<16x16xf32>
    %143 = vector.broadcast %133 : vector<16x1xf32> to vector<16x16xf32>
    %144 = arith.addf %142, %143 : vector<16x16xf32>
    %145 = arith.addf %98, %144 : vector<16x16xf32>
    %146 = vector.extract_strided_slice %8 {offsets = [0, 0, 0], sizes = [1, 16, 112], strides = [1, 1, 1]} : vector<2x16x112xbf16> to vector<1x16x112xbf16>
    %147 = vector.shape_cast %146 : vector<1x16x112xbf16> to vector<16x112xbf16>
    %148 = vector.extract_strided_slice %9 {offsets = [0, 0, 0], sizes = [1, 16, 1], strides = [1, 1, 1]} : vector<2x16x1xf32> to vector<1x16x1xf32>
    %149 = vector.shape_cast %148 : vector<1x16x1xf32> to vector<16x1xf32>
    %cst_67 = arith.constant 0.000000e+00 : f32
    %150 = vector.broadcast %cst_67 : f32 to vector<16x3xf32>
    %cst_68 = arith.constant 0.000000e+00 : f32
    %151 = vector.broadcast %cst_68 : f32 to vector<16x3xf32>
    %152 = tpu.concatenate %150, %59, %151 in 1 : vector<16x3xf32>, vector<16x16xf32>, vector<16x3xf32> -> vector<16x22xf32>
    %153 = vector.extract_strided_slice %152 {offsets = [0, 0], sizes = [16, 16], strides = [1, 1]} : vector<16x22xf32> to vector<16x16xf32>
    %154 = vector.extract_strided_slice %152 {offsets = [0, 1], sizes = [16, 16], strides = [1, 1]} : vector<16x22xf32> to vector<16x16xf32>
    %155 = vector.extract_strided_slice %152 {offsets = [0, 2], sizes = [16, 16], strides = [1, 1]} : vector<16x22xf32> to vector<16x16xf32>
    %156 = vector.extract_strided_slice %152 {offsets = [0, 3], sizes = [16, 16], strides = [1, 1]} : vector<16x22xf32> to vector<16x16xf32>
    %157 = vector.extract_strided_slice %152 {offsets = [0, 4], sizes = [16, 16], strides = [1, 1]} : vector<16x22xf32> to vector<16x16xf32>
    %158 = vector.extract_strided_slice %152 {offsets = [0, 5], sizes = [16, 16], strides = [1, 1]} : vector<16x22xf32> to vector<16x16xf32>
    %159 = vector.extract_strided_slice %152 {offsets = [0, 6], sizes = [16, 16], strides = [1, 1]} : vector<16x22xf32> to vector<16x16xf32>
    %160 = tpu.concatenate %153, %154, %155, %156, %157, %158, %159 in 0 : vector<16x16xf32>, vector<16x16xf32>, vector<16x16xf32>, vector<16x16xf32>, vector<16x16xf32>, vector<16x16xf32>, vector<16x16xf32> -> vector<112x16xf32>
    %161 = arith.truncf %160 : vector<112x16xf32> to vector<112x16xbf16>
    %cst_69 = arith.constant dense<0.000000e+00> : vector<16x16xf32>
    %162 = tpu.matmul %147, %161, %cst_69 {dimension_numbers = #tpu.dot_dimension_numbers<[1], [0], [0], [1], [0, 0, 1, 1], [], []>} : vector<16x112xbf16>, vector<112x16xbf16>, vector<16x16xf32> -> vector<16x16xf32>
    %163 = vector.broadcast %149 : vector<16x1xf32> to vector<16x16xf32>
    %164 = arith.addf %162, %163 : vector<16x16xf32>
    %cst_70 = arith.constant 5.000000e-01 : f32
    %165 = vector.broadcast %cst_70 : f32 to vector<16x16xf32>
    %166 = arith.mulf %165, %164 : vector<16x16xf32>
    %cst_71 = arith.constant 5.000000e-01 : f32
    %167 = vector.broadcast %cst_71 : f32 to vector<16x16xf32>
    %168 = arith.mulf %167, %164 : vector<16x16xf32>
    %169 = math.tanh %168 : vector<16x16xf32>
    %cst_72 = arith.constant 1.000000e+00 : f32
    %170 = vector.broadcast %cst_72 : f32 to vector<16x16xf32>
    %171 = arith.addf %170, %169 : vector<16x16xf32>
    %172 = arith.mulf %166, %171 : vector<16x16xf32>
    %173 = vector.extract_strided_slice %10 {offsets = [0, 0, 0], sizes = [1, 16, 112], strides = [1, 1, 1]} : vector<2x16x112xbf16> to vector<1x16x112xbf16>
    %174 = vector.shape_cast %173 : vector<1x16x112xbf16> to vector<16x112xbf16>
    %175 = vector.extract_strided_slice %11 {offsets = [0, 0, 0], sizes = [1, 16, 1], strides = [1, 1, 1]} : vector<2x16x1xf32> to vector<1x16x1xf32>
    %176 = vector.shape_cast %175 : vector<1x16x1xf32> to vector<16x1xf32>
    %cst_73 = arith.constant 0.000000e+00 : f32
    %177 = vector.broadcast %cst_73 : f32 to vector<16x3xf32>
    %cst_74 = arith.constant 0.000000e+00 : f32
    %178 = vector.broadcast %cst_74 : f32 to vector<16x3xf32>
    %179 = tpu.concatenate %177, %172, %178 in 1 : vector<16x3xf32>, vector<16x16xf32>, vector<16x3xf32> -> vector<16x22xf32>
    %180 = vector.extract_strided_slice %179 {offsets = [0, 0], sizes = [16, 16], strides = [1, 1]} : vector<16x22xf32> to vector<16x16xf32>
    %181 = vector.extract_strided_slice %179 {offsets = [0, 1], sizes = [16, 16], strides = [1, 1]} : vector<16x22xf32> to vector<16x16xf32>
    %182 = vector.extract_strided_slice %179 {offsets = [0, 2], sizes = [16, 16], strides = [1, 1]} : vector<16x22xf32> to vector<16x16xf32>
    %183 = vector.extract_strided_slice %179 {offsets = [0, 3], sizes = [16, 16], strides = [1, 1]} : vector<16x22xf32> to vector<16x16xf32>
    %184 = vector.extract_strided_slice %179 {offsets = [0, 4], sizes = [16, 16], strides = [1, 1]} : vector<16x22xf32> to vector<16x16xf32>
    %185 = vector.extract_strided_slice %179 {offsets = [0, 5], sizes = [16, 16], strides = [1, 1]} : vector<16x22xf32> to vector<16x16xf32>
    %186 = vector.extract_strided_slice %179 {offsets = [0, 6], sizes = [16, 16], strides = [1, 1]} : vector<16x22xf32> to vector<16x16xf32>
    %187 = tpu.concatenate %180, %181, %182, %183, %184, %185, %186 in 0 : vector<16x16xf32>, vector<16x16xf32>, vector<16x16xf32>, vector<16x16xf32>, vector<16x16xf32>, vector<16x16xf32>, vector<16x16xf32> -> vector<112x16xf32>
    %188 = arith.truncf %187 : vector<112x16xf32> to vector<112x16xbf16>
    %cst_75 = arith.constant dense<0.000000e+00> : vector<16x16xf32>
    %189 = tpu.matmul %174, %188, %cst_75 {dimension_numbers = #tpu.dot_dimension_numbers<[1], [0], [0], [1], [0, 0, 1, 1], [], []>} : vector<16x112xbf16>, vector<112x16xbf16>, vector<16x16xf32> -> vector<16x16xf32>
    %190 = vector.broadcast %176 : vector<16x1xf32> to vector<16x16xf32>
    %191 = arith.addf %189, %190 : vector<16x16xf32>
    %192 = arith.addf %51, %191 : vector<16x16xf32>
    %cst_76 = arith.constant 5.000000e-01 : f32
    %193 = vector.broadcast %cst_76 : f32 to vector<16x16xf32>
    %194 = arith.mulf %193, %192 : vector<16x16xf32>
    %cst_77 = arith.constant 5.000000e-01 : f32
    %195 = vector.broadcast %cst_77 : f32 to vector<16x16xf32>
    %196 = arith.mulf %195, %192 : vector<16x16xf32>
    %197 = math.tanh %196 : vector<16x16xf32>
    %cst_78 = arith.constant 1.000000e+00 : f32
    %198 = vector.broadcast %cst_78 : f32 to vector<16x16xf32>
    %199 = arith.addf %198, %197 : vector<16x16xf32>
    %200 = arith.mulf %194, %199 : vector<16x16xf32>
    %201 = vector.extract_strided_slice %8 {offsets = [1, 0, 0], sizes = [1, 16, 112], strides = [1, 1, 1]} : vector<2x16x112xbf16> to vector<1x16x112xbf16>
    %202 = vector.shape_cast %201 : vector<1x16x112xbf16> to vector<16x112xbf16>
    %203 = vector.extract_strided_slice %9 {offsets = [1, 0, 0], sizes = [1, 16, 1], strides = [1, 1, 1]} : vector<2x16x1xf32> to vector<1x16x1xf32>
    %204 = vector.shape_cast %203 : vector<1x16x1xf32> to vector<16x1xf32>
    %cst_79 = arith.constant 0.000000e+00 : f32
    %205 = vector.broadcast %cst_79 : f32 to vector<16x9xf32>
    %cst_80 = arith.constant 0.000000e+00 : f32
    %206 = vector.broadcast %cst_80 : f32 to vector<16x9xf32>
    %207 = tpu.concatenate %205, %200, %206 in 1 : vector<16x9xf32>, vector<16x16xf32>, vector<16x9xf32> -> vector<16x34xf32>
    %208 = vector.extract_strided_slice %207 {offsets = [0, 0], sizes = [16, 16], strides = [1, 1]} : vector<16x34xf32> to vector<16x16xf32>
    %209 = vector.extract_strided_slice %207 {offsets = [0, 3], sizes = [16, 16], strides = [1, 1]} : vector<16x34xf32> to vector<16x16xf32>
    %210 = vector.extract_strided_slice %207 {offsets = [0, 6], sizes = [16, 16], strides = [1, 1]} : vector<16x34xf32> to vector<16x16xf32>
    %211 = vector.extract_strided_slice %207 {offsets = [0, 9], sizes = [16, 16], strides = [1, 1]} : vector<16x34xf32> to vector<16x16xf32>
    %212 = vector.extract_strided_slice %207 {offsets = [0, 12], sizes = [16, 16], strides = [1, 1]} : vector<16x34xf32> to vector<16x16xf32>
    %213 = vector.extract_strided_slice %207 {offsets = [0, 15], sizes = [16, 16], strides = [1, 1]} : vector<16x34xf32> to vector<16x16xf32>
    %214 = vector.extract_strided_slice %207 {offsets = [0, 18], sizes = [16, 16], strides = [1, 1]} : vector<16x34xf32> to vector<16x16xf32>
    %215 = tpu.concatenate %208, %209, %210, %211, %212, %213, %214 in 0 : vector<16x16xf32>, vector<16x16xf32>, vector<16x16xf32>, vector<16x16xf32>, vector<16x16xf32>, vector<16x16xf32>, vector<16x16xf32> -> vector<112x16xf32>
    %216 = arith.truncf %215 : vector<112x16xf32> to vector<112x16xbf16>
    %cst_81 = arith.constant dense<0.000000e+00> : vector<16x16xf32>
    %217 = tpu.matmul %202, %216, %cst_81 {dimension_numbers = #tpu.dot_dimension_numbers<[1], [0], [0], [1], [0, 0, 1, 1], [], []>} : vector<16x112xbf16>, vector<112x16xbf16>, vector<16x16xf32> -> vector<16x16xf32>
    %218 = vector.broadcast %204 : vector<16x1xf32> to vector<16x16xf32>
    %219 = arith.addf %217, %218 : vector<16x16xf32>
    %cst_82 = arith.constant 5.000000e-01 : f32
    %220 = vector.broadcast %cst_82 : f32 to vector<16x16xf32>
    %221 = arith.mulf %220, %219 : vector<16x16xf32>
    %cst_83 = arith.constant 5.000000e-01 : f32
    %222 = vector.broadcast %cst_83 : f32 to vector<16x16xf32>
    %223 = arith.mulf %222, %219 : vector<16x16xf32>
    %224 = math.tanh %223 : vector<16x16xf32>
    %cst_84 = arith.constant 1.000000e+00 : f32
    %225 = vector.broadcast %cst_84 : f32 to vector<16x16xf32>
    %226 = arith.addf %225, %224 : vector<16x16xf32>
    %227 = arith.mulf %221, %226 : vector<16x16xf32>
    %228 = vector.extract_strided_slice %10 {offsets = [1, 0, 0], sizes = [1, 16, 112], strides = [1, 1, 1]} : vector<2x16x112xbf16> to vector<1x16x112xbf16>
    %229 = vector.shape_cast %228 : vector<1x16x112xbf16> to vector<16x112xbf16>
    %230 = vector.extract_strided_slice %11 {offsets = [1, 0, 0], sizes = [1, 16, 1], strides = [1, 1, 1]} : vector<2x16x1xf32> to vector<1x16x1xf32>
    %231 = vector.shape_cast %230 : vector<1x16x1xf32> to vector<16x1xf32>
    %cst_85 = arith.constant 0.000000e+00 : f32
    %232 = vector.broadcast %cst_85 : f32 to vector<16x3xf32>
    %cst_86 = arith.constant 0.000000e+00 : f32
    %233 = vector.broadcast %cst_86 : f32 to vector<16x3xf32>
    %234 = tpu.concatenate %232, %227, %233 in 1 : vector<16x3xf32>, vector<16x16xf32>, vector<16x3xf32> -> vector<16x22xf32>
    %235 = vector.extract_strided_slice %234 {offsets = [0, 0], sizes = [16, 16], strides = [1, 1]} : vector<16x22xf32> to vector<16x16xf32>
    %236 = vector.extract_strided_slice %234 {offsets = [0, 1], sizes = [16, 16], strides = [1, 1]} : vector<16x22xf32> to vector<16x16xf32>
    %237 = vector.extract_strided_slice %234 {offsets = [0, 2], sizes = [16, 16], strides = [1, 1]} : vector<16x22xf32> to vector<16x16xf32>
    %238 = vector.extract_strided_slice %234 {offsets = [0, 3], sizes = [16, 16], strides = [1, 1]} : vector<16x22xf32> to vector<16x16xf32>
    %239 = vector.extract_strided_slice %234 {offsets = [0, 4], sizes = [16, 16], strides = [1, 1]} : vector<16x22xf32> to vector<16x16xf32>
    %240 = vector.extract_strided_slice %234 {offsets = [0, 5], sizes = [16, 16], strides = [1, 1]} : vector<16x22xf32> to vector<16x16xf32>
    %241 = vector.extract_strided_slice %234 {offsets = [0, 6], sizes = [16, 16], strides = [1, 1]} : vector<16x22xf32> to vector<16x16xf32>
    %242 = tpu.concatenate %235, %236, %237, %238, %239, %240, %241 in 0 : vector<16x16xf32>, vector<16x16xf32>, vector<16x16xf32>, vector<16x16xf32>, vector<16x16xf32>, vector<16x16xf32>, vector<16x16xf32> -> vector<112x16xf32>
    %243 = arith.truncf %242 : vector<112x16xf32> to vector<112x16xbf16>
    %cst_87 = arith.constant dense<0.000000e+00> : vector<16x16xf32>
    %244 = tpu.matmul %229, %243, %cst_87 {dimension_numbers = #tpu.dot_dimension_numbers<[1], [0], [0], [1], [0, 0, 1, 1], [], []>} : vector<16x112xbf16>, vector<112x16xbf16>, vector<16x16xf32> -> vector<16x16xf32>
    %245 = vector.broadcast %231 : vector<16x1xf32> to vector<16x16xf32>
    %246 = arith.addf %244, %245 : vector<16x16xf32>
    %247 = arith.addf %192, %246 : vector<16x16xf32>
    %248 = arith.addf %145, %247 : vector<16x16xf32>
    %cst_88 = arith.constant 5.000000e-01 : f32
    %249 = vector.broadcast %cst_88 : f32 to vector<16x16xf32>
    %250 = arith.mulf %248, %249 : vector<16x16xf32>
    %251 = arith.truncf %250 : vector<16x16xf32> to vector<16x16xbf16>
    %c0_89 = arith.constant 0 : index
    %c0_90 = arith.constant 0 : index
    %c0_91 = arith.constant 0 : index
    %252 = vector.load %arg15[%c0_89, %c0_90, %c0_91] : memref<1x16x16xbf16, #tpu.memory_space<vmem>>, vector<1x16x16xbf16>
    %253 = vector.shape_cast %252 : vector<1x16x16xbf16> to vector<16x16xbf16>
    %254 = vector.shape_cast %251 : vector<16x16xbf16> to vector<1x16x16xbf16>
    tpu.vector_store %arg15[%c0_89, %c0_90, %c0_91], %254 {strides = array<i32>} : memref<1x16x16xbf16, #tpu.memory_space<vmem>>, vector<1x16x16xbf16>,
    return
  }
  func.func @transform_0(%arg0: i32) -> (i32, i32, i32) {
    %c0_i32 = arith.constant 0 : i32
    %c0_i32_0 = arith.constant 0 : i32
    %c0_i32_1 = arith.constant 0 : i32
    return %arg0, %c0_i32, %c0_i32_0 : i32, i32, i32
  }
  func.func @transform_1(%arg0: i32) -> (i32, i32, i32) {
    %c0_i32 = arith.constant 0 : i32
    %c0_i32_0 = arith.constant 0 : i32
    %c0_i32_1 = arith.constant 0 : i32
    return %arg0, %c0_i32, %c0_i32_0 : i32, i32, i32
  }
  func.func @transform_2(%arg0: i32) -> (i32, i32) {
    %c0_i32 = arith.constant 0 : i32
    %c0_i32_0 = arith.constant 0 : i32
    %c0_i32_1 = arith.constant 0 : i32
    return %c0_i32, %c0_i32_0 : i32, i32
  }
  func.func @transform_3(%arg0: i32) -> (i32, i32) {
    %c0_i32 = arith.constant 0 : i32
    %c0_i32_0 = arith.constant 0 : i32
    %c0_i32_1 = arith.constant 0 : i32
    return %c0_i32, %c0_i32_0 : i32, i32
  }
  func.func @transform_4(%arg0: i32) -> (i32, i32) {
    %c0_i32 = arith.constant 0 : i32
    %c0_i32_0 = arith.constant 0 : i32
    %c0_i32_1 = arith.constant 0 : i32
    return %c0_i32, %c0_i32_0 : i32, i32
  }
  func.func @transform_5(%arg0: i32) -> (i32, i32) {
    %c0_i32 = arith.constant 0 : i32
    %c0_i32_0 = arith.constant 0 : i32
    %c0_i32_1 = arith.constant 0 : i32
    return %c0_i32, %c0_i32_0 : i32, i32
  }
  func.func @transform_6(%arg0: i32) -> (i32, i32, i32) {
    %c0_i32 = arith.constant 0 : i32
    %c0_i32_0 = arith.constant 0 : i32
    %c0_i32_1 = arith.constant 0 : i32
    %c0_i32_2 = arith.constant 0 : i32
    return %c0_i32, %c0_i32_0, %c0_i32_1 : i32, i32, i32
  }
  func.func @transform_7(%arg0: i32) -> (i32, i32, i32) {
    %c0_i32 = arith.constant 0 : i32
    %c0_i32_0 = arith.constant 0 : i32
    %c0_i32_1 = arith.constant 0 : i32
    %c0_i32_2 = arith.constant 0 : i32
    return %c0_i32, %c0_i32_0, %c0_i32_1 : i32, i32, i32
  }
  func.func @transform_8(%arg0: i32) -> (i32, i32, i32) {
    %c0_i32 = arith.constant 0 : i32
    %c0_i32_0 = arith.constant 0 : i32
    %c0_i32_1 = arith.constant 0 : i32
    %c0_i32_2 = arith.constant 0 : i32
    return %c0_i32, %c0_i32_0, %c0_i32_1 : i32, i32, i32
  }
  func.func @transform_9(%arg0: i32) -> (i32, i32, i32) {
    %c0_i32 = arith.constant 0 : i32
    %c0_i32_0 = arith.constant 0 : i32
    %c0_i32_1 = arith.constant 0 : i32
    %c0_i32_2 = arith.constant 0 : i32
    return %c0_i32, %c0_i32_0, %c0_i32_1 : i32, i32, i32
  }
  func.func @transform_10(%arg0: i32) -> (i32, i32, i32) {
    %c0_i32 = arith.constant 0 : i32
    %c0_i32_0 = arith.constant 0 : i32
    %c0_i32_1 = arith.constant 0 : i32
    %c0_i32_2 = arith.constant 0 : i32
    return %c0_i32, %c0_i32_0, %c0_i32_1 : i32, i32, i32
  }
  func.func @transform_11(%arg0: i32) -> (i32, i32, i32) {
    %c0_i32 = arith.constant 0 : i32
    %c0_i32_0 = arith.constant 0 : i32
    %c0_i32_1 = arith.constant 0 : i32
    %c0_i32_2 = arith.constant 0 : i32
    return %c0_i32, %c0_i32_0, %c0_i32_1 : i32, i32, i32
  }
  func.func @transform_12(%arg0: i32) -> (i32, i32, i32) {
    %c0_i32 = arith.constant 0 : i32
    %c0_i32_0 = arith.constant 0 : i32
    %c0_i32_1 = arith.constant 0 : i32
    %c0_i32_2 = arith.constant 0 : i32
    return %c0_i32, %c0_i32_0, %c0_i32_1 : i32, i32, i32
  }
  func.func @transform_13(%arg0: i32) -> (i32, i32, i32) {
    %c0_i32 = arith.constant 0 : i32
    %c0_i32_0 = arith.constant 0 : i32
    %c0_i32_1 = arith.constant 0 : i32
    %c0_i32_2 = arith.constant 0 : i32
    return %c0_i32, %c0_i32_0, %c0_i32_1 : i32, i32, i32
  }
  func.func @transform_14(%arg0: i32) -> (i32, i32, i32) {
    %c0_i32 = arith.constant 0 : i32
    %c0_i32_0 = arith.constant 0 : i32
    %c0_i32_1 = arith.constant 0 : i32
    return %arg0, %c0_i32, %c0_i32_0 : i32, i32, i32
  }
}

module attributes {stable_mosaic.version = 11 : i64} {
  func.func @kernel(%arg0: i32, %arg1: memref<1x16x31xbf16, #tpu.memory_space<vmem>>, %arg2: memref<1x2x33xbf16, #tpu.memory_space<vmem>>, %arg3: memref<8x64xbf16, #tpu.memory_space<vmem>>, %arg4: memref<8x1xf32, #tpu.memory_space<vmem>>, %arg5: memref<8x4xbf16, #tpu.memory_space<vmem>>, %arg6: memref<8x1xf32, #tpu.memory_space<vmem>>, %arg7: memref<2x8x24xbf16, #tpu.memory_space<vmem>>, %arg8: memref<2x8x1xf32, #tpu.memory_space<vmem>>, %arg9: memref<2x8x24xbf16, #tpu.memory_space<vmem>>, %arg10: memref<2x8x1xf32, #tpu.memory_space<vmem>>, %arg11: memref<2x8x56xbf16, #tpu.memory_space<vmem>>, %arg12: memref<2x8x1xf32, #tpu.memory_space<vmem>>, %arg13: memref<2x8x56xbf16, #tpu.memory_space<vmem>>, %arg14: memref<2x8x1xf32, #tpu.memory_space<vmem>>, %arg15: memref<1x8x32xbf16, #tpu.memory_space<vmem>>) attributes {dimension_semantics = [#tpu.dimension_semantics<parallel>], iteration_bounds = array<i64: 2>, scalar_prefetch = 0 : i64, scratch_operands = 0 : i64, tpu.core_type = #tpu.core_type<tc>, window_params = [{transform_indices = @transform_0, window_bounds = array<i64: 1, 16, 31>}, {transform_indices = @transform_1, window_bounds = array<i64: 1, 2, 33>}, {pipeline_mode = #tpu.pipeline_mode<synchronous>, transform_indices = @transform_2, window_bounds = array<i64: 8, 64>}, {pipeline_mode = #tpu.pipeline_mode<synchronous>, transform_indices = @transform_3, window_bounds = array<i64: 8, 1>}, {pipeline_mode = #tpu.pipeline_mode<synchronous>, transform_indices = @transform_4, window_bounds = array<i64: 8, 4>}, {pipeline_mode = #tpu.pipeline_mode<synchronous>, transform_indices = @transform_5, window_bounds = array<i64: 8, 1>}, {pipeline_mode = #tpu.pipeline_mode<synchronous>, transform_indices = @transform_6, window_bounds = array<i64: 2, 8, 24>}, {pipeline_mode = #tpu.pipeline_mode<synchronous>, transform_indices = @transform_7, window_bounds = array<i64: 2, 8, 1>}, {pipeline_mode = #tpu.pipeline_mode<synchronous>, transform_indices = @transform_8, window_bounds = array<i64: 2, 8, 24>}, {pipeline_mode = #tpu.pipeline_mode<synchronous>, transform_indices = @transform_9, window_bounds = array<i64: 2, 8, 1>}, {pipeline_mode = #tpu.pipeline_mode<synchronous>, transform_indices = @transform_10, window_bounds = array<i64: 2, 8, 56>}, {pipeline_mode = #tpu.pipeline_mode<synchronous>, transform_indices = @transform_11, window_bounds = array<i64: 2, 8, 1>}, {pipeline_mode = #tpu.pipeline_mode<synchronous>, transform_indices = @transform_12, window_bounds = array<i64: 2, 8, 56>}, {pipeline_mode = #tpu.pipeline_mode<synchronous>, transform_indices = @transform_13, window_bounds = array<i64: 2, 8, 1>}, {transform_indices = @transform_14, window_bounds = array<i64: 1, 8, 32>}]} {
    %c0 = arith.constant 0 : index
    %c0_0 = arith.constant 0 : index
    %0 = vector.load %arg3[%c0, %c0_0] : memref<8x64xbf16, #tpu.memory_space<vmem>>, vector<8x64xbf16>
    %c0_1 = arith.constant 0 : index
    %c0_2 = arith.constant 0 : index
    %1 = vector.load %arg4[%c0_1, %c0_2] : memref<8x1xf32, #tpu.memory_space<vmem>>, vector<8x1xf32>
    %c0_3 = arith.constant 0 : index
    %c0_4 = arith.constant 0 : index
    %2 = vector.load %arg5[%c0_3, %c0_4] : memref<8x4xbf16, #tpu.memory_space<vmem>>, vector<8x4xbf16>
    %c0_5 = arith.constant 0 : index
    %c0_6 = arith.constant 0 : index
    %3 = vector.load %arg6[%c0_5, %c0_6] : memref<8x1xf32, #tpu.memory_space<vmem>>, vector<8x1xf32>
    %c0_7 = arith.constant 0 : index
    %c0_8 = arith.constant 0 : index
    %c0_9 = arith.constant 0 : index
    %4 = vector.load %arg7[%c0_7, %c0_8, %c0_9] : memref<2x8x24xbf16, #tpu.memory_space<vmem>>, vector<2x8x24xbf16>
    %c0_10 = arith.constant 0 : index
    %c0_11 = arith.constant 0 : index
    %c0_12 = arith.constant 0 : index
    %5 = vector.load %arg8[%c0_10, %c0_11, %c0_12] : memref<2x8x1xf32, #tpu.memory_space<vmem>>, vector<2x8x1xf32>
    %c0_13 = arith.constant 0 : index
    %c0_14 = arith.constant 0 : index
    %c0_15 = arith.constant 0 : index
    %6 = vector.load %arg9[%c0_13, %c0_14, %c0_15] : memref<2x8x24xbf16, #tpu.memory_space<vmem>>, vector<2x8x24xbf16>
    %c0_16 = arith.constant 0 : index
    %c0_17 = arith.constant 0 : index
    %c0_18 = arith.constant 0 : index
    %7 = vector.load %arg10[%c0_16, %c0_17, %c0_18] : memref<2x8x1xf32, #tpu.memory_space<vmem>>, vector<2x8x1xf32>
    %c0_19 = arith.constant 0 : index
    %c0_20 = arith.constant 0 : index
    %c0_21 = arith.constant 0 : index
    %8 = vector.load %arg11[%c0_19, %c0_20, %c0_21] : memref<2x8x56xbf16, #tpu.memory_space<vmem>>, vector<2x8x56xbf16>
    %c0_22 = arith.constant 0 : index
    %c0_23 = arith.constant 0 : index
    %c0_24 = arith.constant 0 : index
    %9 = vector.load %arg12[%c0_22, %c0_23, %c0_24] : memref<2x8x1xf32, #tpu.memory_space<vmem>>, vector<2x8x1xf32>
    %c0_25 = arith.constant 0 : index
    %c0_26 = arith.constant 0 : index
    %c0_27 = arith.constant 0 : index
    %10 = vector.load %arg13[%c0_25, %c0_26, %c0_27] : memref<2x8x56xbf16, #tpu.memory_space<vmem>>, vector<2x8x56xbf16>
    %c0_28 = arith.constant 0 : index
    %c0_29 = arith.constant 0 : index
    %c0_30 = arith.constant 0 : index
    %11 = vector.load %arg14[%c0_28, %c0_29, %c0_30] : memref<2x8x1xf32, #tpu.memory_space<vmem>>, vector<2x8x1xf32>
    %c0_31 = arith.constant 0 : index
    %c0_32 = arith.constant 0 : index
    %c0_33 = arith.constant 0 : index
    %12 = vector.load %arg1[%c0_31, %c0_32, %c0_33] : memref<1x16x31xbf16, #tpu.memory_space<vmem>>, vector<1x16x31xbf16>
    %13 = vector.shape_cast %12 : vector<1x16x31xbf16> to vector<16x31xbf16>
    %14 = arith.extf %13 : vector<16x31xbf16> to vector<16x31xf32>
    %cst = arith.constant 5.000000e-01 : f32
    %15 = vector.broadcast %cst : f32 to vector<16x31xf32>
    %16 = arith.mulf %15, %14 : vector<16x31xf32>
    %cst_34 = arith.constant 5.000000e-01 : f32
    %17 = vector.broadcast %cst_34 : f32 to vector<16x31xf32>
    %18 = arith.mulf %17, %14 : vector<16x31xf32>
    %19 = math.tanh %18 : vector<16x31xf32>
    %cst_35 = arith.constant 1.000000e+00 : f32
    %20 = vector.broadcast %cst_35 : f32 to vector<16x31xf32>
    %21 = arith.addf %20, %19 : vector<16x31xf32>
    %22 = arith.mulf %16, %21 : vector<16x31xf32>
    %cst_36 = arith.constant 0.000000e+00 : f32
    %23 = vector.broadcast %cst_36 : f32 to vector<16x2xf32>
    %cst_37 = arith.constant 0.000000e+00 : f32
    %24 = vector.broadcast %cst_37 : f32 to vector<16x2xf32>
    %25 = tpu.concatenate %23, %22, %24 in 1 : vector<16x2xf32>, vector<16x31xf32>, vector<16x2xf32> -> vector<16x35xf32>
    %26 = vector.extract_strided_slice %25 {offsets = [0, 0], sizes = [16, 32], strides = [1, 1]} : vector<16x35xf32> to vector<16x32xf32>
    %27 = vector.extract_strided_slice %25 {offsets = [0, 1], sizes = [16, 32], strides = [1, 1]} : vector<16x35xf32> to vector<16x32xf32>
    %28 = vector.extract_strided_slice %25 {offsets = [0, 2], sizes = [16, 32], strides = [1, 1]} : vector<16x35xf32> to vector<16x32xf32>
    %29 = vector.extract_strided_slice %25 {offsets = [0, 3], sizes = [16, 32], strides = [1, 1]} : vector<16x35xf32> to vector<16x32xf32>
    %30 = tpu.concatenate %26, %27, %28, %29 in 0 : vector<16x32xf32>, vector<16x32xf32>, vector<16x32xf32>, vector<16x32xf32> -> vector<64x32xf32>
    %31 = arith.truncf %30 : vector<64x32xf32> to vector<64x32xbf16>
    %cst_38 = arith.constant dense<0.000000e+00> : vector<8x32xf32>
    %32 = tpu.matmul %0, %31, %cst_38 {dimension_numbers = #tpu.dot_dimension_numbers<[1], [0], [0], [1], [0, 0, 1, 1], [], []>} : vector<8x64xbf16>, vector<64x32xbf16>, vector<8x32xf32> -> vector<8x32xf32>
    %33 = vector.broadcast %1 : vector<8x1xf32> to vector<8x32xf32>
    %34 = arith.addf %32, %33 : vector<8x32xf32>
    %c0_39 = arith.constant 0 : index
    %c0_40 = arith.constant 0 : index
    %c0_41 = arith.constant 0 : index
    %35 = vector.load %arg2[%c0_39, %c0_40, %c0_41] : memref<1x2x33xbf16, #tpu.memory_space<vmem>>, vector<1x2x33xbf16>
    %36 = vector.shape_cast %35 : vector<1x2x33xbf16> to vector<2x33xbf16>
    %37 = arith.extf %36 : vector<2x33xbf16> to vector<2x33xf32>
    %38 = vector.extract_strided_slice %37 {offsets = [0, 0], sizes = [1, 32], strides = [1, 1]} : vector<2x33xf32> to vector<1x32xf32>
    %39 = vector.extract_strided_slice %37 {offsets = [1, 0], sizes = [1, 32], strides = [1, 1]} : vector<2x33xf32> to vector<1x32xf32>
    %40 = vector.extract_strided_slice %37 {offsets = [0, 1], sizes = [1, 32], strides = [1, 1]} : vector<2x33xf32> to vector<1x32xf32>
    %41 = vector.extract_strided_slice %37 {offsets = [1, 1], sizes = [1, 32], strides = [1, 1]} : vector<2x33xf32> to vector<1x32xf32>
    %42 = tpu.concatenate %38, %39, %40, %41 in 0 : vector<1x32xf32>, vector<1x32xf32>, vector<1x32xf32>, vector<1x32xf32> -> vector<4x32xf32>
    %43 = arith.truncf %42 : vector<4x32xf32> to vector<4x32xbf16>
    %cst_42 = arith.constant dense<0.000000e+00> : vector<8x32xf32>
    %44 = tpu.matmul %2, %43, %cst_42 {dimension_numbers = #tpu.dot_dimension_numbers<[1], [0], [0], [1], [0, 0, 1, 1], [], []>} : vector<8x4xbf16>, vector<4x32xbf16>, vector<8x32xf32> -> vector<8x32xf32>
    %45 = arith.addf %34, %44 : vector<8x32xf32>
    %46 = vector.broadcast %3 : vector<8x1xf32> to vector<8x32xf32>
    %47 = arith.addf %45, %46 : vector<8x32xf32>
    %cst_43 = arith.constant 5.000000e-01 : f32
    %48 = vector.broadcast %cst_43 : f32 to vector<8x32xf32>
    %49 = arith.mulf %48, %47 : vector<8x32xf32>
    %cst_44 = arith.constant 5.000000e-01 : f32
    %50 = vector.broadcast %cst_44 : f32 to vector<8x32xf32>
    %51 = arith.mulf %50, %47 : vector<8x32xf32>
    %52 = math.tanh %51 : vector<8x32xf32>
    %cst_45 = arith.constant 1.000000e+00 : f32
    %53 = vector.broadcast %cst_45 : f32 to vector<8x32xf32>
    %54 = arith.addf %53, %52 : vector<8x32xf32>
    %55 = arith.mulf %49, %54 : vector<8x32xf32>
    %56 = vector.extract_strided_slice %4 {offsets = [0, 0, 0], sizes = [1, 8, 24], strides = [1, 1, 1]} : vector<2x8x24xbf16> to vector<1x8x24xbf16>
    %57 = vector.shape_cast %56 : vector<1x8x24xbf16> to vector<8x24xbf16>
    %58 = vector.extract_strided_slice %5 {offsets = [0, 0, 0], sizes = [1, 8, 1], strides = [1, 1, 1]} : vector<2x8x1xf32> to vector<1x8x1xf32>
    %59 = vector.shape_cast %58 : vector<1x8x1xf32> to vector<8x1xf32>
    %cst_46 = arith.constant 0.000000e+00 : f32
    %60 = vector.broadcast %cst_46 : f32 to vector<8x1xf32>
    %cst_47 = arith.constant 0.000000e+00 : f32
    %61 = vector.broadcast %cst_47 : f32 to vector<8x1xf32>
    %62 = tpu.concatenate %60, %55, %61 in 1 : vector<8x1xf32>, vector<8x32xf32>, vector<8x1xf32> -> vector<8x34xf32>
    %63 = vector.extract_strided_slice %62 {offsets = [0, 0], sizes = [8, 32], strides = [1, 1]} : vector<8x34xf32> to vector<8x32xf32>
    %64 = vector.extract_strided_slice %62 {offsets = [0, 1], sizes = [8, 32], strides = [1, 1]} : vector<8x34xf32> to vector<8x32xf32>
    %65 = vector.extract_strided_slice %62 {offsets = [0, 2], sizes = [8, 32], strides = [1, 1]} : vector<8x34xf32> to vector<8x32xf32>
    %66 = tpu.concatenate %63, %64, %65 in 0 : vector<8x32xf32>, vector<8x32xf32>, vector<8x32xf32> -> vector<24x32xf32>
    %67 = arith.truncf %66 : vector<24x32xf32> to vector<24x32xbf16>
    %cst_48 = arith.constant dense<0.000000e+00> : vector<8x32xf32>
    %68 = tpu.matmul %57, %67, %cst_48 {dimension_numbers = #tpu.dot_dimension_numbers<[1], [0], [0], [1], [0, 0, 1, 1], [], []>} : vector<8x24xbf16>, vector<24x32xbf16>, vector<8x32xf32> -> vector<8x32xf32>
    %69 = vector.broadcast %59 : vector<8x1xf32> to vector<8x32xf32>
    %70 = arith.addf %68, %69 : vector<8x32xf32>
    %cst_49 = arith.constant 5.000000e-01 : f32
    %71 = vector.broadcast %cst_49 : f32 to vector<8x32xf32>
    %72 = arith.mulf %71, %70 : vector<8x32xf32>
    %cst_50 = arith.constant 5.000000e-01 : f32
    %73 = vector.broadcast %cst_50 : f32 to vector<8x32xf32>
    %74 = arith.mulf %73, %70 : vector<8x32xf32>
    %75 = math.tanh %74 : vector<8x32xf32>
    %cst_51 = arith.constant 1.000000e+00 : f32
    %76 = vector.broadcast %cst_51 : f32 to vector<8x32xf32>
    %77 = arith.addf %76, %75 : vector<8x32xf32>
    %78 = arith.mulf %72, %77 : vector<8x32xf32>
    %79 = vector.extract_strided_slice %6 {offsets = [0, 0, 0], sizes = [1, 8, 24], strides = [1, 1, 1]} : vector<2x8x24xbf16> to vector<1x8x24xbf16>
    %80 = vector.shape_cast %79 : vector<1x8x24xbf16> to vector<8x24xbf16>
    %81 = vector.extract_strided_slice %7 {offsets = [0, 0, 0], sizes = [1, 8, 1], strides = [1, 1, 1]} : vector<2x8x1xf32> to vector<1x8x1xf32>
    %82 = vector.shape_cast %81 : vector<1x8x1xf32> to vector<8x1xf32>
    %cst_52 = arith.constant 0.000000e+00 : f32
    %83 = vector.broadcast %cst_52 : f32 to vector<8x1xf32>
    %cst_53 = arith.constant 0.000000e+00 : f32
    %84 = vector.broadcast %cst_53 : f32 to vector<8x1xf32>
    %85 = tpu.concatenate %83, %78, %84 in 1 : vector<8x1xf32>, vector<8x32xf32>, vector<8x1xf32> -> vector<8x34xf32>
    %86 = vector.extract_strided_slice %85 {offsets = [0, 0], sizes = [8, 32], strides = [1, 1]} : vector<8x34xf32> to vector<8x32xf32>
    %87 = vector.extract_strided_slice %85 {offsets = [0, 1], sizes = [8, 32], strides = [1, 1]} : vector<8x34xf32> to vector<8x32xf32>
    %88 = vector.extract_strided_slice %85 {offsets = [0, 2], sizes = [8, 32], strides = [1, 1]} : vector<8x34xf32> to vector<8x32xf32>
    %89 = tpu.concatenate %86, %87, %88 in 0 : vector<8x32xf32>, vector<8x32xf32>, vector<8x32xf32> -> vector<24x32xf32>
    %90 = arith.truncf %89 : vector<24x32xf32> to vector<24x32xbf16>
    %cst_54 = arith.constant dense<0.000000e+00> : vector<8x32xf32>
    %91 = tpu.matmul %80, %90, %cst_54 {dimension_numbers = #tpu.dot_dimension_numbers<[1], [0], [0], [1], [0, 0, 1, 1], [], []>} : vector<8x24xbf16>, vector<24x32xbf16>, vector<8x32xf32> -> vector<8x32xf32>
    %92 = vector.broadcast %82 : vector<8x1xf32> to vector<8x32xf32>
    %93 = arith.addf %91, %92 : vector<8x32xf32>
    %94 = arith.addf %47, %93 : vector<8x32xf32>
    %cst_55 = arith.constant 5.000000e-01 : f32
    %95 = vector.broadcast %cst_55 : f32 to vector<8x32xf32>
    %96 = arith.mulf %95, %94 : vector<8x32xf32>
    %cst_56 = arith.constant 5.000000e-01 : f32
    %97 = vector.broadcast %cst_56 : f32 to vector<8x32xf32>
    %98 = arith.mulf %97, %94 : vector<8x32xf32>
    %99 = math.tanh %98 : vector<8x32xf32>
    %cst_57 = arith.constant 1.000000e+00 : f32
    %100 = vector.broadcast %cst_57 : f32 to vector<8x32xf32>
    %101 = arith.addf %100, %99 : vector<8x32xf32>
    %102 = arith.mulf %96, %101 : vector<8x32xf32>
    %103 = vector.extract_strided_slice %4 {offsets = [1, 0, 0], sizes = [1, 8, 24], strides = [1, 1, 1]} : vector<2x8x24xbf16> to vector<1x8x24xbf16>
    %104 = vector.shape_cast %103 : vector<1x8x24xbf16> to vector<8x24xbf16>
    %105 = vector.extract_strided_slice %5 {offsets = [1, 0, 0], sizes = [1, 8, 1], strides = [1, 1, 1]} : vector<2x8x1xf32> to vector<1x8x1xf32>
    %106 = vector.shape_cast %105 : vector<1x8x1xf32> to vector<8x1xf32>
    %cst_58 = arith.constant 0.000000e+00 : f32
    %107 = vector.broadcast %cst_58 : f32 to vector<8x3xf32>
    %cst_59 = arith.constant 0.000000e+00 : f32
    %108 = vector.broadcast %cst_59 : f32 to vector<8x3xf32>
    %109 = tpu.concatenate %107, %102, %108 in 1 : vector<8x3xf32>, vector<8x32xf32>, vector<8x3xf32> -> vector<8x38xf32>
    %110 = vector.extract_strided_slice %109 {offsets = [0, 0], sizes = [8, 32], strides = [1, 1]} : vector<8x38xf32> to vector<8x32xf32>
    %111 = vector.extract_strided_slice %109 {offsets = [0, 3], sizes = [8, 32], strides = [1, 1]} : vector<8x38xf32> to vector<8x32xf32>
    %112 = vector.extract_strided_slice %109 {offsets = [0, 6], sizes = [8, 32], strides = [1, 1]} : vector<8x38xf32> to vector<8x32xf32>
    %113 = tpu.concatenate %110, %111, %112 in 0 : vector<8x32xf32>, vector<8x32xf32>, vector<8x32xf32> -> vector<24x32xf32>
    %114 = arith.truncf %113 : vector<24x32xf32> to vector<24x32xbf16>
    %cst_60 = arith.constant dense<0.000000e+00> : vector<8x32xf32>
    %115 = tpu.matmul %104, %114, %cst_60 {dimension_numbers = #tpu.dot_dimension_numbers<[1], [0], [0], [1], [0, 0, 1, 1], [], []>} : vector<8x24xbf16>, vector<24x32xbf16>, vector<8x32xf32> -> vector<8x32xf32>
    %116 = vector.broadcast %106 : vector<8x1xf32> to vector<8x32xf32>
    %117 = arith.addf %115, %116 : vector<8x32xf32>
    %cst_61 = arith.constant 5.000000e-01 : f32
    %118 = vector.broadcast %cst_61 : f32 to vector<8x32xf32>
    %119 = arith.mulf %118, %117 : vector<8x32xf32>
    %cst_62 = arith.constant 5.000000e-01 : f32
    %120 = vector.broadcast %cst_62 : f32 to vector<8x32xf32>
    %121 = arith.mulf %120, %117 : vector<8x32xf32>
    %122 = math.tanh %121 : vector<8x32xf32>
    %cst_63 = arith.constant 1.000000e+00 : f32
    %123 = vector.broadcast %cst_63 : f32 to vector<8x32xf32>
    %124 = arith.addf %123, %122 : vector<8x32xf32>
    %125 = arith.mulf %119, %124 : vector<8x32xf32>
    %126 = vector.extract_strided_slice %6 {offsets = [1, 0, 0], sizes = [1, 8, 24], strides = [1, 1, 1]} : vector<2x8x24xbf16> to vector<1x8x24xbf16>
    %127 = vector.shape_cast %126 : vector<1x8x24xbf16> to vector<8x24xbf16>
    %128 = vector.extract_strided_slice %7 {offsets = [1, 0, 0], sizes = [1, 8, 1], strides = [1, 1, 1]} : vector<2x8x1xf32> to vector<1x8x1xf32>
    %129 = vector.shape_cast %128 : vector<1x8x1xf32> to vector<8x1xf32>
    %cst_64 = arith.constant 0.000000e+00 : f32
    %130 = vector.broadcast %cst_64 : f32 to vector<8x1xf32>
    %cst_65 = arith.constant 0.000000e+00 : f32
    %131 = vector.broadcast %cst_65 : f32 to vector<8x1xf32>
    %132 = tpu.concatenate %130, %125, %131 in 1 : vector<8x1xf32>, vector<8x32xf32>, vector<8x1xf32> -> vector<8x34xf32>
    %133 = vector.extract_strided_slice %132 {offsets = [0, 0], sizes = [8, 32], strides = [1, 1]} : vector<8x34xf32> to vector<8x32xf32>
    %134 = vector.extract_strided_slice %132 {offsets = [0, 1], sizes = [8, 32], strides = [1, 1]} : vector<8x34xf32> to vector<8x32xf32>
    %135 = vector.extract_strided_slice %132 {offsets = [0, 2], sizes = [8, 32], strides = [1, 1]} : vector<8x34xf32> to vector<8x32xf32>
    %136 = tpu.concatenate %133, %134, %135 in 0 : vector<8x32xf32>, vector<8x32xf32>, vector<8x32xf32> -> vector<24x32xf32>
    %137 = arith.truncf %136 : vector<24x32xf32> to vector<24x32xbf16>
    %cst_66 = arith.constant dense<0.000000e+00> : vector<8x32xf32>
    %138 = tpu.matmul %127, %137, %cst_66 {dimension_numbers = #tpu.dot_dimension_numbers<[1], [0], [0], [1], [0, 0, 1, 1], [], []>} : vector<8x24xbf16>, vector<24x32xbf16>, vector<8x32xf32> -> vector<8x32xf32>
    %139 = vector.broadcast %129 : vector<8x1xf32> to vector<8x32xf32>
    %140 = arith.addf %138, %139 : vector<8x32xf32>
    %141 = arith.addf %94, %140 : vector<8x32xf32>
    %142 = vector.extract_strided_slice %8 {offsets = [0, 0, 0], sizes = [1, 8, 56], strides = [1, 1, 1]} : vector<2x8x56xbf16> to vector<1x8x56xbf16>
    %143 = vector.shape_cast %142 : vector<1x8x56xbf16> to vector<8x56xbf16>
    %144 = vector.extract_strided_slice %9 {offsets = [0, 0, 0], sizes = [1, 8, 1], strides = [1, 1, 1]} : vector<2x8x1xf32> to vector<1x8x1xf32>
    %145 = vector.shape_cast %144 : vector<1x8x1xf32> to vector<8x1xf32>
    %cst_67 = arith.constant 0.000000e+00 : f32
    %146 = vector.broadcast %cst_67 : f32 to vector<8x3xf32>
    %cst_68 = arith.constant 0.000000e+00 : f32
    %147 = vector.broadcast %cst_68 : f32 to vector<8x3xf32>
    %148 = tpu.concatenate %146, %55, %147 in 1 : vector<8x3xf32>, vector<8x32xf32>, vector<8x3xf32> -> vector<8x38xf32>
    %149 = vector.extract_strided_slice %148 {offsets = [0, 0], sizes = [8, 32], strides = [1, 1]} : vector<8x38xf32> to vector<8x32xf32>
    %150 = vector.extract_strided_slice %148 {offsets = [0, 1], sizes = [8, 32], strides = [1, 1]} : vector<8x38xf32> to vector<8x32xf32>
    %151 = vector.extract_strided_slice %148 {offsets = [0, 2], sizes = [8, 32], strides = [1, 1]} : vector<8x38xf32> to vector<8x32xf32>
    %152 = vector.extract_strided_slice %148 {offsets = [0, 3], sizes = [8, 32], strides = [1, 1]} : vector<8x38xf32> to vector<8x32xf32>
    %153 = vector.extract_strided_slice %148 {offsets = [0, 4], sizes = [8, 32], strides = [1, 1]} : vector<8x38xf32> to vector<8x32xf32>
    %154 = vector.extract_strided_slice %148 {offsets = [0, 5], sizes = [8, 32], strides = [1, 1]} : vector<8x38xf32> to vector<8x32xf32>
    %155 = vector.extract_strided_slice %148 {offsets = [0, 6], sizes = [8, 32], strides = [1, 1]} : vector<8x38xf32> to vector<8x32xf32>
    %156 = tpu.concatenate %149, %150, %151, %152, %153, %154, %155 in 0 : vector<8x32xf32>, vector<8x32xf32>, vector<8x32xf32>, vector<8x32xf32>, vector<8x32xf32>, vector<8x32xf32>, vector<8x32xf32> -> vector<56x32xf32>
    %157 = arith.truncf %156 : vector<56x32xf32> to vector<56x32xbf16>
    %cst_69 = arith.constant dense<0.000000e+00> : vector<8x32xf32>
    %158 = tpu.matmul %143, %157, %cst_69 {dimension_numbers = #tpu.dot_dimension_numbers<[1], [0], [0], [1], [0, 0, 1, 1], [], []>} : vector<8x56xbf16>, vector<56x32xbf16>, vector<8x32xf32> -> vector<8x32xf32>
    %159 = vector.broadcast %145 : vector<8x1xf32> to vector<8x32xf32>
    %160 = arith.addf %158, %159 : vector<8x32xf32>
    %cst_70 = arith.constant 5.000000e-01 : f32
    %161 = vector.broadcast %cst_70 : f32 to vector<8x32xf32>
    %162 = arith.mulf %161, %160 : vector<8x32xf32>
    %cst_71 = arith.constant 5.000000e-01 : f32
    %163 = vector.broadcast %cst_71 : f32 to vector<8x32xf32>
    %164 = arith.mulf %163, %160 : vector<8x32xf32>
    %165 = math.tanh %164 : vector<8x32xf32>
    %cst_72 = arith.constant 1.000000e+00 : f32
    %166 = vector.broadcast %cst_72 : f32 to vector<8x32xf32>
    %167 = arith.addf %166, %165 : vector<8x32xf32>
    %168 = arith.mulf %162, %167 : vector<8x32xf32>
    %169 = vector.extract_strided_slice %10 {offsets = [0, 0, 0], sizes = [1, 8, 56], strides = [1, 1, 1]} : vector<2x8x56xbf16> to vector<1x8x56xbf16>
    %170 = vector.shape_cast %169 : vector<1x8x56xbf16> to vector<8x56xbf16>
    %171 = vector.extract_strided_slice %11 {offsets = [0, 0, 0], sizes = [1, 8, 1], strides = [1, 1, 1]} : vector<2x8x1xf32> to vector<1x8x1xf32>
    %172 = vector.shape_cast %171 : vector<1x8x1xf32> to vector<8x1xf32>
    %cst_73 = arith.constant 0.000000e+00 : f32
    %173 = vector.broadcast %cst_73 : f32 to vector<8x3xf32>
    %cst_74 = arith.constant 0.000000e+00 : f32
    %174 = vector.broadcast %cst_74 : f32 to vector<8x3xf32>
    %175 = tpu.concatenate %173, %168, %174 in 1 : vector<8x3xf32>, vector<8x32xf32>, vector<8x3xf32> -> vector<8x38xf32>
    %176 = vector.extract_strided_slice %175 {offsets = [0, 0], sizes = [8, 32], strides = [1, 1]} : vector<8x38xf32> to vector<8x32xf32>
    %177 = vector.extract_strided_slice %175 {offsets = [0, 1], sizes = [8, 32], strides = [1, 1]} : vector<8x38xf32> to vector<8x32xf32>
    %178 = vector.extract_strided_slice %175 {offsets = [0, 2], sizes = [8, 32], strides = [1, 1]} : vector<8x38xf32> to vector<8x32xf32>
    %179 = vector.extract_strided_slice %175 {offsets = [0, 3], sizes = [8, 32], strides = [1, 1]} : vector<8x38xf32> to vector<8x32xf32>
    %180 = vector.extract_strided_slice %175 {offsets = [0, 4], sizes = [8, 32], strides = [1, 1]} : vector<8x38xf32> to vector<8x32xf32>
    %181 = vector.extract_strided_slice %175 {offsets = [0, 5], sizes = [8, 32], strides = [1, 1]} : vector<8x38xf32> to vector<8x32xf32>
    %182 = vector.extract_strided_slice %175 {offsets = [0, 6], sizes = [8, 32], strides = [1, 1]} : vector<8x38xf32> to vector<8x32xf32>
    %183 = tpu.concatenate %176, %177, %178, %179, %180, %181, %182 in 0 : vector<8x32xf32>, vector<8x32xf32>, vector<8x32xf32>, vector<8x32xf32>, vector<8x32xf32>, vector<8x32xf32>, vector<8x32xf32> -> vector<56x32xf32>
    %184 = arith.truncf %183 : vector<56x32xf32> to vector<56x32xbf16>
    %cst_75 = arith.constant dense<0.000000e+00> : vector<8x32xf32>
    %185 = tpu.matmul %170, %184, %cst_75 {dimension_numbers = #tpu.dot_dimension_numbers<[1], [0], [0], [1], [0, 0, 1, 1], [], []>} : vector<8x56xbf16>, vector<56x32xbf16>, vector<8x32xf32> -> vector<8x32xf32>
    %186 = vector.broadcast %172 : vector<8x1xf32> to vector<8x32xf32>
    %187 = arith.addf %185, %186 : vector<8x32xf32>
    %188 = arith.addf %47, %187 : vector<8x32xf32>
    %cst_76 = arith.constant 5.000000e-01 : f32
    %189 = vector.broadcast %cst_76 : f32 to vector<8x32xf32>
    %190 = arith.mulf %189, %188 : vector<8x32xf32>
    %cst_77 = arith.constant 5.000000e-01 : f32
    %191 = vector.broadcast %cst_77 : f32 to vector<8x32xf32>
    %192 = arith.mulf %191, %188 : vector<8x32xf32>
    %193 = math.tanh %192 : vector<8x32xf32>
    %cst_78 = arith.constant 1.000000e+00 : f32
    %194 = vector.broadcast %cst_78 : f32 to vector<8x32xf32>
    %195 = arith.addf %194, %193 : vector<8x32xf32>
    %196 = arith.mulf %190, %195 : vector<8x32xf32>
    %197 = vector.extract_strided_slice %8 {offsets = [1, 0, 0], sizes = [1, 8, 56], strides = [1, 1, 1]} : vector<2x8x56xbf16> to vector<1x8x56xbf16>
    %198 = vector.shape_cast %197 : vector<1x8x56xbf16> to vector<8x56xbf16>
    %199 = vector.extract_strided_slice %9 {offsets = [1, 0, 0], sizes = [1, 8, 1], strides = [1, 1, 1]} : vector<2x8x1xf32> to vector<1x8x1xf32>
    %200 = vector.shape_cast %199 : vector<1x8x1xf32> to vector<8x1xf32>
    %cst_79 = arith.constant 0.000000e+00 : f32
    %201 = vector.broadcast %cst_79 : f32 to vector<8x9xf32>
    %cst_80 = arith.constant 0.000000e+00 : f32
    %202 = vector.broadcast %cst_80 : f32 to vector<8x9xf32>
    %203 = tpu.concatenate %201, %196, %202 in 1 : vector<8x9xf32>, vector<8x32xf32>, vector<8x9xf32> -> vector<8x50xf32>
    %204 = vector.extract_strided_slice %203 {offsets = [0, 0], sizes = [8, 32], strides = [1, 1]} : vector<8x50xf32> to vector<8x32xf32>
    %205 = vector.extract_strided_slice %203 {offsets = [0, 3], sizes = [8, 32], strides = [1, 1]} : vector<8x50xf32> to vector<8x32xf32>
    %206 = vector.extract_strided_slice %203 {offsets = [0, 6], sizes = [8, 32], strides = [1, 1]} : vector<8x50xf32> to vector<8x32xf32>
    %207 = vector.extract_strided_slice %203 {offsets = [0, 9], sizes = [8, 32], strides = [1, 1]} : vector<8x50xf32> to vector<8x32xf32>
    %208 = vector.extract_strided_slice %203 {offsets = [0, 12], sizes = [8, 32], strides = [1, 1]} : vector<8x50xf32> to vector<8x32xf32>
    %209 = vector.extract_strided_slice %203 {offsets = [0, 15], sizes = [8, 32], strides = [1, 1]} : vector<8x50xf32> to vector<8x32xf32>
    %210 = vector.extract_strided_slice %203 {offsets = [0, 18], sizes = [8, 32], strides = [1, 1]} : vector<8x50xf32> to vector<8x32xf32>
    %211 = tpu.concatenate %204, %205, %206, %207, %208, %209, %210 in 0 : vector<8x32xf32>, vector<8x32xf32>, vector<8x32xf32>, vector<8x32xf32>, vector<8x32xf32>, vector<8x32xf32>, vector<8x32xf32> -> vector<56x32xf32>
    %212 = arith.truncf %211 : vector<56x32xf32> to vector<56x32xbf16>
    %cst_81 = arith.constant dense<0.000000e+00> : vector<8x32xf32>
    %213 = tpu.matmul %198, %212, %cst_81 {dimension_numbers = #tpu.dot_dimension_numbers<[1], [0], [0], [1], [0, 0, 1, 1], [], []>} : vector<8x56xbf16>, vector<56x32xbf16>, vector<8x32xf32> -> vector<8x32xf32>
    %214 = vector.broadcast %200 : vector<8x1xf32> to vector<8x32xf32>
    %215 = arith.addf %213, %214 : vector<8x32xf32>
    %cst_82 = arith.constant 5.000000e-01 : f32
    %216 = vector.broadcast %cst_82 : f32 to vector<8x32xf32>
    %217 = arith.mulf %216, %215 : vector<8x32xf32>
    %cst_83 = arith.constant 5.000000e-01 : f32
    %218 = vector.broadcast %cst_83 : f32 to vector<8x32xf32>
    %219 = arith.mulf %218, %215 : vector<8x32xf32>
    %220 = math.tanh %219 : vector<8x32xf32>
    %cst_84 = arith.constant 1.000000e+00 : f32
    %221 = vector.broadcast %cst_84 : f32 to vector<8x32xf32>
    %222 = arith.addf %221, %220 : vector<8x32xf32>
    %223 = arith.mulf %217, %222 : vector<8x32xf32>
    %224 = vector.extract_strided_slice %10 {offsets = [1, 0, 0], sizes = [1, 8, 56], strides = [1, 1, 1]} : vector<2x8x56xbf16> to vector<1x8x56xbf16>
    %225 = vector.shape_cast %224 : vector<1x8x56xbf16> to vector<8x56xbf16>
    %226 = vector.extract_strided_slice %11 {offsets = [1, 0, 0], sizes = [1, 8, 1], strides = [1, 1, 1]} : vector<2x8x1xf32> to vector<1x8x1xf32>
    %227 = vector.shape_cast %226 : vector<1x8x1xf32> to vector<8x1xf32>
    %cst_85 = arith.constant 0.000000e+00 : f32
    %228 = vector.broadcast %cst_85 : f32 to vector<8x3xf32>
    %cst_86 = arith.constant 0.000000e+00 : f32
    %229 = vector.broadcast %cst_86 : f32 to vector<8x3xf32>
    %230 = tpu.concatenate %228, %223, %229 in 1 : vector<8x3xf32>, vector<8x32xf32>, vector<8x3xf32> -> vector<8x38xf32>
    %231 = vector.extract_strided_slice %230 {offsets = [0, 0], sizes = [8, 32], strides = [1, 1]} : vector<8x38xf32> to vector<8x32xf32>
    %232 = vector.extract_strided_slice %230 {offsets = [0, 1], sizes = [8, 32], strides = [1, 1]} : vector<8x38xf32> to vector<8x32xf32>
    %233 = vector.extract_strided_slice %230 {offsets = [0, 2], sizes = [8, 32], strides = [1, 1]} : vector<8x38xf32> to vector<8x32xf32>
    %234 = vector.extract_strided_slice %230 {offsets = [0, 3], sizes = [8, 32], strides = [1, 1]} : vector<8x38xf32> to vector<8x32xf32>
    %235 = vector.extract_strided_slice %230 {offsets = [0, 4], sizes = [8, 32], strides = [1, 1]} : vector<8x38xf32> to vector<8x32xf32>
    %236 = vector.extract_strided_slice %230 {offsets = [0, 5], sizes = [8, 32], strides = [1, 1]} : vector<8x38xf32> to vector<8x32xf32>
    %237 = vector.extract_strided_slice %230 {offsets = [0, 6], sizes = [8, 32], strides = [1, 1]} : vector<8x38xf32> to vector<8x32xf32>
    %238 = tpu.concatenate %231, %232, %233, %234, %235, %236, %237 in 0 : vector<8x32xf32>, vector<8x32xf32>, vector<8x32xf32>, vector<8x32xf32>, vector<8x32xf32>, vector<8x32xf32>, vector<8x32xf32> -> vector<56x32xf32>
    %239 = arith.truncf %238 : vector<56x32xf32> to vector<56x32xbf16>
    %cst_87 = arith.constant dense<0.000000e+00> : vector<8x32xf32>
    %240 = tpu.matmul %225, %239, %cst_87 {dimension_numbers = #tpu.dot_dimension_numbers<[1], [0], [0], [1], [0, 0, 1, 1], [], []>} : vector<8x56xbf16>, vector<56x32xbf16>, vector<8x32xf32> -> vector<8x32xf32>
    %241 = vector.broadcast %227 : vector<8x1xf32> to vector<8x32xf32>
    %242 = arith.addf %240, %241 : vector<8x32xf32>
    %243 = arith.addf %188, %242 : vector<8x32xf32>
    %244 = arith.addf %141, %243 : vector<8x32xf32>
    %cst_88 = arith.constant 5.000000e-01 : f32
    %245 = vector.broadcast %cst_88 : f32 to vector<8x32xf32>
    %246 = arith.mulf %244, %245 : vector<8x32xf32>
    %247 = arith.truncf %246 : vector<8x32xf32> to vector<8x32xbf16>
    %c0_89 = arith.constant 0 : index
    %c0_90 = arith.constant 0 : index
    %c0_91 = arith.constant 0 : index
    %248 = vector.load %arg15[%c0_89, %c0_90, %c0_91] : memref<1x8x32xbf16, #tpu.memory_space<vmem>>, vector<1x8x32xbf16>
    %249 = vector.shape_cast %248 : vector<1x8x32xbf16> to vector<8x32xbf16>
    %250 = vector.shape_cast %247 : vector<8x32xbf16> to vector<1x8x32xbf16>
    tpu.vector_store %arg15[%c0_89, %c0_90, %c0_91], %250 {strides = array<i32>} : memref<1x8x32xbf16, #tpu.memory_space<vmem>>, vector<1x8x32xbf16>,
    return
  }
  func.func @transform_0(%arg0: i32) -> (i32, i32, i32) {
    %c0_i32 = arith.constant 0 : i32
    %c0_i32_0 = arith.constant 0 : i32
    %c0_i32_1 = arith.constant 0 : i32
    return %arg0, %c0_i32, %c0_i32_0 : i32, i32, i32
  }
  func.func @transform_1(%arg0: i32) -> (i32, i32, i32) {
    %c0_i32 = arith.constant 0 : i32
    %c0_i32_0 = arith.constant 0 : i32
    %c0_i32_1 = arith.constant 0 : i32
    return %arg0, %c0_i32, %c0_i32_0 : i32, i32, i32
  }
  func.func @transform_2(%arg0: i32) -> (i32, i32) {
    %c0_i32 = arith.constant 0 : i32
    %c0_i32_0 = arith.constant 0 : i32
    %c0_i32_1 = arith.constant 0 : i32
    return %c0_i32, %c0_i32_0 : i32, i32
  }
  func.func @transform_3(%arg0: i32) -> (i32, i32) {
    %c0_i32 = arith.constant 0 : i32
    %c0_i32_0 = arith.constant 0 : i32
    %c0_i32_1 = arith.constant 0 : i32
    return %c0_i32, %c0_i32_0 : i32, i32
  }
  func.func @transform_4(%arg0: i32) -> (i32, i32) {
    %c0_i32 = arith.constant 0 : i32
    %c0_i32_0 = arith.constant 0 : i32
    %c0_i32_1 = arith.constant 0 : i32
    return %c0_i32, %c0_i32_0 : i32, i32
  }
  func.func @transform_5(%arg0: i32) -> (i32, i32) {
    %c0_i32 = arith.constant 0 : i32
    %c0_i32_0 = arith.constant 0 : i32
    %c0_i32_1 = arith.constant 0 : i32
    return %c0_i32, %c0_i32_0 : i32, i32
  }
  func.func @transform_6(%arg0: i32) -> (i32, i32, i32) {
    %c0_i32 = arith.constant 0 : i32
    %c0_i32_0 = arith.constant 0 : i32
    %c0_i32_1 = arith.constant 0 : i32
    %c0_i32_2 = arith.constant 0 : i32
    return %c0_i32, %c0_i32_0, %c0_i32_1 : i32, i32, i32
  }
  func.func @transform_7(%arg0: i32) -> (i32, i32, i32) {
    %c0_i32 = arith.constant 0 : i32
    %c0_i32_0 = arith.constant 0 : i32
    %c0_i32_1 = arith.constant 0 : i32
    %c0_i32_2 = arith.constant 0 : i32
    return %c0_i32, %c0_i32_0, %c0_i32_1 : i32, i32, i32
  }
  func.func @transform_8(%arg0: i32) -> (i32, i32, i32) {
    %c0_i32 = arith.constant 0 : i32
    %c0_i32_0 = arith.constant 0 : i32
    %c0_i32_1 = arith.constant 0 : i32
    %c0_i32_2 = arith.constant 0 : i32
    return %c0_i32, %c0_i32_0, %c0_i32_1 : i32, i32, i32
  }
  func.func @transform_9(%arg0: i32) -> (i32, i32, i32) {
    %c0_i32 = arith.constant 0 : i32
    %c0_i32_0 = arith.constant 0 : i32
    %c0_i32_1 = arith.constant 0 : i32
    %c0_i32_2 = arith.constant 0 : i32
    return %c0_i32, %c0_i32_0, %c0_i32_1 : i32, i32, i32
  }
  func.func @transform_10(%arg0: i32) -> (i32, i32, i32) {
    %c0_i32 = arith.constant 0 : i32
    %c0_i32_0 = arith.constant 0 : i32
    %c0_i32_1 = arith.constant 0 : i32
    %c0_i32_2 = arith.constant 0 : i32
    return %c0_i32, %c0_i32_0, %c0_i32_1 : i32, i32, i32
  }
  func.func @transform_11(%arg0: i32) -> (i32, i32, i32) {
    %c0_i32 = arith.constant 0 : i32
    %c0_i32_0 = arith.constant 0 : i32
    %c0_i32_1 = arith.constant 0 : i32
    %c0_i32_2 = arith.constant 0 : i32
    return %c0_i32, %c0_i32_0, %c0_i32_1 : i32, i32, i32
  }
  func.func @transform_12(%arg0: i32) -> (i32, i32, i32) {
    %c0_i32 = arith.constant 0 : i32
    %c0_i32_0 = arith.constant 0 : i32
    %c0_i32_1 = arith.constant 0 : i32
    %c0_i32_2 = arith.constant 0 : i32
    return %c0_i32, %c0_i32_0, %c0_i32_1 : i32, i32, i32
  }
  func.func @transform_13(%arg0: i32) -> (i32, i32, i32) {
    %c0_i32 = arith.constant 0 : i32
    %c0_i32_0 = arith.constant 0 : i32
    %c0_i32_1 = arith.constant 0 : i32
    %c0_i32_2 = arith.constant 0 : i32
    return %c0_i32, %c0_i32_0, %c0_i32_1 : i32, i32, i32
  }
  func.func @transform_14(%arg0: i32) -> (i32, i32, i32) {
    %c0_i32 = arith.constant 0 : i32
    %c0_i32_0 = arith.constant 0 : i32
    %c0_i32_1 = arith.constant 0 : i32
    return %arg0, %c0_i32, %c0_i32_0 : i32, i32, i32
  }
}

module attributes {stable_mosaic.version = 11 : i64} {
  func.func @kernel(%arg0: i32, %arg1: memref<1x8x63xbf16, #tpu.memory_space<vmem>>, %arg2: memref<1x1x64xbf16, #tpu.memory_space<vmem>>, %arg3: memref<4x32xbf16, #tpu.memory_space<vmem>>, %arg4: memref<4x1xf32, #tpu.memory_space<vmem>>, %arg5: memref<4x1xbf16, #tpu.memory_space<vmem>>, %arg6: memref<4x1xf32, #tpu.memory_space<vmem>>, %arg7: memref<2x4x12xbf16, #tpu.memory_space<vmem>>, %arg8: memref<2x4x1xf32, #tpu.memory_space<vmem>>, %arg9: memref<2x4x12xbf16, #tpu.memory_space<vmem>>, %arg10: memref<2x4x1xf32, #tpu.memory_space<vmem>>, %arg11: memref<2x4x28xbf16, #tpu.memory_space<vmem>>, %arg12: memref<2x4x1xf32, #tpu.memory_space<vmem>>, %arg13: memref<2x4x28xbf16, #tpu.memory_space<vmem>>, %arg14: memref<2x4x1xf32, #tpu.memory_space<vmem>>, %arg15: memref<1x28xbf16, #tpu.memory_space<vmem>>, %arg16: memref<1x1xf32, #tpu.memory_space<vmem>>, %arg17: memref<1x1x64xf32, #tpu.memory_space<vmem>>) attributes {dimension_semantics = [#tpu.dimension_semantics<parallel>], iteration_bounds = array<i64: 2>, scalar_prefetch = 0 : i64, scratch_operands = 0 : i64, tpu.core_type = #tpu.core_type<tc>, window_params = [{transform_indices = @transform_0, window_bounds = array<i64: 1, 8, 63>}, {transform_indices = @transform_1, window_bounds = array<i64: 1, 1, 64>}, {pipeline_mode = #tpu.pipeline_mode<synchronous>, transform_indices = @transform_2, window_bounds = array<i64: 4, 32>}, {pipeline_mode = #tpu.pipeline_mode<synchronous>, transform_indices = @transform_3, window_bounds = array<i64: 4, 1>}, {pipeline_mode = #tpu.pipeline_mode<synchronous>, transform_indices = @transform_4, window_bounds = array<i64: 4, 1>}, {pipeline_mode = #tpu.pipeline_mode<synchronous>, transform_indices = @transform_5, window_bounds = array<i64: 4, 1>}, {pipeline_mode = #tpu.pipeline_mode<synchronous>, transform_indices = @transform_6, window_bounds = array<i64: 2, 4, 12>}, {pipeline_mode = #tpu.pipeline_mode<synchronous>, transform_indices = @transform_7, window_bounds = array<i64: 2, 4, 1>}, {pipeline_mode = #tpu.pipeline_mode<synchronous>, transform_indices = @transform_8, window_bounds = array<i64: 2, 4, 12>}, {pipeline_mode = #tpu.pipeline_mode<synchronous>, transform_indices = @transform_9, window_bounds = array<i64: 2, 4, 1>}, {pipeline_mode = #tpu.pipeline_mode<synchronous>, transform_indices = @transform_10, window_bounds = array<i64: 2, 4, 28>}, {pipeline_mode = #tpu.pipeline_mode<synchronous>, transform_indices = @transform_11, window_bounds = array<i64: 2, 4, 1>}, {pipeline_mode = #tpu.pipeline_mode<synchronous>, transform_indices = @transform_12, window_bounds = array<i64: 2, 4, 28>}, {pipeline_mode = #tpu.pipeline_mode<synchronous>, transform_indices = @transform_13, window_bounds = array<i64: 2, 4, 1>}, {pipeline_mode = #tpu.pipeline_mode<synchronous>, transform_indices = @transform_14, window_bounds = array<i64: 1, 28>}, {pipeline_mode = #tpu.pipeline_mode<synchronous>, transform_indices = @transform_15, window_bounds = array<i64: 1, 1>}, {transform_indices = @transform_16, window_bounds = array<i64: 1, 1, 64>}]} {
    %c0 = arith.constant 0 : index
    %c0_0 = arith.constant 0 : index
    %0 = vector.load %arg3[%c0, %c0_0] : memref<4x32xbf16, #tpu.memory_space<vmem>>, vector<4x32xbf16>
    %c0_1 = arith.constant 0 : index
    %c0_2 = arith.constant 0 : index
    %1 = vector.load %arg4[%c0_1, %c0_2] : memref<4x1xf32, #tpu.memory_space<vmem>>, vector<4x1xf32>
    %c0_3 = arith.constant 0 : index
    %c0_4 = arith.constant 0 : index
    %2 = vector.load %arg5[%c0_3, %c0_4] : memref<4x1xbf16, #tpu.memory_space<vmem>>, vector<4x1xbf16>
    %c0_5 = arith.constant 0 : index
    %c0_6 = arith.constant 0 : index
    %3 = vector.load %arg6[%c0_5, %c0_6] : memref<4x1xf32, #tpu.memory_space<vmem>>, vector<4x1xf32>
    %c0_7 = arith.constant 0 : index
    %c0_8 = arith.constant 0 : index
    %c0_9 = arith.constant 0 : index
    %4 = vector.load %arg7[%c0_7, %c0_8, %c0_9] : memref<2x4x12xbf16, #tpu.memory_space<vmem>>, vector<2x4x12xbf16>
    %c0_10 = arith.constant 0 : index
    %c0_11 = arith.constant 0 : index
    %c0_12 = arith.constant 0 : index
    %5 = vector.load %arg8[%c0_10, %c0_11, %c0_12] : memref<2x4x1xf32, #tpu.memory_space<vmem>>, vector<2x4x1xf32>
    %c0_13 = arith.constant 0 : index
    %c0_14 = arith.constant 0 : index
    %c0_15 = arith.constant 0 : index
    %6 = vector.load %arg9[%c0_13, %c0_14, %c0_15] : memref<2x4x12xbf16, #tpu.memory_space<vmem>>, vector<2x4x12xbf16>
    %c0_16 = arith.constant 0 : index
    %c0_17 = arith.constant 0 : index
    %c0_18 = arith.constant 0 : index
    %7 = vector.load %arg10[%c0_16, %c0_17, %c0_18] : memref<2x4x1xf32, #tpu.memory_space<vmem>>, vector<2x4x1xf32>
    %c0_19 = arith.constant 0 : index
    %c0_20 = arith.constant 0 : index
    %c0_21 = arith.constant 0 : index
    %8 = vector.load %arg11[%c0_19, %c0_20, %c0_21] : memref<2x4x28xbf16, #tpu.memory_space<vmem>>, vector<2x4x28xbf16>
    %c0_22 = arith.constant 0 : index
    %c0_23 = arith.constant 0 : index
    %c0_24 = arith.constant 0 : index
    %9 = vector.load %arg12[%c0_22, %c0_23, %c0_24] : memref<2x4x1xf32, #tpu.memory_space<vmem>>, vector<2x4x1xf32>
    %c0_25 = arith.constant 0 : index
    %c0_26 = arith.constant 0 : index
    %c0_27 = arith.constant 0 : index
    %10 = vector.load %arg13[%c0_25, %c0_26, %c0_27] : memref<2x4x28xbf16, #tpu.memory_space<vmem>>, vector<2x4x28xbf16>
    %c0_28 = arith.constant 0 : index
    %c0_29 = arith.constant 0 : index
    %c0_30 = arith.constant 0 : index
    %11 = vector.load %arg14[%c0_28, %c0_29, %c0_30] : memref<2x4x1xf32, #tpu.memory_space<vmem>>, vector<2x4x1xf32>
    %c0_31 = arith.constant 0 : index
    %c0_32 = arith.constant 0 : index
    %12 = vector.load %arg15[%c0_31, %c0_32] : memref<1x28xbf16, #tpu.memory_space<vmem>>, vector<1x28xbf16>
    %c0_33 = arith.constant 0 : index
    %c0_34 = arith.constant 0 : index
    %13 = vector.load %arg16[%c0_33, %c0_34] : memref<1x1xf32, #tpu.memory_space<vmem>>, vector<1x1xf32>
    %c0_35 = arith.constant 0 : index
    %c0_36 = arith.constant 0 : index
    %c0_37 = arith.constant 0 : index
    %14 = vector.load %arg1[%c0_35, %c0_36, %c0_37] : memref<1x8x63xbf16, #tpu.memory_space<vmem>>, vector<1x8x63xbf16>
    %15 = vector.shape_cast %14 : vector<1x8x63xbf16> to vector<8x63xbf16>
    %16 = arith.extf %15 : vector<8x63xbf16> to vector<8x63xf32>
    %cst = arith.constant 5.000000e-01 : f32
    %17 = vector.broadcast %cst : f32 to vector<8x63xf32>
    %18 = arith.mulf %17, %16 : vector<8x63xf32>
    %cst_38 = arith.constant 5.000000e-01 : f32
    %19 = vector.broadcast %cst_38 : f32 to vector<8x63xf32>
    %20 = arith.mulf %19, %16 : vector<8x63xf32>
    %21 = math.tanh %20 : vector<8x63xf32>
    %cst_39 = arith.constant 1.000000e+00 : f32
    %22 = vector.broadcast %cst_39 : f32 to vector<8x63xf32>
    %23 = arith.addf %22, %21 : vector<8x63xf32>
    %24 = arith.mulf %18, %23 : vector<8x63xf32>
    %cst_40 = arith.constant 0.000000e+00 : f32
    %25 = vector.broadcast %cst_40 : f32 to vector<8x2xf32>
    %cst_41 = arith.constant 0.000000e+00 : f32
    %26 = vector.broadcast %cst_41 : f32 to vector<8x2xf32>
    %27 = tpu.concatenate %25, %24, %26 in 1 : vector<8x2xf32>, vector<8x63xf32>, vector<8x2xf32> -> vector<8x67xf32>
    %28 = vector.extract_strided_slice %27 {offsets = [0, 0], sizes = [8, 64], strides = [1, 1]} : vector<8x67xf32> to vector<8x64xf32>
    %29 = vector.extract_strided_slice %27 {offsets = [0, 1], sizes = [8, 64], strides = [1, 1]} : vector<8x67xf32> to vector<8x64xf32>
    %30 = vector.extract_strided_slice %27 {offsets = [0, 2], sizes = [8, 64], strides = [1, 1]} : vector<8x67xf32> to vector<8x64xf32>
    %31 = vector.extract_strided_slice %27 {offsets = [0, 3], sizes = [8, 64], strides = [1, 1]} : vector<8x67xf32> to vector<8x64xf32>
    %32 = tpu.concatenate %28, %29, %30, %31 in 0 : vector<8x64xf32>, vector<8x64xf32>, vector<8x64xf32>, vector<8x64xf32> -> vector<32x64xf32>
    %33 = arith.truncf %32 : vector<32x64xf32> to vector<32x64xbf16>
    %cst_42 = arith.constant dense<0.000000e+00> : vector<4x64xf32>
    %34 = tpu.matmul %0, %33, %cst_42 {dimension_numbers = #tpu.dot_dimension_numbers<[1], [0], [0], [1], [0, 0, 1, 1], [], []>} : vector<4x32xbf16>, vector<32x64xbf16>, vector<4x64xf32> -> vector<4x64xf32>
    %35 = vector.broadcast %1 : vector<4x1xf32> to vector<4x64xf32>
    %36 = arith.addf %34, %35 : vector<4x64xf32>
    %c0_43 = arith.constant 0 : index
    %c0_44 = arith.constant 0 : index
    %c0_45 = arith.constant 0 : index
    %37 = vector.load %arg2[%c0_43, %c0_44, %c0_45] : memref<1x1x64xbf16, #tpu.memory_space<vmem>>, vector<1x1x64xbf16>
    %38 = vector.shape_cast %37 : vector<1x1x64xbf16> to vector<1x64xbf16>
    %39 = arith.extf %38 : vector<1x64xbf16> to vector<1x64xf32>
    %40 = arith.truncf %39 : vector<1x64xf32> to vector<1x64xbf16>
    %cst_46 = arith.constant dense<0.000000e+00> : vector<4x64xf32>
    %41 = tpu.matmul %2, %40, %cst_46 {dimension_numbers = #tpu.dot_dimension_numbers<[1], [0], [0], [1], [0, 0, 1, 1], [], []>} : vector<4x1xbf16>, vector<1x64xbf16>, vector<4x64xf32> -> vector<4x64xf32>
    %42 = arith.addf %36, %41 : vector<4x64xf32>
    %43 = vector.broadcast %3 : vector<4x1xf32> to vector<4x64xf32>
    %44 = arith.addf %42, %43 : vector<4x64xf32>
    %cst_47 = arith.constant 5.000000e-01 : f32
    %45 = vector.broadcast %cst_47 : f32 to vector<4x64xf32>
    %46 = arith.mulf %45, %44 : vector<4x64xf32>
    %cst_48 = arith.constant 5.000000e-01 : f32
    %47 = vector.broadcast %cst_48 : f32 to vector<4x64xf32>
    %48 = arith.mulf %47, %44 : vector<4x64xf32>
    %49 = math.tanh %48 : vector<4x64xf32>
    %cst_49 = arith.constant 1.000000e+00 : f32
    %50 = vector.broadcast %cst_49 : f32 to vector<4x64xf32>
    %51 = arith.addf %50, %49 : vector<4x64xf32>
    %52 = arith.mulf %46, %51 : vector<4x64xf32>
    %53 = vector.extract_strided_slice %4 {offsets = [0, 0, 0], sizes = [1, 4, 12], strides = [1, 1, 1]} : vector<2x4x12xbf16> to vector<1x4x12xbf16>
    %54 = vector.shape_cast %53 : vector<1x4x12xbf16> to vector<4x12xbf16>
    %55 = vector.extract_strided_slice %5 {offsets = [0, 0, 0], sizes = [1, 4, 1], strides = [1, 1, 1]} : vector<2x4x1xf32> to vector<1x4x1xf32>
    %56 = vector.shape_cast %55 : vector<1x4x1xf32> to vector<4x1xf32>
    %cst_50 = arith.constant 0.000000e+00 : f32
    %57 = vector.broadcast %cst_50 : f32 to vector<4x1xf32>
    %cst_51 = arith.constant 0.000000e+00 : f32
    %58 = vector.broadcast %cst_51 : f32 to vector<4x1xf32>
    %59 = tpu.concatenate %57, %52, %58 in 1 : vector<4x1xf32>, vector<4x64xf32>, vector<4x1xf32> -> vector<4x66xf32>
    %60 = vector.extract_strided_slice %59 {offsets = [0, 0], sizes = [4, 64], strides = [1, 1]} : vector<4x66xf32> to vector<4x64xf32>
    %61 = vector.extract_strided_slice %59 {offsets = [0, 1], sizes = [4, 64], strides = [1, 1]} : vector<4x66xf32> to vector<4x64xf32>
    %62 = vector.extract_strided_slice %59 {offsets = [0, 2], sizes = [4, 64], strides = [1, 1]} : vector<4x66xf32> to vector<4x64xf32>
    %63 = tpu.concatenate %60, %61, %62 in 0 : vector<4x64xf32>, vector<4x64xf32>, vector<4x64xf32> -> vector<12x64xf32>
    %64 = arith.truncf %63 : vector<12x64xf32> to vector<12x64xbf16>
    %cst_52 = arith.constant dense<0.000000e+00> : vector<4x64xf32>
    %65 = tpu.matmul %54, %64, %cst_52 {dimension_numbers = #tpu.dot_dimension_numbers<[1], [0], [0], [1], [0, 0, 1, 1], [], []>} : vector<4x12xbf16>, vector<12x64xbf16>, vector<4x64xf32> -> vector<4x64xf32>
    %66 = vector.broadcast %56 : vector<4x1xf32> to vector<4x64xf32>
    %67 = arith.addf %65, %66 : vector<4x64xf32>
    %cst_53 = arith.constant 5.000000e-01 : f32
    %68 = vector.broadcast %cst_53 : f32 to vector<4x64xf32>
    %69 = arith.mulf %68, %67 : vector<4x64xf32>
    %cst_54 = arith.constant 5.000000e-01 : f32
    %70 = vector.broadcast %cst_54 : f32 to vector<4x64xf32>
    %71 = arith.mulf %70, %67 : vector<4x64xf32>
    %72 = math.tanh %71 : vector<4x64xf32>
    %cst_55 = arith.constant 1.000000e+00 : f32
    %73 = vector.broadcast %cst_55 : f32 to vector<4x64xf32>
    %74 = arith.addf %73, %72 : vector<4x64xf32>
    %75 = arith.mulf %69, %74 : vector<4x64xf32>
    %76 = vector.extract_strided_slice %6 {offsets = [0, 0, 0], sizes = [1, 4, 12], strides = [1, 1, 1]} : vector<2x4x12xbf16> to vector<1x4x12xbf16>
    %77 = vector.shape_cast %76 : vector<1x4x12xbf16> to vector<4x12xbf16>
    %78 = vector.extract_strided_slice %7 {offsets = [0, 0, 0], sizes = [1, 4, 1], strides = [1, 1, 1]} : vector<2x4x1xf32> to vector<1x4x1xf32>
    %79 = vector.shape_cast %78 : vector<1x4x1xf32> to vector<4x1xf32>
    %cst_56 = arith.constant 0.000000e+00 : f32
    %80 = vector.broadcast %cst_56 : f32 to vector<4x1xf32>
    %cst_57 = arith.constant 0.000000e+00 : f32
    %81 = vector.broadcast %cst_57 : f32 to vector<4x1xf32>
    %82 = tpu.concatenate %80, %75, %81 in 1 : vector<4x1xf32>, vector<4x64xf32>, vector<4x1xf32> -> vector<4x66xf32>
    %83 = vector.extract_strided_slice %82 {offsets = [0, 0], sizes = [4, 64], strides = [1, 1]} : vector<4x66xf32> to vector<4x64xf32>
    %84 = vector.extract_strided_slice %82 {offsets = [0, 1], sizes = [4, 64], strides = [1, 1]} : vector<4x66xf32> to vector<4x64xf32>
    %85 = vector.extract_strided_slice %82 {offsets = [0, 2], sizes = [4, 64], strides = [1, 1]} : vector<4x66xf32> to vector<4x64xf32>
    %86 = tpu.concatenate %83, %84, %85 in 0 : vector<4x64xf32>, vector<4x64xf32>, vector<4x64xf32> -> vector<12x64xf32>
    %87 = arith.truncf %86 : vector<12x64xf32> to vector<12x64xbf16>
    %cst_58 = arith.constant dense<0.000000e+00> : vector<4x64xf32>
    %88 = tpu.matmul %77, %87, %cst_58 {dimension_numbers = #tpu.dot_dimension_numbers<[1], [0], [0], [1], [0, 0, 1, 1], [], []>} : vector<4x12xbf16>, vector<12x64xbf16>, vector<4x64xf32> -> vector<4x64xf32>
    %89 = vector.broadcast %79 : vector<4x1xf32> to vector<4x64xf32>
    %90 = arith.addf %88, %89 : vector<4x64xf32>
    %91 = arith.addf %44, %90 : vector<4x64xf32>
    %cst_59 = arith.constant 5.000000e-01 : f32
    %92 = vector.broadcast %cst_59 : f32 to vector<4x64xf32>
    %93 = arith.mulf %92, %91 : vector<4x64xf32>
    %cst_60 = arith.constant 5.000000e-01 : f32
    %94 = vector.broadcast %cst_60 : f32 to vector<4x64xf32>
    %95 = arith.mulf %94, %91 : vector<4x64xf32>
    %96 = math.tanh %95 : vector<4x64xf32>
    %cst_61 = arith.constant 1.000000e+00 : f32
    %97 = vector.broadcast %cst_61 : f32 to vector<4x64xf32>
    %98 = arith.addf %97, %96 : vector<4x64xf32>
    %99 = arith.mulf %93, %98 : vector<4x64xf32>
    %100 = vector.extract_strided_slice %4 {offsets = [1, 0, 0], sizes = [1, 4, 12], strides = [1, 1, 1]} : vector<2x4x12xbf16> to vector<1x4x12xbf16>
    %101 = vector.shape_cast %100 : vector<1x4x12xbf16> to vector<4x12xbf16>
    %102 = vector.extract_strided_slice %5 {offsets = [1, 0, 0], sizes = [1, 4, 1], strides = [1, 1, 1]} : vector<2x4x1xf32> to vector<1x4x1xf32>
    %103 = vector.shape_cast %102 : vector<1x4x1xf32> to vector<4x1xf32>
    %cst_62 = arith.constant 0.000000e+00 : f32
    %104 = vector.broadcast %cst_62 : f32 to vector<4x3xf32>
    %cst_63 = arith.constant 0.000000e+00 : f32
    %105 = vector.broadcast %cst_63 : f32 to vector<4x3xf32>
    %106 = tpu.concatenate %104, %99, %105 in 1 : vector<4x3xf32>, vector<4x64xf32>, vector<4x3xf32> -> vector<4x70xf32>
    %107 = vector.extract_strided_slice %106 {offsets = [0, 0], sizes = [4, 64], strides = [1, 1]} : vector<4x70xf32> to vector<4x64xf32>
    %108 = vector.extract_strided_slice %106 {offsets = [0, 3], sizes = [4, 64], strides = [1, 1]} : vector<4x70xf32> to vector<4x64xf32>
    %109 = vector.extract_strided_slice %106 {offsets = [0, 6], sizes = [4, 64], strides = [1, 1]} : vector<4x70xf32> to vector<4x64xf32>
    %110 = tpu.concatenate %107, %108, %109 in 0 : vector<4x64xf32>, vector<4x64xf32>, vector<4x64xf32> -> vector<12x64xf32>
    %111 = arith.truncf %110 : vector<12x64xf32> to vector<12x64xbf16>
    %cst_64 = arith.constant dense<0.000000e+00> : vector<4x64xf32>
    %112 = tpu.matmul %101, %111, %cst_64 {dimension_numbers = #tpu.dot_dimension_numbers<[1], [0], [0], [1], [0, 0, 1, 1], [], []>} : vector<4x12xbf16>, vector<12x64xbf16>, vector<4x64xf32> -> vector<4x64xf32>
    %113 = vector.broadcast %103 : vector<4x1xf32> to vector<4x64xf32>
    %114 = arith.addf %112, %113 : vector<4x64xf32>
    %cst_65 = arith.constant 5.000000e-01 : f32
    %115 = vector.broadcast %cst_65 : f32 to vector<4x64xf32>
    %116 = arith.mulf %115, %114 : vector<4x64xf32>
    %cst_66 = arith.constant 5.000000e-01 : f32
    %117 = vector.broadcast %cst_66 : f32 to vector<4x64xf32>
    %118 = arith.mulf %117, %114 : vector<4x64xf32>
    %119 = math.tanh %118 : vector<4x64xf32>
    %cst_67 = arith.constant 1.000000e+00 : f32
    %120 = vector.broadcast %cst_67 : f32 to vector<4x64xf32>
    %121 = arith.addf %120, %119 : vector<4x64xf32>
    %122 = arith.mulf %116, %121 : vector<4x64xf32>
    %123 = vector.extract_strided_slice %6 {offsets = [1, 0, 0], sizes = [1, 4, 12], strides = [1, 1, 1]} : vector<2x4x12xbf16> to vector<1x4x12xbf16>
    %124 = vector.shape_cast %123 : vector<1x4x12xbf16> to vector<4x12xbf16>
    %125 = vector.extract_strided_slice %7 {offsets = [1, 0, 0], sizes = [1, 4, 1], strides = [1, 1, 1]} : vector<2x4x1xf32> to vector<1x4x1xf32>
    %126 = vector.shape_cast %125 : vector<1x4x1xf32> to vector<4x1xf32>
    %cst_68 = arith.constant 0.000000e+00 : f32
    %127 = vector.broadcast %cst_68 : f32 to vector<4x1xf32>
    %cst_69 = arith.constant 0.000000e+00 : f32
    %128 = vector.broadcast %cst_69 : f32 to vector<4x1xf32>
    %129 = tpu.concatenate %127, %122, %128 in 1 : vector<4x1xf32>, vector<4x64xf32>, vector<4x1xf32> -> vector<4x66xf32>
    %130 = vector.extract_strided_slice %129 {offsets = [0, 0], sizes = [4, 64], strides = [1, 1]} : vector<4x66xf32> to vector<4x64xf32>
    %131 = vector.extract_strided_slice %129 {offsets = [0, 1], sizes = [4, 64], strides = [1, 1]} : vector<4x66xf32> to vector<4x64xf32>
    %132 = vector.extract_strided_slice %129 {offsets = [0, 2], sizes = [4, 64], strides = [1, 1]} : vector<4x66xf32> to vector<4x64xf32>
    %133 = tpu.concatenate %130, %131, %132 in 0 : vector<4x64xf32>, vector<4x64xf32>, vector<4x64xf32> -> vector<12x64xf32>
    %134 = arith.truncf %133 : vector<12x64xf32> to vector<12x64xbf16>
    %cst_70 = arith.constant dense<0.000000e+00> : vector<4x64xf32>
    %135 = tpu.matmul %124, %134, %cst_70 {dimension_numbers = #tpu.dot_dimension_numbers<[1], [0], [0], [1], [0, 0, 1, 1], [], []>} : vector<4x12xbf16>, vector<12x64xbf16>, vector<4x64xf32> -> vector<4x64xf32>
    %136 = vector.broadcast %126 : vector<4x1xf32> to vector<4x64xf32>
    %137 = arith.addf %135, %136 : vector<4x64xf32>
    %138 = arith.addf %91, %137 : vector<4x64xf32>
    %139 = vector.extract_strided_slice %8 {offsets = [0, 0, 0], sizes = [1, 4, 28], strides = [1, 1, 1]} : vector<2x4x28xbf16> to vector<1x4x28xbf16>
    %140 = vector.shape_cast %139 : vector<1x4x28xbf16> to vector<4x28xbf16>
    %141 = vector.extract_strided_slice %9 {offsets = [0, 0, 0], sizes = [1, 4, 1], strides = [1, 1, 1]} : vector<2x4x1xf32> to vector<1x4x1xf32>
    %142 = vector.shape_cast %141 : vector<1x4x1xf32> to vector<4x1xf32>
    %cst_71 = arith.constant 0.000000e+00 : f32
    %143 = vector.broadcast %cst_71 : f32 to vector<4x3xf32>
    %cst_72 = arith.constant 0.000000e+00 : f32
    %144 = vector.broadcast %cst_72 : f32 to vector<4x3xf32>
    %145 = tpu.concatenate %143, %52, %144 in 1 : vector<4x3xf32>, vector<4x64xf32>, vector<4x3xf32> -> vector<4x70xf32>
    %146 = vector.extract_strided_slice %145 {offsets = [0, 0], sizes = [4, 64], strides = [1, 1]} : vector<4x70xf32> to vector<4x64xf32>
    %147 = vector.extract_strided_slice %145 {offsets = [0, 1], sizes = [4, 64], strides = [1, 1]} : vector<4x70xf32> to vector<4x64xf32>
    %148 = vector.extract_strided_slice %145 {offsets = [0, 2], sizes = [4, 64], strides = [1, 1]} : vector<4x70xf32> to vector<4x64xf32>
    %149 = vector.extract_strided_slice %145 {offsets = [0, 3], sizes = [4, 64], strides = [1, 1]} : vector<4x70xf32> to vector<4x64xf32>
    %150 = vector.extract_strided_slice %145 {offsets = [0, 4], sizes = [4, 64], strides = [1, 1]} : vector<4x70xf32> to vector<4x64xf32>
    %151 = vector.extract_strided_slice %145 {offsets = [0, 5], sizes = [4, 64], strides = [1, 1]} : vector<4x70xf32> to vector<4x64xf32>
    %152 = vector.extract_strided_slice %145 {offsets = [0, 6], sizes = [4, 64], strides = [1, 1]} : vector<4x70xf32> to vector<4x64xf32>
    %153 = tpu.concatenate %146, %147, %148, %149, %150, %151, %152 in 0 : vector<4x64xf32>, vector<4x64xf32>, vector<4x64xf32>, vector<4x64xf32>, vector<4x64xf32>, vector<4x64xf32>, vector<4x64xf32> -> vector<28x64xf32>
    %154 = arith.truncf %153 : vector<28x64xf32> to vector<28x64xbf16>
    %cst_73 = arith.constant dense<0.000000e+00> : vector<4x64xf32>
    %155 = tpu.matmul %140, %154, %cst_73 {dimension_numbers = #tpu.dot_dimension_numbers<[1], [0], [0], [1], [0, 0, 1, 1], [], []>} : vector<4x28xbf16>, vector<28x64xbf16>, vector<4x64xf32> -> vector<4x64xf32>
    %156 = vector.broadcast %142 : vector<4x1xf32> to vector<4x64xf32>
    %157 = arith.addf %155, %156 : vector<4x64xf32>
    %cst_74 = arith.constant 5.000000e-01 : f32
    %158 = vector.broadcast %cst_74 : f32 to vector<4x64xf32>
    %159 = arith.mulf %158, %157 : vector<4x64xf32>
    %cst_75 = arith.constant 5.000000e-01 : f32
    %160 = vector.broadcast %cst_75 : f32 to vector<4x64xf32>
    %161 = arith.mulf %160, %157 : vector<4x64xf32>
    %162 = math.tanh %161 : vector<4x64xf32>
    %cst_76 = arith.constant 1.000000e+00 : f32
    %163 = vector.broadcast %cst_76 : f32 to vector<4x64xf32>
    %164 = arith.addf %163, %162 : vector<4x64xf32>
    %165 = arith.mulf %159, %164 : vector<4x64xf32>
    %166 = vector.extract_strided_slice %10 {offsets = [0, 0, 0], sizes = [1, 4, 28], strides = [1, 1, 1]} : vector<2x4x28xbf16> to vector<1x4x28xbf16>
    %167 = vector.shape_cast %166 : vector<1x4x28xbf16> to vector<4x28xbf16>
    %168 = vector.extract_strided_slice %11 {offsets = [0, 0, 0], sizes = [1, 4, 1], strides = [1, 1, 1]} : vector<2x4x1xf32> to vector<1x4x1xf32>
    %169 = vector.shape_cast %168 : vector<1x4x1xf32> to vector<4x1xf32>
    %cst_77 = arith.constant 0.000000e+00 : f32
    %170 = vector.broadcast %cst_77 : f32 to vector<4x3xf32>
    %cst_78 = arith.constant 0.000000e+00 : f32
    %171 = vector.broadcast %cst_78 : f32 to vector<4x3xf32>
    %172 = tpu.concatenate %170, %165, %171 in 1 : vector<4x3xf32>, vector<4x64xf32>, vector<4x3xf32> -> vector<4x70xf32>
    %173 = vector.extract_strided_slice %172 {offsets = [0, 0], sizes = [4, 64], strides = [1, 1]} : vector<4x70xf32> to vector<4x64xf32>
    %174 = vector.extract_strided_slice %172 {offsets = [0, 1], sizes = [4, 64], strides = [1, 1]} : vector<4x70xf32> to vector<4x64xf32>
    %175 = vector.extract_strided_slice %172 {offsets = [0, 2], sizes = [4, 64], strides = [1, 1]} : vector<4x70xf32> to vector<4x64xf32>
    %176 = vector.extract_strided_slice %172 {offsets = [0, 3], sizes = [4, 64], strides = [1, 1]} : vector<4x70xf32> to vector<4x64xf32>
    %177 = vector.extract_strided_slice %172 {offsets = [0, 4], sizes = [4, 64], strides = [1, 1]} : vector<4x70xf32> to vector<4x64xf32>
    %178 = vector.extract_strided_slice %172 {offsets = [0, 5], sizes = [4, 64], strides = [1, 1]} : vector<4x70xf32> to vector<4x64xf32>
    %179 = vector.extract_strided_slice %172 {offsets = [0, 6], sizes = [4, 64], strides = [1, 1]} : vector<4x70xf32> to vector<4x64xf32>
    %180 = tpu.concatenate %173, %174, %175, %176, %177, %178, %179 in 0 : vector<4x64xf32>, vector<4x64xf32>, vector<4x64xf32>, vector<4x64xf32>, vector<4x64xf32>, vector<4x64xf32>, vector<4x64xf32> -> vector<28x64xf32>
    %181 = arith.truncf %180 : vector<28x64xf32> to vector<28x64xbf16>
    %cst_79 = arith.constant dense<0.000000e+00> : vector<4x64xf32>
    %182 = tpu.matmul %167, %181, %cst_79 {dimension_numbers = #tpu.dot_dimension_numbers<[1], [0], [0], [1], [0, 0, 1, 1], [], []>} : vector<4x28xbf16>, vector<28x64xbf16>, vector<4x64xf32> -> vector<4x64xf32>
    %183 = vector.broadcast %169 : vector<4x1xf32> to vector<4x64xf32>
    %184 = arith.addf %182, %183 : vector<4x64xf32>
    %185 = arith.addf %44, %184 : vector<4x64xf32>
    %cst_80 = arith.constant 5.000000e-01 : f32
    %186 = vector.broadcast %cst_80 : f32 to vector<4x64xf32>
    %187 = arith.mulf %186, %185 : vector<4x64xf32>
    %cst_81 = arith.constant 5.000000e-01 : f32
    %188 = vector.broadcast %cst_81 : f32 to vector<4x64xf32>
    %189 = arith.mulf %188, %185 : vector<4x64xf32>
    %190 = math.tanh %189 : vector<4x64xf32>
    %cst_82 = arith.constant 1.000000e+00 : f32
    %191 = vector.broadcast %cst_82 : f32 to vector<4x64xf32>
    %192 = arith.addf %191, %190 : vector<4x64xf32>
    %193 = arith.mulf %187, %192 : vector<4x64xf32>
    %194 = vector.extract_strided_slice %8 {offsets = [1, 0, 0], sizes = [1, 4, 28], strides = [1, 1, 1]} : vector<2x4x28xbf16> to vector<1x4x28xbf16>
    %195 = vector.shape_cast %194 : vector<1x4x28xbf16> to vector<4x28xbf16>
    %196 = vector.extract_strided_slice %9 {offsets = [1, 0, 0], sizes = [1, 4, 1], strides = [1, 1, 1]} : vector<2x4x1xf32> to vector<1x4x1xf32>
    %197 = vector.shape_cast %196 : vector<1x4x1xf32> to vector<4x1xf32>
    %cst_83 = arith.constant 0.000000e+00 : f32
    %198 = vector.broadcast %cst_83 : f32 to vector<4x9xf32>
    %cst_84 = arith.constant 0.000000e+00 : f32
    %199 = vector.broadcast %cst_84 : f32 to vector<4x9xf32>
    %200 = tpu.concatenate %198, %193, %199 in 1 : vector<4x9xf32>, vector<4x64xf32>, vector<4x9xf32> -> vector<4x82xf32>
    %201 = vector.extract_strided_slice %200 {offsets = [0, 0], sizes = [4, 64], strides = [1, 1]} : vector<4x82xf32> to vector<4x64xf32>
    %202 = vector.extract_strided_slice %200 {offsets = [0, 3], sizes = [4, 64], strides = [1, 1]} : vector<4x82xf32> to vector<4x64xf32>
    %203 = vector.extract_strided_slice %200 {offsets = [0, 6], sizes = [4, 64], strides = [1, 1]} : vector<4x82xf32> to vector<4x64xf32>
    %204 = vector.extract_strided_slice %200 {offsets = [0, 9], sizes = [4, 64], strides = [1, 1]} : vector<4x82xf32> to vector<4x64xf32>
    %205 = vector.extract_strided_slice %200 {offsets = [0, 12], sizes = [4, 64], strides = [1, 1]} : vector<4x82xf32> to vector<4x64xf32>
    %206 = vector.extract_strided_slice %200 {offsets = [0, 15], sizes = [4, 64], strides = [1, 1]} : vector<4x82xf32> to vector<4x64xf32>
    %207 = vector.extract_strided_slice %200 {offsets = [0, 18], sizes = [4, 64], strides = [1, 1]} : vector<4x82xf32> to vector<4x64xf32>
    %208 = tpu.concatenate %201, %202, %203, %204, %205, %206, %207 in 0 : vector<4x64xf32>, vector<4x64xf32>, vector<4x64xf32>, vector<4x64xf32>, vector<4x64xf32>, vector<4x64xf32>, vector<4x64xf32> -> vector<28x64xf32>
    %209 = arith.truncf %208 : vector<28x64xf32> to vector<28x64xbf16>
    %cst_85 = arith.constant dense<0.000000e+00> : vector<4x64xf32>
    %210 = tpu.matmul %195, %209, %cst_85 {dimension_numbers = #tpu.dot_dimension_numbers<[1], [0], [0], [1], [0, 0, 1, 1], [], []>} : vector<4x28xbf16>, vector<28x64xbf16>, vector<4x64xf32> -> vector<4x64xf32>
    %211 = vector.broadcast %197 : vector<4x1xf32> to vector<4x64xf32>
    %212 = arith.addf %210, %211 : vector<4x64xf32>
    %cst_86 = arith.constant 5.000000e-01 : f32
    %213 = vector.broadcast %cst_86 : f32 to vector<4x64xf32>
    %214 = arith.mulf %213, %212 : vector<4x64xf32>
    %cst_87 = arith.constant 5.000000e-01 : f32
    %215 = vector.broadcast %cst_87 : f32 to vector<4x64xf32>
    %216 = arith.mulf %215, %212 : vector<4x64xf32>
    %217 = math.tanh %216 : vector<4x64xf32>
    %cst_88 = arith.constant 1.000000e+00 : f32
    %218 = vector.broadcast %cst_88 : f32 to vector<4x64xf32>
    %219 = arith.addf %218, %217 : vector<4x64xf32>
    %220 = arith.mulf %214, %219 : vector<4x64xf32>
    %221 = vector.extract_strided_slice %10 {offsets = [1, 0, 0], sizes = [1, 4, 28], strides = [1, 1, 1]} : vector<2x4x28xbf16> to vector<1x4x28xbf16>
    %222 = vector.shape_cast %221 : vector<1x4x28xbf16> to vector<4x28xbf16>
    %223 = vector.extract_strided_slice %11 {offsets = [1, 0, 0], sizes = [1, 4, 1], strides = [1, 1, 1]} : vector<2x4x1xf32> to vector<1x4x1xf32>
    %224 = vector.shape_cast %223 : vector<1x4x1xf32> to vector<4x1xf32>
    %cst_89 = arith.constant 0.000000e+00 : f32
    %225 = vector.broadcast %cst_89 : f32 to vector<4x3xf32>
    %cst_90 = arith.constant 0.000000e+00 : f32
    %226 = vector.broadcast %cst_90 : f32 to vector<4x3xf32>
    %227 = tpu.concatenate %225, %220, %226 in 1 : vector<4x3xf32>, vector<4x64xf32>, vector<4x3xf32> -> vector<4x70xf32>
    %228 = vector.extract_strided_slice %227 {offsets = [0, 0], sizes = [4, 64], strides = [1, 1]} : vector<4x70xf32> to vector<4x64xf32>
    %229 = vector.extract_strided_slice %227 {offsets = [0, 1], sizes = [4, 64], strides = [1, 1]} : vector<4x70xf32> to vector<4x64xf32>
    %230 = vector.extract_strided_slice %227 {offsets = [0, 2], sizes = [4, 64], strides = [1, 1]} : vector<4x70xf32> to vector<4x64xf32>
    %231 = vector.extract_strided_slice %227 {offsets = [0, 3], sizes = [4, 64], strides = [1, 1]} : vector<4x70xf32> to vector<4x64xf32>
    %232 = vector.extract_strided_slice %227 {offsets = [0, 4], sizes = [4, 64], strides = [1, 1]} : vector<4x70xf32> to vector<4x64xf32>
    %233 = vector.extract_strided_slice %227 {offsets = [0, 5], sizes = [4, 64], strides = [1, 1]} : vector<4x70xf32> to vector<4x64xf32>
    %234 = vector.extract_strided_slice %227 {offsets = [0, 6], sizes = [4, 64], strides = [1, 1]} : vector<4x70xf32> to vector<4x64xf32>
    %235 = tpu.concatenate %228, %229, %230, %231, %232, %233, %234 in 0 : vector<4x64xf32>, vector<4x64xf32>, vector<4x64xf32>, vector<4x64xf32>, vector<4x64xf32>, vector<4x64xf32>, vector<4x64xf32> -> vector<28x64xf32>
    %236 = arith.truncf %235 : vector<28x64xf32> to vector<28x64xbf16>
    %cst_91 = arith.constant dense<0.000000e+00> : vector<4x64xf32>
    %237 = tpu.matmul %222, %236, %cst_91 {dimension_numbers = #tpu.dot_dimension_numbers<[1], [0], [0], [1], [0, 0, 1, 1], [], []>} : vector<4x28xbf16>, vector<28x64xbf16>, vector<4x64xf32> -> vector<4x64xf32>
    %238 = vector.broadcast %224 : vector<4x1xf32> to vector<4x64xf32>
    %239 = arith.addf %237, %238 : vector<4x64xf32>
    %240 = arith.addf %185, %239 : vector<4x64xf32>
    %241 = arith.addf %138, %240 : vector<4x64xf32>
    %cst_92 = arith.constant 5.000000e-01 : f32
    %242 = vector.broadcast %cst_92 : f32 to vector<4x64xf32>
    %243 = arith.mulf %241, %242 : vector<4x64xf32>
    %cst_93 = arith.constant 5.000000e-01 : f32
    %244 = vector.broadcast %cst_93 : f32 to vector<4x64xf32>
    %245 = arith.mulf %244, %243 : vector<4x64xf32>
    %cst_94 = arith.constant 5.000000e-01 : f32
    %246 = vector.broadcast %cst_94 : f32 to vector<4x64xf32>
    %247 = arith.mulf %246, %243 : vector<4x64xf32>
    %248 = math.tanh %247 : vector<4x64xf32>
    %cst_95 = arith.constant 1.000000e+00 : f32
    %249 = vector.broadcast %cst_95 : f32 to vector<4x64xf32>
    %250 = arith.addf %249, %248 : vector<4x64xf32>
    %251 = arith.mulf %245, %250 : vector<4x64xf32>
    %cst_96 = arith.constant 0.000000e+00 : f32
    %252 = vector.broadcast %cst_96 : f32 to vector<4x3xf32>
    %cst_97 = arith.constant 0.000000e+00 : f32
    %253 = vector.broadcast %cst_97 : f32 to vector<4x3xf32>
    %254 = tpu.concatenate %252, %251, %253 in 1 : vector<4x3xf32>, vector<4x64xf32>, vector<4x3xf32> -> vector<4x70xf32>
    %255 = vector.extract_strided_slice %254 {offsets = [0, 0], sizes = [4, 64], strides = [1, 1]} : vector<4x70xf32> to vector<4x64xf32>
    %256 = vector.extract_strided_slice %254 {offsets = [0, 1], sizes = [4, 64], strides = [1, 1]} : vector<4x70xf32> to vector<4x64xf32>
    %257 = vector.extract_strided_slice %254 {offsets = [0, 2], sizes = [4, 64], strides = [1, 1]} : vector<4x70xf32> to vector<4x64xf32>
    %258 = vector.extract_strided_slice %254 {offsets = [0, 3], sizes = [4, 64], strides = [1, 1]} : vector<4x70xf32> to vector<4x64xf32>
    %259 = vector.extract_strided_slice %254 {offsets = [0, 4], sizes = [4, 64], strides = [1, 1]} : vector<4x70xf32> to vector<4x64xf32>
    %260 = vector.extract_strided_slice %254 {offsets = [0, 5], sizes = [4, 64], strides = [1, 1]} : vector<4x70xf32> to vector<4x64xf32>
    %261 = vector.extract_strided_slice %254 {offsets = [0, 6], sizes = [4, 64], strides = [1, 1]} : vector<4x70xf32> to vector<4x64xf32>
    %262 = tpu.concatenate %255, %256, %257, %258, %259, %260, %261 in 0 : vector<4x64xf32>, vector<4x64xf32>, vector<4x64xf32>, vector<4x64xf32>, vector<4x64xf32>, vector<4x64xf32>, vector<4x64xf32> -> vector<28x64xf32>
    %263 = arith.truncf %262 : vector<28x64xf32> to vector<28x64xbf16>
    %cst_98 = arith.constant dense<0.000000e+00> : vector<1x64xf32>
    %264 = tpu.matmul %12, %263, %cst_98 {dimension_numbers = #tpu.dot_dimension_numbers<[1], [0], [0], [1], [0, 0, 1, 1], [], []>} : vector<1x28xbf16>, vector<28x64xbf16>, vector<1x64xf32> -> vector<1x64xf32>
    %265 = vector.broadcast %13 : vector<1x1xf32> to vector<1x64xf32>
    %266 = arith.addf %264, %265 : vector<1x64xf32>
    %267 = math.tanh %266 : vector<1x64xf32>
    %c0_99 = arith.constant 0 : index
    %c0_100 = arith.constant 0 : index
    %c0_101 = arith.constant 0 : index
    %268 = vector.load %arg17[%c0_99, %c0_100, %c0_101] : memref<1x1x64xf32, #tpu.memory_space<vmem>>, vector<1x1x64xf32>
    %269 = vector.shape_cast %268 : vector<1x1x64xf32> to vector<1x64xf32>
    %270 = vector.shape_cast %267 : vector<1x64xf32> to vector<1x1x64xf32>
    tpu.vector_store %arg17[%c0_99, %c0_100, %c0_101], %270 {strides = array<i32>} : memref<1x1x64xf32, #tpu.memory_space<vmem>>, vector<1x1x64xf32>,
    return
  }
  func.func @transform_0(%arg0: i32) -> (i32, i32, i32) {
    %c0_i32 = arith.constant 0 : i32
    %c0_i32_0 = arith.constant 0 : i32
    %c0_i32_1 = arith.constant 0 : i32
    return %arg0, %c0_i32, %c0_i32_0 : i32, i32, i32
  }
  func.func @transform_1(%arg0: i32) -> (i32, i32, i32) {
    %c0_i32 = arith.constant 0 : i32
    %c0_i32_0 = arith.constant 0 : i32
    %c0_i32_1 = arith.constant 0 : i32
    return %arg0, %c0_i32, %c0_i32_0 : i32, i32, i32
  }
  func.func @transform_2(%arg0: i32) -> (i32, i32) {
    %c0_i32 = arith.constant 0 : i32
    %c0_i32_0 = arith.constant 0 : i32
    %c0_i32_1 = arith.constant 0 : i32
    return %c0_i32, %c0_i32_0 : i32, i32
  }
  func.func @transform_3(%arg0: i32) -> (i32, i32) {
    %c0_i32 = arith.constant 0 : i32
    %c0_i32_0 = arith.constant 0 : i32
    %c0_i32_1 = arith.constant 0 : i32
    return %c0_i32, %c0_i32_0 : i32, i32
  }
  func.func @transform_4(%arg0: i32) -> (i32, i32) {
    %c0_i32 = arith.constant 0 : i32
    %c0_i32_0 = arith.constant 0 : i32
    %c0_i32_1 = arith.constant 0 : i32
    return %c0_i32, %c0_i32_0 : i32, i32
  }
  func.func @transform_5(%arg0: i32) -> (i32, i32) {
    %c0_i32 = arith.constant 0 : i32
    %c0_i32_0 = arith.constant 0 : i32
    %c0_i32_1 = arith.constant 0 : i32
    return %c0_i32, %c0_i32_0 : i32, i32
  }
  func.func @transform_6(%arg0: i32) -> (i32, i32, i32) {
    %c0_i32 = arith.constant 0 : i32
    %c0_i32_0 = arith.constant 0 : i32
    %c0_i32_1 = arith.constant 0 : i32
    %c0_i32_2 = arith.constant 0 : i32
    return %c0_i32, %c0_i32_0, %c0_i32_1 : i32, i32, i32
  }
  func.func @transform_7(%arg0: i32) -> (i32, i32, i32) {
    %c0_i32 = arith.constant 0 : i32
    %c0_i32_0 = arith.constant 0 : i32
    %c0_i32_1 = arith.constant 0 : i32
    %c0_i32_2 = arith.constant 0 : i32
    return %c0_i32, %c0_i32_0, %c0_i32_1 : i32, i32, i32
  }
  func.func @transform_8(%arg0: i32) -> (i32, i32, i32) {
    %c0_i32 = arith.constant 0 : i32
    %c0_i32_0 = arith.constant 0 : i32
    %c0_i32_1 = arith.constant 0 : i32
    %c0_i32_2 = arith.constant 0 : i32
    return %c0_i32, %c0_i32_0, %c0_i32_1 : i32, i32, i32
  }
  func.func @transform_9(%arg0: i32) -> (i32, i32, i32) {
    %c0_i32 = arith.constant 0 : i32
    %c0_i32_0 = arith.constant 0 : i32
    %c0_i32_1 = arith.constant 0 : i32
    %c0_i32_2 = arith.constant 0 : i32
    return %c0_i32, %c0_i32_0, %c0_i32_1 : i32, i32, i32
  }
  func.func @transform_10(%arg0: i32) -> (i32, i32, i32) {
    %c0_i32 = arith.constant 0 : i32
    %c0_i32_0 = arith.constant 0 : i32
    %c0_i32_1 = arith.constant 0 : i32
    %c0_i32_2 = arith.constant 0 : i32
    return %c0_i32, %c0_i32_0, %c0_i32_1 : i32, i32, i32
  }
  func.func @transform_11(%arg0: i32) -> (i32, i32, i32) {
    %c0_i32 = arith.constant 0 : i32
    %c0_i32_0 = arith.constant 0 : i32
    %c0_i32_1 = arith.constant 0 : i32
    %c0_i32_2 = arith.constant 0 : i32
    return %c0_i32, %c0_i32_0, %c0_i32_1 : i32, i32, i32
  }
  func.func @transform_12(%arg0: i32) -> (i32, i32, i32) {
    %c0_i32 = arith.constant 0 : i32
    %c0_i32_0 = arith.constant 0 : i32
    %c0_i32_1 = arith.constant 0 : i32
    %c0_i32_2 = arith.constant 0 : i32
    return %c0_i32, %c0_i32_0, %c0_i32_1 : i32, i32, i32
  }
  func.func @transform_13(%arg0: i32) -> (i32, i32, i32) {
    %c0_i32 = arith.constant 0 : i32
    %c0_i32_0 = arith.constant 0 : i32
    %c0_i32_1 = arith.constant 0 : i32
    %c0_i32_2 = arith.constant 0 : i32
    return %c0_i32, %c0_i32_0, %c0_i32_1 : i32, i32, i32
  }
  func.func @transform_14(%arg0: i32) -> (i32, i32) {
    %c0_i32 = arith.constant 0 : i32
    %c0_i32_0 = arith.constant 0 : i32
    %c0_i32_1 = arith.constant 0 : i32
    return %c0_i32, %c0_i32_0 : i32, i32
  }
  func.func @transform_15(%arg0: i32) -> (i32, i32) {
    %c0_i32 = arith.constant 0 : i32
    %c0_i32_0 = arith.constant 0 : i32
    %c0_i32_1 = arith.constant 0 : i32
    return %c0_i32, %c0_i32_0 : i32, i32
  }
  func.func @transform_16(%arg0: i32) -> (i32, i32, i32) {
    %c0_i32 = arith.constant 0 : i32
    %c0_i32_0 = arith.constant 0 : i32
    %c0_i32_1 = arith.constant 0 : i32
    return %arg0, %c0_i32, %c0_i32_0 : i32, i32, i32
  }
}

</mosaic_0001>

<bundles_post_ra>
// kernel: hifigan_forward.4
= control target key start
LH: loop header
LB: loop body
LE: loop exit
PB: predicated region body
PF: predicated region fallthrough
CT: control target
= control target key end

     0   :  { %s549_s12 = smov 0   ;;  %s593_s0 = inlined_call_operand.vmem [shape: f32[2,16,8], index: 0, kind: input, shape index: {}]   ;;  %s594_s1 = inlined_call_operand.vmem [shape: bf16[32,112], index: 1, kind: input, shape index: {}]   ;;  %s595_s2 = inlined_call_operand.vmem [shape: f32[32,1], index: 2, kind: input, shape index: {}]   ;;  %s596_s3 = inlined_call_operand.vmem [shape: bf16[2,32,8], index: 3, kind: output, shape index: {}]  }
   0x1 LB: > { %s403_s13 = sadd.s32 4294967295, %s519_s12   ;;  %p407_p0 = scmp.ge.s32.totalorder %s519_s12, 1  ;;  %s519_s12 = sphi %s549_s12, %s13_s12  }
   0x2   : > { %p137_p1 = scmp.lt.s32.totalorder %s519_s12, 3 }
   0x4   : > { %p138_p2 = pnand %p407_p0, %p137_p1 }
   0x5   : > { %p161_p3 = scmp.lt.s32.totalorder (!%p138_p2), %s403_s13, 1  ;;  %s521_s18 = smov (!%p138_p2), 3   ;;  %vm190_vm0 = vcmask (!%p138_p2), 23552   ;;  %vm193_vm1 = vcmask (!%p138_p2), 89088   ;;  %v511_v12 = vld [vmem:[%s594_s1] sm:$0xff] (!%p138_p2)   ;;  %vm271_vm3 = vcmask (!%p138_p2), 916480  }
   0x6   : > { %141 = sbr.rel (%p138_p2) target bundleno = 504 (0x1f8), region = 32  ;;  %vm414_vm2 = vmpackc.low (!%p138_p2), %vm193_vm1, %vm193_vm1  ;;  %s522_s19 = smov (!%p138_p2), 126   ;;  %454 = vmatprep.mubr.msk.bf16.mxu0 (!%p138_p2), %vm271_vm3, %v511_v12  ;;  %v178_v13 = vld [vmem:[%s595_s2] sm:$0xff] (!%p138_p2)  ;;  %v528_v14 = vmov (!%p138_p2), 0   ;;  %v179_v15 = vld [vmem:[%s595_s2 + $0x8] sm:$0xff] (!%p138_p2)  ;;  %vm343_vm4 = vcmask (!%p138_p2), 60416  }
   0x7   : > { %s523_s20 = smov (!%p138_p2), 127   ;;  %s524_s21 = smov (!%p138_p2), 125   ;;  %509 = vset.pattern.permute.xlu1 (!%p138_p2), %v528_v14  ;;  %510 = vset.pattern.permute.xlu0 (!%p138_p2), %v528_v14  ;;  %v180_v16 = vld [vmem:[%s595_s2 + $0x10] sm:$0xff] (!%p138_p2)  ;;  %v181_v17 = vld [vmem:[%s595_s2 + $0x18] sm:$0xff] (!%p138_p2)  ;;  %v512_v42 = vld [vmem:[%s594_s1 + $0x8] sm:$0xff] (!%p138_p2)  }
   0x8   : > { %s525_s22 = smov (!%p138_p2), 124   ;;  %s526_s23 = smov (!%p138_p2), 123  }
   0x9   : > { %s527_s24 = smov (!%p138_p2), 122  }
   0xd   : > { %s598_s13 = smov (!%p161_p3, %s403_s13), 1 }
   0xe   : > { %s425_s14 = sshll.u32 %s598_s13, 4 }
   0xf   : > { %s165_s17 = scalar_lea.vmem %s593_s0, %s425_s14  ;;  %s170_s15 = scalar_lea.vmem %s596_s3, %s425_s14 }
  0x10   : > { %v172_v0 = vld [vmem:[%s165_s17] sm:$0xff]  ;;  %v173_v1 = vld [vmem:[%s165_s17 + $0x8] sm:$0xff] }
  0x11   : > { %v474_v2 = vpack.i.bf16 %v173_v1, %v172_v0 }
  0x13   : > { %475 = vrot.lane.b32.xlu0 %v474_v2, %s521_s18 }
  0x85   : > { %v476_v3 = vpop.permute.xlu0 %475 }
  0x86   : > { %v478_v4 = vunpack.i.h.bf16 %v476_v3  ;;  %v477_v5 = vunpack.i.l.bf16 %v476_v3 }
  0x88   : > { %v191_v6 = vsel %vm190_vm0, 0.0, %v477_v5  ;;  %v192_v7 = vsel %vm190_vm0, 0.0, %v478_v4 }
  0x89   : > { %v194_v8 = vsel %vm193_vm1, %v191_v6, 0.0  ;;  %v195_v9 = vsel %vm193_vm1, %v192_v7, 0.0  ;;  %v415_v10 = vpack.c.bf16 %v192_v7, %v191_v6 }
  0x8a   : > { %v484_v11 = vpack.i.bf16 %v195_v9, %v194_v8 }
  0x8b   : > { %440 = vmatprep.subr.msk.bf16.mxu0 %vm414_vm2, %v415_v10 }
  0x8c   : > { %441 = vmatpush3.bf16.msk.msra.mxu0 %vm414_vm2, %v415_v10  ;;  %485 = vrot.lane.b32.xlu1 %v484_v11, %s522_s19 }
  0x8d   : > { %480 = vrot.lane.b32.xlu0 %v484_v11, %s523_s20 }
  0x90   : > { %490 = vrot.lane.b32.xlu1 %v484_v11, %s524_s21 }
  0x91   : > { %495 = vrot.lane.b32.xlu0 %v484_v11, %s525_s22 }
  0x94   : > { %500 = vrot.lane.b32.xlu1 %v484_v11, %s526_s23 }
  0x95   : > { %505 = vrot.lane.b32.xlu0 %v484_v11, %s527_s24 }
  0x98   : > { %243 = vperm.xlu1 %509, %v178_v13  }
  0x99   : > { %248 = vperm.xlu0 %510, %v179_v15  }
  0x9c   : > { %253 = vperm.xlu1 %509, %v180_v16  }
  0xa0   : > { %258 = vperm.xlu1 %509, %v181_v17  }
  0xfe   : > { %v486_v18 = vpop.permute.xlu1 %485 }
  0xff   : > { %v481_v19 = vpop.permute.xlu0 %480  ;;  %v488_v20 = vunpack.i.h.bf16 %v486_v18  ;;  %v487_v21 = vunpack.i.l.bf16 %v486_v18 }
 0x100   : > { %v483_v22 = vunpack.i.h.bf16 %v481_v19  ;;  %v482_v23 = vunpack.i.l.bf16 %v481_v19 }
 0x101   : > { %v236_v26 = vpack.c.bf16 %v488_v20, %v487_v21 }
 0x102   : > { %v235_v24 = vpack.c.bf16 %v483_v22, %v482_v23  ;;  %v491_v25 = vpop.permute.xlu1 %490 }
 0x103   : > { %v493_v27 = vunpack.i.h.bf16 %v491_v25  ;;  %v492_v28 = vunpack.i.l.bf16 %v491_v25  ;;  %v496_v29 = vpop.permute.xlu0 %495 }
 0x104   : > { %442 = vmatprep.subr.bf16.mxu0 %v235_v24  ;;  %v498_v31 = vunpack.i.h.bf16 %v496_v29  ;;  %v497_v32 = vunpack.i.l.bf16 %v496_v29 }
 0x105   : > { %443 = vmatpush3.bf16.msra.mxu0 %v235_v24  ;;  %v237_v30 = vpack.c.bf16 %v493_v27, %v492_v28 }
 0x106   : > { %444 = vmatprep.subr.bf16.mxu0 %v236_v26  ;;  %v501_v33 = vpop.permute.xlu1 %500  ;;  %v238_v34 = vpack.c.bf16 %v498_v31, %v497_v32 }
 0x107   : > { %v503_v35 = vunpack.i.h.bf16 %v501_v33  ;;  %v502_v36 = vunpack.i.l.bf16 %v501_v33  ;;  %v506_v37 = vpop.permute.xlu0 %505 }
 0x108   : > { %v508_v39 = vunpack.i.h.bf16 %v506_v37  ;;  %v507_v40 = vunpack.i.l.bf16 %v506_v37 }
 0x109   : > { %445 = vmatpush3.bf16.msra.mxu0 %v236_v26  ;;  %v239_v38 = vpack.c.bf16 %v503_v35, %v502_v36 }
 0x10a   : > { %446 = vmatprep.subr.bf16.mxu0 %v237_v30  ;;  %v240_v41 = vpack.c.bf16 %v508_v39, %v507_v40 }
 0x10d   : > { %447 = vmatpush3.bf16.msra.mxu0 %v237_v30 }
 0x10e   : > { %448 = vmatprep.subr.bf16.mxu0 %v238_v34 }
 0x111   : > { %449 = vmatpush3.bf16.msra.mxu0 %v238_v34 }
 0x112   : > { %450 = vmatprep.subr.bf16.mxu0 %v239_v38 }
 0x115   : > { %451 = vmatpush3.bf16.msra.mxu0 %v239_v38 }
 0x116   : > { %452 = vmatprep.subr.bf16.mxu0 %v240_v41 }
 0x117   : > { %v244_v43 = vpop.permute.xlu1 %243 }
 0x118   : > { %v249_v48 = vpop.permute.xlu0 %248 }
 0x119   : > { %453 = vmatpush3.bf16.msra.mxu0 %v240_v41 }
 0x11b   : > { %v254_v44 = vpop.permute.xlu1 %253 }
 0x11c   : > { %455 = vmatmul.mubr.msk.bf16.vlgmr.msra.gmra.mrb[0].mxu0 %vm271_vm3, %v512_v42 }
 0x11f   : > { %v259_v49 = vpop.permute.xlu1 %258 }
 0x1ef   : > { %v456_v45 = vpop.f32.mrb[0].mxu0 }
 0x1f0   : > { %v321_v46 = vadd.f32 %v456_v45, %v254_v44  ;;  %v312_v47 = vpop.f32.mrb[1].mxu0 }
 0x1f1   : > { %v313_v50 = vadd.f32 %v312_v47, %v244_v43  ;;  %v457_v51 = vpop.f32.mrb[2].mxu0 }
 0x1f2   : > { %v429_v52 = vpack.c.bf16 %v321_v46, %v321_v46  ;;  %v324_v53 = vadd.f32 %v457_v51, %v259_v49  ;;  %v315_v54 = vpop.f32.mrb[3].mxu0 }
 0x1f3   : > { %v427_v55 = vpack.c.bf16 %v313_v50, %v313_v50  ;;  %v316_v56 = vadd.f32 %v315_v54, %v249_v48 }
 0x1f4   : > { %346 = vst.msk [vmem:[%s170_s15 + $0x8] sm:$0xf] %vm343_vm4, %v429_v52  ;;  %v430_v57 = vpack.c.bf16 %v324_v53, %v324_v53 }
 0x1f5   : > { %344 = vst.msk [vmem:[%s170_s15] sm:$0xf] %vm343_vm4, %v427_v55  ;;  %v428_v58 = vpack.c.bf16 %v316_v56, %v316_v56 }
 0x1f6   : > { %347 = vst.msk [vmem:[%s170_s15 + $0xc] sm:$0xf] %vm343_vm4, %v430_v57 }
 0x1f7   : > { %345 = vst.msk [vmem:[%s170_s15 + $0x4] sm:$0xf] %vm343_vm4, %v428_v58 }
 0x1f8 PF: > { %s13_s12 = sadd.s32 1, %s519_s12  }
 0x1f9   : > { %p10_p4 = scmp.ge.s32.totalorder %s13_s12, 4  }
 0x1fb   :  { %12 = sbr.rel (!%p10_p4) target bundleno = 1 (0x1), region = 62 }

// kernel: hifigan_forward.5
= control target key start
LH: loop header
LB: loop body
LE: loop exit
PB: predicated region body
PF: predicated region fallthrough
CT: control target
= control target key end

     0   :  { %s2463_s29 = smov 0   ;;  %s2814_s0 = inlined_call_operand.vmem [shape: bf16[2,32,15], index: 0, kind: input, shape index: {}]   ;;  %s2815_s1 = inlined_call_operand.vmem [shape: bf16[2,4,17], index: 1, kind: input, shape index: {}]   ;;  %s2816_s2 = inlined_call_operand.vmem [shape: bf16[16,128], index: 2, kind: input, shape index: {}]   ;;  %s2817_s3 = inlined_call_operand.vmem [shape: f32[16,1], index: 3, kind: input, shape index: {}]   ;;  %s2818_s4 = inlined_call_operand.vmem [shape: bf16[16,8], index: 4, kind: input, shape index: {}]   ;;  %s2819_s5 = inlined_call_operand.vmem [shape: f32[16,1], index: 5, kind: input, shape index: {}]   ;;  %s2820_s6 = inlined_call_operand.vmem [shape: bf16[2,16,48], index: 6, kind: input, shape index: {}]   ;;  %s2821_s7 = inlined_call_operand.vmem [shape: f32[2,16,1], index: 7, kind: input, shape index: {}]   ;;  %s2822_s8 = inlined_call_operand.vmem [shape: bf16[2,16,48], index: 8, kind: input, shape index: {}]   ;;  %s2823_s9 = inlined_call_operand.vmem [shape: f32[2,16,1], index: 9, kind: input, shape index: {}]   ;;  %s2824_s10 = inlined_call_operand.vmem [shape: bf16[2,16,112], index: 10, kind: input, shape index: {}]   ;;  %s2825_s11 = inlined_call_operand.vmem [shape: f32[2,16,1], index: 11, kind: input, shape index: {}]   ;;  %s2826_s12 = inlined_call_operand.vmem [shape: bf16[2,16,112], index: 12, kind: input, shape index: {}]   ;;  %s2827_s13 = inlined_call_operand.vmem [shape: f32[2,16,1], index: 13, kind: input, shape index: {}]   ;;  %s2828_s14 = inlined_call_operand.vmem [shape: bf16[2,16,16], index: 14, kind: output, shape index: {}]  }
   0x1 LB: > { %s1755_s30 = sadd.s32 4294967295, %s2369_s29   ;;  %p1759_p0 = scmp.ge.s32.totalorder %s2369_s29, 1  ;;  %s2369_s29 = sphi %s2463_s29, %s24_s29  }
   0x2   : > { %p421_p1 = scmp.lt.s32.totalorder %s2369_s29, 3 }
   0x4   : > { %p422_p2 = pnand %p1759_p0, %p421_p1 }
   0x5   : > { %p471_p3 = scmp.lt.s32.totalorder (!%p422_p2), %s1755_s30, 1  ;;  %v2371_v10 = vmov (!%p422_p2), 0.0   ;;  %s2372_s19 = smov (!%p422_p2), 2   ;;  %v684_v25 = vlaneseq (!%p422_p2)  ;;  %vm566_vm0 = vcmask (!%p422_p2), 15360   ;;  %vm571_vm1 = vcmask (!%p422_p2), 138240   ;;  %v488_v58 = vld [vmem:[%s2817_s3] sm:$0xff] (!%p422_p2) }
   0x6   : > { %425 = sbr.rel (%p422_p2) target bundleno = 3499 (0xdab), region = 76  ;;  %1890 = vmatprep.subr.bf16.mxu0 (!%p422_p2), %v2371_v10  ;;  %1910 = vmatprep.subr.bf16.mxu1 (!%p422_p2), %v2371_v10  ;;  %vm2487_vm2 = vmpackc.low (!%p422_p2), %vm571_vm1, %vm571_vm1  ;;  %s2373_s24 = smov (!%p422_p2), 126   ;;  %vm2376_vm3 = vmmov (!%p422_p2), 0   ;;  %v2377_v59 = vmov (!%p422_p2), 0   ;;  %v489_v60 = vld [vmem:[%s2817_s3 + $0x8] sm:$0xff] (!%p422_p2)  ;;  %v492_v62 = vld [vmem:[%s2819_s5] sm:$0xff] (!%p422_p2) }
   0x7   : > { %v685_v30 = vshrl.u32 (!%p422_p2), %v684_v25, 7  ;;  %s2374_s25 = smov (!%p422_p2), 127   ;;  %s2829_s26 = smov (!%p422_p2), 125   ;;  %1912 = vmatprep.mubr.msk.bf16.mxu1 (!%p422_p2), %vm2376_vm3, %v2371_v10  ;;  %1906 = vmatprep.mubr.msk.bf16.mxu0 (!%p422_p2), %vm2376_vm3, %v2371_v10  ;;  %v493_v61 = vld [vmem:[%s2819_s5 + $0x8] sm:$0xff] (!%p422_p2)  ;;  %vm712_vm4 = vcmask (!%p422_p2), 1043456   ;;  %vm714_vm5 = vcmask (!%p422_p2), 1044480  }
   0x8   : > { %2116 = vset.pattern.permute.xlu1 (!%p422_p2), %v2377_v59  ;;  %2115 = vset.pattern.permute.xlu0 (!%p422_p2), %v2377_v59  ;;  %vm716_vm6 = vcmask (!%p422_p2), 1045504   ;;  %vm718_vm7 = vcmask (!%p422_p2), 1046528   ;;  %vm726_vm8 = vcmask (!%p422_p2), 64512   ;;  %s2378_s28 = smov (!%p422_p2), 1   ;;  %vm804_vm9 = vcmask (!%p422_p2), 7168   ;;  %s2383_s16 = smov (!%p422_p2), 9  }
   0x9   : > { %v700_v34 = vsub.s32 (!%p422_p2), 2, %v685_v30  ;;  %v707_v35 = vsub.s32 (!%p422_p2), 3, %v685_v30  ;;  %v686_v44 = vsub.s32 (!%p422_p2), 0, %v685_v30  ;;  %v693_v45 = vsub.s32 (!%p422_p2), 1, %v685_v30  ;;  %s2384_s17 = smov (!%p422_p2), 116   ;;  %s2385_s21 = smov (!%p422_p2), 119  }
   0xa   : > { %vm841_vm10 = vcmask (!%p422_p2), 392192   ;;  %vm1000_vm11 = vcmask (!%p422_p2), 23552   ;;  %vm1003_vm12 = vcmask (!%p422_p2), 154624   ;;  %vm1250_vm14 = vcmask (!%p422_p2), 916480   ;;  %s2386_s22 = smov (!%p422_p2), 110  }
   0xb   : > { %vm2633_vm13 = vmpackc.low (!%p422_p2), %vm1003_vm12, %vm1003_vm12  ;;  %vm1437_vm15 = vcmask (!%p422_p2), 72704  }
   0xd   : > { %s2842_s30 = smov (!%p471_p3, %s1755_s30), 1 }
   0xe   : > { %s1818_s15 = sshll.u32 %s2842_s30, 4  ;;  %s1762_s20 = sshll.u32 %s2842_s30, 1 }
   0xf   : > { %s475_s18 = scalar_lea.vmem %s2814_s0, %s1818_s15  ;;  %s479_s23 = scalar_lea.vmem %s2815_s1, %s1762_s20 }
  0x10   : > { %v1823_v0 = vld [vmem:[%s475_s18] sm:$0xff]   ;;  %v1830_v1 = vld [vmem:[%s475_s18 + $0x8] sm:$0xff]   ;;  %s2379_s15 = smov 3   ;;  %s2380_s18 = smov 122  }
  0x11   : > { %v1824_v2 = vunpack.c.l.bf16 %v1823_v0  ;;  %v1825_v3 = vunpack.c.h.bf16 %v1823_v0  ;;  %v1828_v4 = vunpack.c.l.bf16 %v1830_v1  ;;  %v1829_v5 = vunpack.c.h.bf16 %v1830_v1  ;;  %v681_v27 = vld [vmem:[%s479_s23] sm:$0x3]  ;;  %s2833_s20 = smov 123   ;;  %s2839_s23 = smov 125  }
  0x12   : > { %v2491_v36 = vunpack.c.l.bf16 %v681_v27 }
  0x13   : > { %v534_v6 = vmul.f32 0.5, %v1824_v2  ;;  %v535_v7 = vmul.f32 0.5, %v1825_v3  ;;  %v536_v8 = vmul.f32 0.5, %v1828_v4  ;;  %v537_v9 = vmul.f32 0.5, %v1829_v5 }
  0x14   : > { %v701_v48 = vrot.slane %v2491_v36, %v700_v34  ;;  %v708_v49 = vrot.slane %v2491_v36, %v707_v35  ;;  %v687_v54 = vrot.slane %v2491_v36, %v686_v44  ;;  %v694_v55 = vrot.slane %v2491_v36, %v693_v45 }
  0x15   : > { %2327 = vtanh.f32 %v534_v6 }
  0x16   : > { %2329 = vtanh.f32 %v535_v7  ;;  %v2105_v56 = vpack.i.bf16 %v708_v49, %v701_v48  ;;  %v2095_v57 = vpack.i.bf16 %v694_v55, %v687_v54 }
  0x17   : > { %2331 = vtanh.f32 %v536_v8 }
  0x18   : > { %2333 = vtanh.f32 %v537_v9 }
  0x1f   : > { %v2328_v11 = vpop.eup %2327 }
  0x20   : > { %v2330_v12 = vpop.eup %2329  ;;  %v542_v13 = vadd.f32 1.0, %v2328_v11 }
  0x21   : > { %v2332_v14 = vpop.eup %2331  ;;  %v543_v15 = vadd.f32 1.0, %v2330_v12 }
  0x22   : > { %v2334_v16 = vpop.eup %2333  ;;  %v546_v17 = vmul.f32 %v542_v13, %v534_v6  ;;  %v544_v18 = vadd.f32 1.0, %v2332_v14 }
  0x23   : > { %v547_v19 = vmul.f32 %v543_v15, %v535_v7  ;;  %v545_v20 = vadd.f32 1.0, %v2334_v16 }
  0x24   : > { %v548_v21 = vmul.f32 %v544_v18, %v536_v8 }
  0x25   : > { %v2065_v22 = vpack.i.bf16 %v547_v19, %v546_v17  ;;  %v549_v23 = vmul.f32 %v545_v20, %v537_v9 }
  0x27   : > { %2066 = vrot.lane.b32.xlu0 %v2065_v22, %s2372_s19  ;;  %v2070_v24 = vpack.i.bf16 %v549_v23, %v548_v21 }
  0x2b   : > { %2071 = vrot.lane.b32.xlu0 %v2070_v24, %s2372_s19  ;;  %s2831_s19 = smov 124  }
  0x99   : > { %v2067_v26 = vpop.permute.xlu0 %2066 }
  0x9a   : > { %v2069_v28 = vunpack.i.h.bf16 %v2067_v26  ;;  %v2068_v29 = vunpack.i.l.bf16 %v2067_v26 }
  0x9c   : > { %v568_v31 = vsel %vm566_vm0, 0.0, %v2069_v28  ;;  %v567_v32 = vsel %vm566_vm0, 0.0, %v2068_v29 }
  0x9d   : > { %v573_v37 = vsel %vm571_vm1, %v568_v31, 0.0  ;;  %v572_v38 = vsel %vm571_vm1, %v567_v32, 0.0  ;;  %v2072_v39 = vpop.permute.xlu0 %2071  ;;  %v1767_v40 = vpack.c.bf16 %v568_v31, %v567_v32 }
  0x9e   : > { %v2074_v41 = vunpack.i.h.bf16 %v2072_v39  ;;  %v2073_v42 = vunpack.i.l.bf16 %v2072_v39  ;;  %v2085_v43 = vpack.i.bf16 %v573_v37, %v572_v38  ;;  %v2317_v37 = vld [vmem:[%s2818_s4] sm:$0xff]  }
  0x9f   : > { %1891 = vmatpush3.bf16.msk.msra.mxu0 %vm2487_vm2, %v1767_v40  ;;  %v2318_v38 = vld [vmem:[%s2816_s2] sm:$0xff]  }
  0xa0   : > { %v570_v46 = vsel %vm566_vm0, 0.0, %v2074_v41  ;;  %v569_v47 = vsel %vm566_vm0, 0.0, %v2073_v42  ;;  %2086 = vrot.lane.b32.xlu0 %v2085_v43, %s2373_s24  ;;  %2076 = vrot.lane.b32.xlu1 %v2085_v43, %s2374_s25  ;;  %vm1440_vm0 = vcmask 203776  }
  0xa1   : > { %v575_v50 = vsel %vm571_vm1, %v570_v46, 0.0  ;;  %v574_v51 = vsel %vm571_vm1, %v569_v47, 0.0  ;;  %v1770_v52 = vpack.c.bf16 %v570_v46, %v569_v47  ;;  %1892 = vmatprep.subr.bf16.mxu0 %v2371_v10 }
  0xa2   : > { %v2080_v53 = vpack.i.bf16 %v575_v50, %v574_v51 }
  0xa3   : > { %1893 = vmatpush3.bf16.msk.msra.mxu0 %vm2487_vm2, %v1770_v52 }
  0xa4   : > { %2101 = vrot.lane.b32.xlu0 %v2085_v43, %s2829_s26  ;;  %2081 = vrot.lane.b32.xlu1 %v2080_v53, %s2374_s25 }
  0xa5   : > { %1894 = vmatprep.subr.bf16.mxu0 %v2371_v10 }
  0xa8   : > { %2091 = vrot.lane.b32.xlu1 %v2080_v53, %s2373_s24  ;;  %2106 = vrot.lane.b32.xlu0 %v2105_v56, %s2374_s25 }
  0xac   : > { %2096 = vrot.lane.b32.xlu1 %v2095_v57, %s2374_s25  ;;  %626 = vperm.xlu0 %2115, %v488_v58  }
  0xb0   : > { %2111 = vrot.lane.b32.xlu1 %v2080_v53, %s2829_s26  ;;  %783 = vperm.xlu0 %2115, %v493_v61  }
  0xb4   : > { %631 = vperm.xlu1 %2116, %v489_v60  }
  0xb8   : > { %778 = vperm.xlu1 %2116, %v492_v62  }
 0x112   : > { %v2087_v63 = vpop.permute.xlu0 %2086  ;;  %v2077_v0 = vpop.permute.xlu1 %2076 }
 0x113   : > { %v2079_v1 = vunpack.i.h.bf16 %v2077_v0  ;;  %v2078_v2 = vunpack.i.l.bf16 %v2077_v0  ;;  %v2089_v8 = vunpack.i.h.bf16 %v2087_v63  ;;  %v2088_v9 = vunpack.i.l.bf16 %v2087_v63 }
 0x115   : > { %v618_v3 = vpack.c.bf16 %v2079_v1, %v2078_v2  ;;  %v620_v14 = vpack.c.bf16 %v2089_v8, %v2088_v9 }
 0x116   : > { %v2082_v4 = vpop.permute.xlu1 %2081  ;;  %v2102_v7 = vpop.permute.xlu0 %2101 }
 0x117   : > { %v2084_v5 = vunpack.i.h.bf16 %v2082_v4  ;;  %v2083_v6 = vunpack.i.l.bf16 %v2082_v4  ;;  %1895 = vmatpush3.bf16.msra.mxu0 %v618_v3  ;;  %v2104_v22 = vunpack.i.h.bf16 %v2102_v7  ;;  %v2103_v23 = vunpack.i.l.bf16 %v2102_v7 }
 0x118   : > { %1896 = vmatprep.subr.bf16.mxu0 %v2371_v10 }
 0x119   : > { %v619_v11 = vpack.c.bf16 %v2084_v5, %v2083_v6  ;;  %v622_v30 = vpack.c.bf16 %v2104_v22, %v2103_v23  ;;  %v2319_v22 = vld [vmem:[%s2820_s6] sm:$0xff]  }
 0x11a   : > { %v2092_v12 = vpop.permute.xlu1 %2091  ;;  %v2107_v13 = vpop.permute.xlu0 %2106 }
 0x11b   : > { %1897 = vmatpush3.bf16.msra.mxu0 %v619_v11  ;;  %v2094_v15 = vunpack.i.h.bf16 %v2092_v12  ;;  %v2093_v16 = vunpack.i.l.bf16 %v2092_v12  ;;  %v2108_v20 = vunpack.i.l.bf16 %v2107_v13  ;;  %v2109_v21 = vunpack.i.h.bf16 %v2107_v13  ;;  %v499_v12 = vld [vmem:[%s2821_s7 + $0x8] sm:$0xff]  ;;  %v498_v13 = vld [vmem:[%s2821_s7] sm:$0xff] }
 0x11c   : > { %1898 = vmatprep.subr.bf16.mxu0 %v2371_v10 }
 0x11d   : > { %v621_v24 = vpack.c.bf16 %v2094_v15, %v2093_v16 }
 0x11e   : > { %v2097_v17 = vpop.permute.xlu1 %2096 }
 0x11f   : > { %v2099_v18 = vunpack.i.h.bf16 %v2097_v17  ;;  %v2098_v19 = vunpack.i.l.bf16 %v2097_v17  ;;  %1899 = vmatpush3.bf16.msra.mxu0 %v620_v14 }
 0x120   : > { %1900 = vmatprep.subr.bf16.mxu0 %v2371_v10 }
 0x121   : > { %v713_v25 = vsel %vm712_vm4, %v2491_v36, %v2098_v19 }
 0x122   : > { %v2112_v26 = vpop.permute.xlu1 %2111  ;;  %v715_v27 = vsel %vm714_vm5, %v713_v25, %v2099_v18 }
 0x123   : > { %1901 = vmatpush3.bf16.msra.mxu0 %v621_v24  ;;  %v717_v28 = vsel %vm716_vm6, %v715_v27, %v2108_v20  ;;  %v2114_v31 = vunpack.i.h.bf16 %v2112_v26  ;;  %v2113_v32 = vunpack.i.l.bf16 %v2112_v26 }
 0x124   : > { %1902 = vmatprep.subr.bf16.mxu0 %v2371_v10  ;;  %v719_v29 = vsel %vm718_vm7, %v717_v28, %v2109_v21 }
 0x125   : > { %v720_v34 = vpack.c.bf16 %v719_v29, %v719_v29  ;;  %v623_v36 = vpack.c.bf16 %v2114_v31, %v2113_v32 }
 0x127   : > { %1903 = vmatpush3.bf16.msra.mxu0 %v622_v30  ;;  %v731_v35 = vsel %vm712_vm4, %v720_v34, 0 }
 0x128   : > { %1904 = vmatprep.subr.bf16.mxu0 %v2371_v10  ;;  %1911 = vmatpush3.bf16.msra.mxu1 %v731_v35 }
 0x129   : > { %1916 = vmatprep.subr.bf16.mxu1 %v2371_v10 }
 0x12b   : > { %1905 = vmatpush3.bf16.msra.mxu0 %v623_v36  ;;  %1913 = vmatmul.mubr.msk.bf16.vlgmr.msra.gmra.mrb[0].mxu1 %vm726_vm8, %v2317_v37  ;;  %v627_v42 = vpop.permute.xlu0 %626 }
 0x12c   : > { %1922 = vmatprep.mubr.msk.bf16.mxu1 %vm2376_vm3, %v2371_v10  ;;  %1946 = vmatprep.subr.bf16.mxu0 %v2371_v10 }
 0x12e   : > { %1907 = vmatmul.mubr.bf16.vlgmr.msra.gmra.mrb[0].mxu0 %v2318_v38 }
 0x12f   : > { %1952 = vmatprep.mubr.msk.bf16.mxu0 %vm2376_vm3, %v2371_v10  ;;  %v784_v55 = vpop.permute.xlu0 %783 }
 0x133   : > { %v632_v40 = vpop.permute.xlu1 %631 }
 0x137   : > { %v779_v52 = vpop.permute.xlu1 %778 }
 0x1fe   : > { %v767_v39 = vpop.f32.mrb[0].mxu1 }
 0x1ff   : > { %v1914_v41 = vpop.f32.mrb[1].mxu1 }
 0x200   : > { %v770_v43 = vpop.f32.mrb[2].mxu1 }
 0x201   : > { %v674_v44 = vpop.f32.mrb[0].mxu0  ;;  %v1915_v45 = vpop.f32.mrb[3].mxu1 }
 0x202   : > { %v675_v46 = vadd.f32 %v674_v44, %v627_v42  ;;  %v1908_v47 = vpop.f32.mrb[1].mxu0 }
 0x203   : > { %v677_v48 = vpop.f32.mrb[2].mxu0 }
 0x204   : > { %v774_v49 = vadd.f32 %v767_v39, %v675_v46  ;;  %v678_v50 = vadd.f32 %v677_v48, %v632_v40  ;;  %v1909_v51 = vpop.f32.mrb[3].mxu0 }
 0x205   : > { %v506_v51 = vld [vmem:[%s2823_s9] sm:$0xff] }
 0x206   : > { %v2553_v53 = vadd.f32 %v779_v52, %v774_v49  ;;  %v775_v54 = vadd.f32 %v770_v43, %v678_v50  ;;  %v507_v50 = vld [vmem:[%s2823_s9 + $0x8] sm:$0xff] }
 0x208   : > { %v788_v56 = vmul.f32 0.5, %v2553_v53  ;;  %v2556_v57 = vadd.f32 %v784_v55, %v775_v54 }
 0x20a   : > { %2335 = vtanh.f32 %v788_v56  ;;  %v789_v58 = vmul.f32 0.5, %v2556_v57 }
 0x20c   : > { %2337 = vtanh.f32 %v789_v58 }
 0x214   : > { %v2336_v59 = vpop.eup %2335 }
 0x215   : > { %v792_v60 = vadd.f32 1.0, %v2336_v59 }
 0x216   : > { %v2338_v61 = vpop.eup %2337 }
 0x217   : > { %v793_v62 = vadd.f32 1.0, %v2338_v61  ;;  %v794_v63 = vmul.f32 %v792_v60, %v788_v56 }
 0x219   : > { %v795_v0 = vmul.f32 %v793_v62, %v789_v58  ;;  %v2320_v62 = vld [vmem:[%s2822_s8] sm:$0xff]  }
 0x21b   : > { %v2559_v1 = vpack.i.bf16 %v795_v0, %v794_v63 }
 0x21d   : > { %2118 = vrot.lane.b32.xlu1 %v2559_v1, %s2378_s28 }
 0x28f   : > { %v2119_v2 = vpop.permute.xlu1 %2118 }
 0x290   : > { %v2121_v3 = vunpack.i.h.bf16 %v2119_v2  ;;  %v2120_v4 = vunpack.i.l.bf16 %v2119_v2 }
 0x292   : > { %v806_v5 = vsel %vm804_vm9, 0.0, %v2121_v3  ;;  %v805_v6 = vsel %vm804_vm9, 0.0, %v2120_v4 }
 0x293   : > { %v808_v7 = vsel %vm571_vm1, %v806_v5, 0.0  ;;  %v807_v8 = vsel %vm571_vm1, %v805_v6, 0.0  ;;  %v1776_v9 = vpack.c.bf16 %v806_v5, %v805_v6 }
 0x294   : > { %v2127_v11 = vpack.i.bf16 %v808_v7, %v807_v8 }
 0x295   : > { %1917 = vmatpush3.bf16.msk.msra.mxu1 %vm2487_vm2, %v1776_v9 }
 0x296   : > { %2128 = vrot.lane.b32.xlu1 %v2127_v11, %s2373_s24  ;;  %2123 = vrot.lane.b32.xlu0 %v2127_v11, %s2374_s25 }
 0x297   : > { %1918 = vmatprep.subr.bf16.mxu1 %v2371_v10 }
 0x29a   : > { %833 = vperm.xlu1 %2116, %v499_v12   ;;  %828 = vperm.xlu0 %2115, %v498_v13  }
 0x308   : > { %v2129_v14 = vpop.permute.xlu1 %2128  ;;  %v2124_v15 = vpop.permute.xlu0 %2123 }
 0x309   : > { %v2126_v16 = vunpack.i.h.bf16 %v2124_v15  ;;  %v2125_v17 = vunpack.i.l.bf16 %v2124_v15  ;;  %v2131_v18 = vunpack.i.h.bf16 %v2129_v14  ;;  %v2130_v19 = vunpack.i.l.bf16 %v2129_v14 }
 0x30b   : > { %v824_v20 = vpack.c.bf16 %v2126_v16, %v2125_v17  ;;  %v825_v21 = vpack.c.bf16 %v2131_v18, %v2130_v19 }
 0x30d   : > { %1919 = vmatpush3.bf16.msra.mxu1 %v824_v20 }
 0x30e   : > { %1920 = vmatprep.subr.bf16.mxu1 %v2371_v10 }
 0x311   : > { %1921 = vmatpush3.bf16.msra.mxu1 %v825_v21 }
 0x312   : > { %1926 = vmatprep.subr.bf16.mxu1 %v2371_v10 }
 0x314   : > { %1923 = vmatmul.mubr.msk.bf16.vlgmr.msra.gmra.mrb[4].mxu1 %vm841_vm10, %v2319_v22 }
 0x315   : > { %1932 = vmatprep.mubr.msk.bf16.mxu1 %vm2376_vm3, %v2371_v10 }
 0x319   : > { %v829_v23 = vpop.permute.xlu0 %828  ;;  %v834_v27 = vpop.permute.xlu1 %833 }
 0x3e7   : > { %v879_v24 = vpop.f32.mrb[4].mxu1 }
 0x3e8   : > { %v880_v25 = vadd.f32 %v879_v24, %v829_v23  ;;  %v1924_v26 = vpop.f32.mrb[5].mxu1 }
 0x3e9   : > { %v882_v28 = vpop.f32.mrb[6].mxu1 }
 0x3ea   : > { %v886_v29 = vmul.f32 0.5, %v880_v25  ;;  %v883_v30 = vadd.f32 %v882_v28, %v834_v27  ;;  %v1925_v31 = vpop.f32.mrb[7].mxu1 }
 0x3ec   : > { %2339 = vtanh.f32 %v886_v29  ;;  %v887_v32 = vmul.f32 0.5, %v883_v30  ;;  %v508_v30 = vld [vmem:[%s2823_s9 + $0x10] sm:$0xff] }
 0x3ee   : > { %2341 = vtanh.f32 %v887_v32 }
 0x3f6   : > { %v2340_v34 = vpop.eup %2339 }
 0x3f7   : > { %v890_v35 = vadd.f32 1.0, %v2340_v34 }
 0x3f8   : > { %v2342_v37 = vpop.eup %2341 }
 0x3f9   : > { %v891_v36 = vadd.f32 1.0, %v2342_v37  ;;  %v892_v38 = vmul.f32 %v890_v35, %v886_v29 }
 0x3fb   : > { %v893_v39 = vmul.f32 %v891_v36, %v887_v32 }
 0x3fd   : > { %v2132_v40 = vpack.i.bf16 %v893_v39, %v892_v38  ;;  %v501_v39 = vld [vmem:[%s2821_s7 + $0x18] sm:$0xff] }
 0x3ff   : > { %2133 = vrot.lane.b32.xlu0 %v2132_v40, %s2378_s28  ;;  %v500_v40 = vld [vmem:[%s2821_s7 + $0x10] sm:$0xff] }
 0x471   : > { %v2134_v41 = vpop.permute.xlu0 %2133 }
 0x472   : > { %v2136_v42 = vunpack.i.h.bf16 %v2134_v41  ;;  %v2135_v43 = vunpack.i.l.bf16 %v2134_v41  ;;  %v515_v41 = vld [vmem:[%s2825_s11 + $0x8] sm:$0xff] }
 0x474   : > { %v903_v44 = vsel %vm804_vm9, 0.0, %v2136_v42  ;;  %v902_v45 = vsel %vm804_vm9, 0.0, %v2135_v43  ;;  %v514_v42 = vld [vmem:[%s2825_s11] sm:$0xff] }
 0x475   : > { %v905_v46 = vsel %vm571_vm1, %v903_v44, 0.0  ;;  %v904_v47 = vsel %vm571_vm1, %v902_v45, 0.0  ;;  %v1781_v48 = vpack.c.bf16 %v903_v44, %v902_v45 }
 0x476   : > { %v2142_v49 = vpack.i.bf16 %v905_v46, %v904_v47 }
 0x477   : > { %1927 = vmatpush3.bf16.msk.msra.mxu1 %vm2487_vm2, %v1781_v48 }
 0x478   : > { %2143 = vrot.lane.b32.xlu0 %v2142_v49, %s2373_s24  ;;  %2138 = vrot.lane.b32.xlu1 %v2142_v49, %s2374_s25 }
 0x479   : > { %1928 = vmatprep.subr.bf16.mxu1 %v2371_v10 }
 0x47c   : > { %930 = vperm.xlu0 %2115, %v507_v50   ;;  %925 = vperm.xlu1 %2116, %v506_v51  }
 0x480   : > { %2153 = vrot.lane.b32.xlu0 %v2559_v1, %s2379_s15 }
 0x4ea   : > { %v2144_v52 = vpop.permute.xlu0 %2143  ;;  %v2139_v54 = vpop.permute.xlu1 %2138 }
 0x4eb   : > { %v2141_v55 = vunpack.i.h.bf16 %v2139_v54  ;;  %v2140_v56 = vunpack.i.l.bf16 %v2139_v54  ;;  %v2146_v58 = vunpack.i.h.bf16 %v2144_v52  ;;  %v2145_v59 = vunpack.i.l.bf16 %v2144_v52  ;;  %v2321_v52 = vld [vmem:[%s2820_s6 + $0x8] sm:$0xff]  }
 0x4ed   : > { %v921_v60 = vpack.c.bf16 %v2141_v55, %v2140_v56  ;;  %v922_v61 = vpack.c.bf16 %v2146_v58, %v2145_v59 }
 0x4ef   : > { %1929 = vmatpush3.bf16.msra.mxu1 %v921_v60 }
 0x4f0   : > { %1930 = vmatprep.subr.bf16.mxu1 %v2371_v10 }
 0x4f3   : > { %1931 = vmatpush3.bf16.msra.mxu1 %v922_v61 }
 0x4f4   : > { %1936 = vmatprep.subr.bf16.mxu1 %v2371_v10 }
 0x4f6   : > { %1933 = vmatmul.mubr.msk.bf16.vlgmr.msra.gmra.mrb[8].mxu1 %vm841_vm10, %v2320_v62 }
 0x4f7   : > { %1942 = vmatprep.mubr.msk.bf16.mxu1 %vm2376_vm3, %v2371_v10 }
 0x4fb   : > { %v931_v63 = vpop.permute.xlu0 %930  ;;  %v926_v6 = vpop.permute.xlu1 %925 }
 0x4ff   : > { %v2154_v0 = vpop.permute.xlu0 %2153 }
 0x500   : > { %v2156_v1 = vunpack.i.h.bf16 %v2154_v0  ;;  %v2155_v2 = vunpack.i.l.bf16 %v2154_v0 }
 0x502   : > { %v2613_v3 = vsel %vm1000_vm11, 0.0, %v2156_v1  ;;  %v2616_v4 = vsel %vm1000_vm11, 0.0, %v2155_v2 }
 0x503   : > { %v1796_v5 = vpack.c.bf16 %v2613_v3, %v2616_v4  ;;  %v1189_v37 = vsel %vm1003_vm12, %v2613_v3, 0.0  ;;  %v1188_v36 = vsel %vm1003_vm12, %v2616_v4, 0.0 }
 0x504   : > { %v2172_v38 = vpack.i.bf16 %v1189_v37, %v1188_v36 }
 0x5c9   : > { %v975_v7 = vpop.f32.mrb[8].mxu1 }
 0x5ca   : > { %v976_v8 = vadd.f32 %v975_v7, %v926_v6  ;;  %v1934_v9 = vpop.f32.mrb[9].mxu1 }
 0x5cb   : > { %v978_v11 = vpop.f32.mrb[10].mxu1 }
 0x5cc   : > { %v2621_v12 = vadd.f32 %v976_v8, %v2553_v53  ;;  %v979_v13 = vadd.f32 %v978_v11, %v931_v63  ;;  %v1935_v14 = vpop.f32.mrb[11].mxu1 }
 0x5ce   : > { %v984_v15 = vmul.f32 0.5, %v2621_v12  ;;  %v2625_v16 = vadd.f32 %v979_v13, %v2556_v57 }
 0x5d0   : > { %2343 = vtanh.f32 %v984_v15  ;;  %v985_v17 = vmul.f32 0.5, %v2625_v16 }
 0x5d2   : > { %2345 = vtanh.f32 %v985_v17 }
 0x5da   : > { %v2344_v18 = vpop.eup %2343 }
 0x5db   : > { %v988_v19 = vadd.f32 1.0, %v2344_v18 }
 0x5dc   : > { %v2346_v20 = vpop.eup %2345 }
 0x5dd   : > { %v989_v21 = vadd.f32 1.0, %v2346_v20  ;;  %v990_v22 = vmul.f32 %v988_v19, %v984_v15 }
 0x5df   : > { %v991_v23 = vmul.f32 %v989_v21, %v985_v17  ;;  %v2322_v17 = vld [vmem:[%s2824_s10] sm:$0xff]  }
 0x5e1   : > { %v2147_v24 = vpack.i.bf16 %v991_v23, %v990_v22 }
 0x5e3   : > { %2148 = vrot.lane.b32.xlu1 %v2147_v24, %s2379_s15 }
 0x655   : > { %v2149_v25 = vpop.permute.xlu1 %2148 }
 0x656   : > { %v2151_v26 = vunpack.i.h.bf16 %v2149_v25  ;;  %v2150_v27 = vunpack.i.l.bf16 %v2149_v25 }
 0x658   : > { %v1002_v28 = vsel %vm1000_vm11, 0.0, %v2151_v26  ;;  %v1001_v29 = vsel %vm1000_vm11, 0.0, %v2150_v27 }
 0x659   : > { %v1005_v31 = vsel %vm1003_vm12, %v1002_v28, 0.0  ;;  %v1004_v32 = vsel %vm1003_vm12, %v1001_v29, 0.0  ;;  %v1786_v34 = vpack.c.bf16 %v1002_v28, %v1001_v29 }
 0x65a   : > { %v2162_v35 = vpack.i.bf16 %v1005_v31, %v1004_v32 }
 0x65b   : > { %1937 = vmatpush3.bf16.msk.msra.mxu1 %vm2633_vm13, %v1786_v34 }
 0x65c   : > { %2163 = vrot.lane.b32.xlu0 %v2162_v35, %s2380_s18  ;;  %2158 = vrot.lane.b32.xlu1 %v2162_v35, %s2829_s26 }
 0x65d   : > { %1938 = vmatprep.subr.bf16.mxu1 %v2371_v10 }
 0x660   : > { %2173 = vrot.lane.b32.xlu0 %v2172_v38, %s2373_s24  ;;  %2168 = vrot.lane.b32.xlu1 %v2172_v38, %s2374_s25 }
 0x664   : > { %2183 = vrot.lane.b32.xlu0 %v2172_v38, %s2831_s19  ;;  %2178 = vrot.lane.b32.xlu1 %v2172_v38, %s2829_s26  ;;  %s2387_s26 = smov 113  }
 0x668   : > { %2193 = vrot.lane.b32.xlu0 %v2172_v38, %s2380_s18  ;;  %2188 = vrot.lane.b32.xlu1 %v2172_v38, %s2833_s20 }
 0x66c   : > { %1030 = vperm.xlu0 %2115, %v501_v39   ;;  %1025 = vperm.xlu1 %2116, %v500_v40  }
 0x670   : > { %1242 = vperm.xlu0 %2115, %v515_v41   ;;  %1237 = vperm.xlu1 %2116, %v514_v42  }
 0x6ce   : > { %v2164_v43 = vpop.permute.xlu0 %2163  ;;  %v2159_v44 = vpop.permute.xlu1 %2158 }
 0x6cf   : > { %v2161_v45 = vunpack.i.h.bf16 %v2159_v44  ;;  %v2160_v46 = vunpack.i.l.bf16 %v2159_v44  ;;  %v2166_v47 = vunpack.i.h.bf16 %v2164_v43  ;;  %v2165_v48 = vunpack.i.l.bf16 %v2164_v43 }
 0x6d1   : > { %v1021_v49 = vpack.c.bf16 %v2161_v45, %v2160_v46  ;;  %v1022_v50 = vpack.c.bf16 %v2166_v47, %v2165_v48 }
 0x6d2   : > { %v2169_v51 = vpop.permute.xlu1 %2168  ;;  %v2174_v56 = vpop.permute.xlu0 %2173 }
 0x6d3   : > { %1939 = vmatpush3.bf16.msra.mxu1 %v1021_v49  ;;  %v2171_v54 = vunpack.i.h.bf16 %v2169_v51  ;;  %v2170_v55 = vunpack.i.l.bf16 %v2169_v51  ;;  %v2176_v58 = vunpack.i.h.bf16 %v2174_v56  ;;  %v2175_v59 = vunpack.i.l.bf16 %v2174_v56 }
 0x6d4   : > { %1940 = vmatprep.subr.bf16.mxu1 %v2371_v10 }
 0x6d5   : > { %v1229_v60 = vpack.c.bf16 %v2171_v54, %v2170_v55  ;;  %v1230_v62 = vpack.c.bf16 %v2176_v58, %v2175_v59 }
 0x6d6   : > { %v2179_v61 = vpop.permute.xlu1 %2178  ;;  %v2184_v1 = vpop.permute.xlu0 %2183 }
 0x6d7   : > { %1941 = vmatpush3.bf16.msra.mxu1 %v1022_v50  ;;  %v2181_v63 = vunpack.i.h.bf16 %v2179_v61  ;;  %v2180_v0 = vunpack.i.l.bf16 %v2179_v61  ;;  %v2186_v2 = vunpack.i.h.bf16 %v2184_v1  ;;  %v2185_v3 = vunpack.i.l.bf16 %v2184_v1 }
 0x6d8   : > { %1956 = vmatprep.subr.bf16.mxu1 %v2371_v10 }
 0x6d9   : > { %v1231_v4 = vpack.c.bf16 %v2181_v63, %v2180_v0  ;;  %v1232_v6 = vpack.c.bf16 %v2186_v2, %v2185_v3 }
 0x6da   : > { %1943 = vmatmul.mubr.msk.bf16.vlgmr.msra.gmra.mrb[12].mxu1 %vm841_vm10, %v2321_v52  ;;  %v2194_v9 = vpop.permute.xlu0 %2193 }
 0x6db   : > { %1957 = vmatpush3.bf16.msk.msra.mxu1 %vm2633_vm13, %v1796_v5  ;;  %1970 = vmatprep.mubr.msk.bf16.mxu1 %vm2376_vm3, %v2371_v10  ;;  %v2189_v5 = vpop.permute.xlu1 %2188  ;;  %v2196_v11 = vunpack.i.h.bf16 %v2194_v9  ;;  %v2195_v13 = vunpack.i.l.bf16 %v2194_v9  ;;  %v523_v9 = vld [vmem:[%s2827_s13 + $0x8] sm:$0xff] }
 0x6dc   : > { %1958 = vmatprep.subr.bf16.mxu1 %v2371_v10  ;;  %v2191_v7 = vunpack.i.h.bf16 %v2189_v5  ;;  %v2190_v8 = vunpack.i.l.bf16 %v2189_v5 }
 0x6dd   : > { %v1234_v15 = vpack.c.bf16 %v2196_v11, %v2195_v13  ;;  %v522_v11 = vld [vmem:[%s2827_s13] sm:$0xff] }
 0x6de   : > { %v1233_v14 = vpack.c.bf16 %v2191_v7, %v2190_v8 }
 0x6df   : > { %1959 = vmatpush3.bf16.msra.mxu1 %v1229_v60 }
 0x6e0   : > { %1960 = vmatprep.subr.bf16.mxu1 %v2371_v10 }
 0x6e3   : > { %1961 = vmatpush3.bf16.msra.mxu1 %v1230_v62 }
 0x6e4   : > { %1962 = vmatprep.subr.bf16.mxu1 %v2371_v10 }
 0x6e7   : > { %1963 = vmatpush3.bf16.msra.mxu1 %v1231_v4 }
 0x6e8   : > { %1964 = vmatprep.subr.bf16.mxu1 %v2371_v10 }
 0x6eb   : > { %1965 = vmatpush3.bf16.msra.mxu1 %v1232_v6  ;;  %v1026_v18 = vpop.permute.xlu1 %1025  ;;  %v1031_v22 = vpop.permute.xlu0 %1030 }
 0x6ec   : > { %1966 = vmatprep.subr.bf16.mxu1 %v2371_v10 }
 0x6ef   : > { %1967 = vmatpush3.bf16.msra.mxu1 %v1233_v14  ;;  %v1238_v36 = vpop.permute.xlu1 %1237  ;;  %v1243_v41 = vpop.permute.xlu0 %1242 }
 0x6f0   : > { %1968 = vmatprep.subr.bf16.mxu1 %v2371_v10 }
 0x6f3   : > { %1969 = vmatpush3.bf16.msra.mxu1 %v1234_v15 }
 0x6f4   : > { %1992 = vmatprep.subr.bf16.mxu1 %v2371_v10 }
 0x6f6   : > { %1971 = vmatmul.mubr.msk.bf16.vlgmr.msra.gmra.mrb[16].mxu1 %vm1250_vm14, %v2322_v17 }
 0x6f7   : > { %2006 = vmatprep.mubr.msk.bf16.mxu1 %vm2376_vm3, %v2371_v10 }
 0x7ad   : > { %v1075_v19 = vpop.f32.mrb[12].mxu1 }
 0x7ae   : > { %v1076_v20 = vadd.f32 %v1075_v19, %v1026_v18  ;;  %v1944_v21 = vpop.f32.mrb[13].mxu1 }
 0x7af   : > { %v1078_v23 = vpop.f32.mrb[14].mxu1 }
 0x7b0   : > { %v1082_v24 = vmul.f32 0.5, %v1076_v20  ;;  %v1079_v25 = vadd.f32 %v1078_v23, %v1031_v22  ;;  %v1945_v26 = vpop.f32.mrb[15].mxu1  ;;  %v2323_v22 = vld [vmem:[%s2822_s8 + $0x8] sm:$0xff]  }
 0x7b2   : > { %2347 = vtanh.f32 %v1082_v24  ;;  %v1083_v27 = vmul.f32 0.5, %v1079_v25 }
 0x7b4   : > { %2349 = vtanh.f32 %v1083_v27 }
 0x7bc   : > { %v2348_v28 = vpop.eup %2347 }
 0x7bd   : > { %v1086_v29 = vadd.f32 1.0, %v2348_v28 }
 0x7be   : > { %v2350_v31 = vpop.eup %2349 }
 0x7bf   : > { %v1087_v32 = vadd.f32 1.0, %v2350_v31  ;;  %v1088_v34 = vmul.f32 %v1086_v29, %v1082_v24 }
 0x7c1   : > { %v1089_v35 = vmul.f32 %v1087_v32, %v1083_v27 }
 0x7c3   : > { %v2197_v37 = vpack.i.bf16 %v1089_v35, %v1088_v34 }
 0x7c5   : > { %2198 = vrot.lane.b32.xlu1 %v2197_v37, %s2378_s28  ;;  %s2838_s28 = smov 124  }
 0x7c9   : > { %v1288_v38 = vpop.f32.mrb[16].mxu1 }
 0x7ca   : > { %v1289_v39 = vadd.f32 %v1288_v38, %v1238_v36  ;;  %v1972_v40 = vpop.f32.mrb[17].mxu1 }
 0x7cb   : > { %v1291_v42 = vpop.f32.mrb[18].mxu1 }
 0x7cc   : > { %v1295_v43 = vmul.f32 0.5, %v1289_v39  ;;  %v1292_v44 = vadd.f32 %v1291_v42, %v1243_v41  ;;  %v1973_v45 = vpop.f32.mrb[19].mxu1 }
 0x7ce   : > { %2351 = vtanh.f32 %v1295_v43  ;;  %v1296_v46 = vmul.f32 0.5, %v1292_v44 }
 0x7d0   : > { %2353 = vtanh.f32 %v1296_v46 }
 0x7d8   : > { %v2352_v47 = vpop.eup %2351 }
 0x7d9   : > { %v1299_v48 = vadd.f32 1.0, %v2352_v47 }
 0x7da   : > { %v2354_v49 = vpop.eup %2353 }
 0x7db   : > { %v1300_v50 = vadd.f32 1.0, %v2354_v49  ;;  %v1301_v51 = vmul.f32 %v1299_v48, %v1295_v43  ;;  %v2324_v49 = vld [vmem:[%s2826_s12] sm:$0xff]  }
 0x7dd   : > { %v1302_v52 = vmul.f32 %v1300_v50, %v1296_v46 }
 0x7df   : > { %v2202_v54 = vpack.i.bf16 %v1302_v52, %v1301_v51 }
 0x7e1   : > { %2203 = vrot.lane.b32.xlu0 %v2202_v54, %s2379_s15 }
 0x837   : > { %v2199_v55 = vpop.permute.xlu1 %2198 }
 0x838   : > { %v2201_v56 = vunpack.i.h.bf16 %v2199_v55  ;;  %v2200_v58 = vunpack.i.l.bf16 %v2199_v55 }
 0x83a   : > { %v1099_v59 = vsel %vm804_vm9, 0.0, %v2201_v56  ;;  %v1098_v60 = vsel %vm804_vm9, 0.0, %v2200_v58 }
 0x83b   : > { %v1101_v61 = vsel %vm571_vm1, %v1099_v59, 0.0  ;;  %v1100_v62 = vsel %vm571_vm1, %v1098_v60, 0.0  ;;  %v1791_v63 = vpack.c.bf16 %v1099_v59, %v1098_v60  ;;  %vm1805_vm1 = vmpackc.low %vm1440_vm0, %vm1440_vm0 }
 0x83c   : > { %v2207_v0 = vpack.i.bf16 %v1101_v61, %v1100_v62 }
 0x83d   : > { %1947 = vmatpush3.bf16.msk.msra.mxu0 %vm2487_vm2, %v1791_v63  ;;  %vm1685_vm2 = vcmask 125952  }
 0x83e   : > { %2208 = vrot.lane.b32.xlu1 %v2207_v0, %s2374_s25  ;;  %2213 = vrot.lane.b32.xlu0 %v2207_v0, %s2373_s24 }
 0x83f   : > { %1948 = vmatprep.subr.bf16.mxu0 %v2371_v10 }
 0x853   : > { %v2204_v1 = vpop.permute.xlu0 %2203 }
 0x854   : > { %v2206_v2 = vunpack.i.h.bf16 %v2204_v1  ;;  %v2205_v3 = vunpack.i.l.bf16 %v2204_v1 }
 0x856   : > { %v1312_v4 = vsel %vm1000_vm11, 0.0, %v2206_v2  ;;  %v1311_v5 = vsel %vm1000_vm11, 0.0, %v2205_v3 }
 0x857   : > { %v1314_v6 = vsel %vm1003_vm12, %v1312_v4, 0.0  ;;  %v1313_v7 = vsel %vm1003_vm12, %v1311_v5, 0.0  ;;  %v1801_v8 = vpack.c.bf16 %v1312_v4, %v1311_v5 }
 0x858   : > { %v2222_v33 = vpack.i.bf16 %v1314_v6, %v1313_v7 }
 0x85a   : > { %2223 = vrot.lane.b32.xlu0 %v2222_v33, %s2373_s24  ;;  %2218 = vrot.lane.b32.xlu1 %v2222_v33, %s2374_s25 }
 0x85e   : > { %2233 = vrot.lane.b32.xlu0 %v2222_v33, %s2838_s28  ;;  %2228 = vrot.lane.b32.xlu1 %v2222_v33, %s2839_s23 }
 0x862   : > { %2243 = vrot.lane.b32.xlu0 %v2222_v33, %s2380_s18  ;;  %2238 = vrot.lane.b32.xlu1 %v2222_v33, %s2833_s20 }
 0x866   : > { %1367 = vperm.xlu0 %2115, %v523_v9   ;;  %1362 = vperm.xlu1 %2116, %v522_v11  }
 0x8b0   : > { %v2209_v13 = vpop.permute.xlu1 %2208  ;;  %v2214_v14 = vpop.permute.xlu0 %2213 }
 0x8b1   : > { %v2211_v15 = vunpack.i.h.bf16 %v2209_v13  ;;  %v2210_v17 = vunpack.i.l.bf16 %v2209_v13  ;;  %v2216_v19 = vunpack.i.h.bf16 %v2214_v14  ;;  %v2215_v20 = vunpack.i.l.bf16 %v2214_v14 }
 0x8b3   : > { %v1117_v18 = vpack.c.bf16 %v2211_v15, %v2210_v17  ;;  %v1118_v21 = vpack.c.bf16 %v2216_v19, %v2215_v20  ;;  %v517_v15 = vld [vmem:[%s2825_s11 + $0x18] sm:$0xff]  ;;  %v516_v17 = vld [vmem:[%s2825_s11 + $0x10] sm:$0xff] }
 0x8b5   : > { %1949 = vmatpush3.bf16.msra.mxu0 %v1117_v18 }
 0x8b6   : > { %1950 = vmatprep.subr.bf16.mxu0 %v2371_v10 }
 0x8b9   : > { %1951 = vmatpush3.bf16.msra.mxu0 %v1118_v21 }
 0x8ba   : > { %1974 = vmatprep.subr.bf16.mxu0 %v2371_v10 }
 0x8bc   : > { %1953 = vmatmul.mubr.msk.bf16.vlgmr.msra.gmra.mrb[4].mxu0 %vm841_vm10, %v2323_v22 }
 0x8bd   : > { %1975 = vmatpush3.bf16.msk.msra.mxu0 %vm2633_vm13, %v1801_v8  ;;  %1988 = vmatprep.mubr.msk.bf16.mxu0 %vm2376_vm3, %v2371_v10 }
 0x8be   : > { %1976 = vmatprep.subr.bf16.mxu0 %v2371_v10 }
 0x8cc   : > { %v2224_v23 = vpop.permute.xlu0 %2223  ;;  %v2219_v24 = vpop.permute.xlu1 %2218 }
 0x8cd   : > { %v2221_v25 = vunpack.i.h.bf16 %v2219_v24  ;;  %v2220_v26 = vunpack.i.l.bf16 %v2219_v24  ;;  %v2226_v27 = vunpack.i.h.bf16 %v2224_v23  ;;  %v2225_v28 = vunpack.i.l.bf16 %v2224_v23 }
 0x8cf   : > { %v1354_v29 = vpack.c.bf16 %v2221_v25, %v2220_v26  ;;  %v1355_v32 = vpack.c.bf16 %v2226_v27, %v2225_v28 }
 0x8d0   : > { %v2229_v31 = vpop.permute.xlu1 %2228  ;;  %v2234_v37 = vpop.permute.xlu0 %2233 }
 0x8d1   : > { %1977 = vmatpush3.bf16.msra.mxu0 %v1354_v29  ;;  %v2231_v34 = vunpack.i.h.bf16 %v2229_v31  ;;  %v2230_v35 = vunpack.i.l.bf16 %v2229_v31  ;;  %v2236_v36 = vunpack.i.h.bf16 %v2234_v37  ;;  %v2235_v38 = vunpack.i.l.bf16 %v2234_v37 }
 0x8d2   : > { %1978 = vmatprep.subr.bf16.mxu0 %v2371_v10 }
 0x8d3   : > { %v1356_v39 = vpack.c.bf16 %v2231_v34, %v2230_v35  ;;  %v1357_v41 = vpack.c.bf16 %v2236_v36, %v2235_v38 }
 0x8d4   : > { %v2239_v40 = vpop.permute.xlu1 %2238  ;;  %v2244_v44 = vpop.permute.xlu0 %2243 }
 0x8d5   : > { %1979 = vmatpush3.bf16.msra.mxu0 %v1355_v32  ;;  %v2241_v42 = vunpack.i.h.bf16 %v2239_v40  ;;  %v2240_v43 = vunpack.i.l.bf16 %v2239_v40  ;;  %v2246_v45 = vunpack.i.h.bf16 %v2244_v44  ;;  %v2245_v46 = vunpack.i.l.bf16 %v2244_v44  ;;  %v2325_v44 = vld [vmem:[%s2824_s10 + $0x8] sm:$0xff]  }
 0x8d6   : > { %1980 = vmatprep.subr.bf16.mxu0 %v2371_v10 }
 0x8d7   : > { %v1358_v47 = vpack.c.bf16 %v2241_v42, %v2240_v43  ;;  %v1359_v48 = vpack.c.bf16 %v2246_v45, %v2245_v46 }
 0x8d9   : > { %1981 = vmatpush3.bf16.msra.mxu0 %v1356_v39 }
 0x8da   : > { %1982 = vmatprep.subr.bf16.mxu0 %v2371_v10 }
 0x8dd   : > { %1983 = vmatpush3.bf16.msra.mxu0 %v1357_v41 }
 0x8de   : > { %1984 = vmatprep.subr.bf16.mxu0 %v2371_v10 }
 0x8e1   : > { %1985 = vmatpush3.bf16.msra.mxu0 %v1358_v47 }
 0x8e2   : > { %1986 = vmatprep.subr.bf16.mxu0 %v2371_v10 }
 0x8e5   : > { %1987 = vmatpush3.bf16.msra.mxu0 %v1359_v48  ;;  %v1363_v50 = vpop.permute.xlu1 %1362  ;;  %v1368_v55 = vpop.permute.xlu0 %1367 }
 0x8e6   : > { %2010 = vmatprep.subr.bf16.mxu0 %v2371_v10 }
 0x8e8   : > { %1989 = vmatmul.mubr.msk.bf16.vlgmr.msra.gmra.mrb[8].mxu0 %vm1250_vm14, %v2324_v49 }
 0x8e9   : > { %2024 = vmatprep.mubr.msk.bf16.mxu0 %vm2376_vm3, %v2371_v10 }
 0x9bb   : > { %v1412_v51 = vpop.f32.mrb[8].mxu0 }
 0x9bc   : > { %v1413_v52 = vadd.f32 %v1412_v51, %v1363_v50  ;;  %v1990_v54 = vpop.f32.mrb[9].mxu0 }
 0x9bd   : > { %v1415_v56 = vpop.f32.mrb[10].mxu0 }
 0x9be   : > { %v2743_v58 = vadd.f32 %v1413_v52, %v2553_v53  ;;  %v1416_v59 = vadd.f32 %v1415_v56, %v1368_v55  ;;  %v1991_v60 = vpop.f32.mrb[11].mxu0 }
 0x9c0   : > { %v1421_v61 = vmul.f32 0.5, %v2743_v58  ;;  %v2747_v62 = vadd.f32 %v1416_v59, %v2556_v57 }
 0x9c2   : > { %2355 = vtanh.f32 %v1421_v61  ;;  %v1422_v63 = vmul.f32 0.5, %v2747_v62 }
 0x9c4   : > { %2357 = vtanh.f32 %v1422_v63 }
 0x9cc   : > { %v2356_v0 = vpop.eup %2355 }
 0x9cd   : > { %v1425_v1 = vadd.f32 1.0, %v2356_v0 }
 0x9ce   : > { %v2358_v2 = vpop.eup %2357 }
 0x9cf   : > { %v1426_v3 = vadd.f32 1.0, %v2358_v2  ;;  %v1427_v4 = vmul.f32 %v1425_v1, %v1421_v61 }
 0x9d1   : > { %v1428_v5 = vmul.f32 %v1426_v3, %v1422_v63 }
 0x9d3   : > { %v2247_v6 = vpack.i.bf16 %v1428_v5, %v1427_v4 }
 0x9d5   : > { %2248 = vrot.lane.b32.xlu1 %v2247_v6, %s2383_s16  ;;  %s1819_s16 = sshll.u32 %s2842_s30, 3 }
 0xa47   : > { %v2249_v53 = vpop.permute.xlu1 %2248 }
 0xa48   : > { %v2251_v7 = vunpack.i.h.bf16 %v2249_v53  ;;  %v2250_v8 = vunpack.i.l.bf16 %v2249_v53 }
 0xa4a   : > { %v1439_v57 = vsel %vm1437_vm15, 0.0, %v2251_v7  ;;  %v1438_v33 = vsel %vm1437_vm15, 0.0, %v2250_v8 }
 0xa4b   : > { %v1442_v9 = vsel %vm1440_vm0, %v1439_v57, 0.0  ;;  %v1441_v11 = vsel %vm1440_vm0, %v1438_v33, 0.0  ;;  %v1806_v13 = vpack.c.bf16 %v1439_v57, %v1438_v33  ;;  %v509_v33 = vld [vmem:[%s2823_s9 + $0x18] sm:$0xff] }
 0xa4c   : > { %v2257_v14 = vpack.i.bf16 %v1442_v9, %v1441_v11  ;;  %v525_v9 = vld [vmem:[%s2827_s13 + $0x18] sm:$0xff]  ;;  %v524_v11 = vld [vmem:[%s2827_s13 + $0x10] sm:$0xff] }
 0xa4d   : > { %1993 = vmatpush3.bf16.msk.msra.mxu1 %vm1805_vm1, %v1806_v13 }
 0xa4e   : > { %2258 = vrot.lane.b32.xlu1 %v2257_v14, %s2380_s18  ;;  %2253 = vrot.lane.b32.xlu0 %v2257_v14, %s2839_s23 }
 0xa4f   : > { %1994 = vmatprep.subr.bf16.mxu1 %v2371_v10 }
 0xa52   : > { %2268 = vrot.lane.b32.xlu1 %v2257_v14, %s2384_s17  ;;  %2263 = vrot.lane.b32.xlu0 %v2257_v14, %s2385_s21 }
 0xa56   : > { %2278 = vrot.lane.b32.xlu1 %v2257_v14, %s2386_s22  ;;  %2273 = vrot.lane.b32.xlu0 %v2257_v14, %s2387_s26 }
 0xa5a   : > { %1495 = vperm.xlu1 %2116, %v517_v15   ;;  %1490 = vperm.xlu0 %2115, %v516_v17  }
 0xac0   : > { %v2259_v18 = vpop.permute.xlu1 %2258  ;;  %v2254_v19 = vpop.permute.xlu0 %2253 }
 0xac1   : > { %v2256_v20 = vunpack.i.h.bf16 %v2254_v19  ;;  %v2255_v21 = vunpack.i.l.bf16 %v2254_v19  ;;  %v2261_v22 = vunpack.i.h.bf16 %v2259_v18  ;;  %v2260_v23 = vunpack.i.l.bf16 %v2259_v18 }
 0xac3   : > { %v1482_v24 = vpack.c.bf16 %v2256_v20, %v2255_v21  ;;  %v1483_v26 = vpack.c.bf16 %v2261_v22, %v2260_v23 }
 0xac4   : > { %v2264_v25 = vpop.permute.xlu0 %2263  ;;  %v2269_v29 = vpop.permute.xlu1 %2268 }
 0xac5   : > { %1995 = vmatpush3.bf16.msra.mxu1 %v1482_v24  ;;  %v2266_v27 = vunpack.i.h.bf16 %v2264_v25  ;;  %v2265_v28 = vunpack.i.l.bf16 %v2264_v25  ;;  %v2271_v31 = vunpack.i.h.bf16 %v2269_v29  ;;  %v2270_v32 = vunpack.i.l.bf16 %v2269_v29 }
 0xac6   : > { %1996 = vmatprep.subr.bf16.mxu1 %v2371_v10 }
 0xac7   : > { %v1484_v34 = vpack.c.bf16 %v2266_v27, %v2265_v28  ;;  %v1485_v37 = vpack.c.bf16 %v2271_v31, %v2270_v32 }
 0xac8   : > { %v2274_v35 = vpop.permute.xlu0 %2273  ;;  %v2279_v39 = vpop.permute.xlu1 %2278 }
 0xac9   : > { %1997 = vmatpush3.bf16.msra.mxu1 %v1483_v26  ;;  %v2276_v36 = vunpack.i.h.bf16 %v2274_v35  ;;  %v2275_v38 = vunpack.i.l.bf16 %v2274_v35  ;;  %v2281_v40 = vunpack.i.h.bf16 %v2279_v39  ;;  %v2280_v41 = vunpack.i.l.bf16 %v2279_v39 }
 0xaca   : > { %1998 = vmatprep.subr.bf16.mxu1 %v2371_v10 }
 0xacb   : > { %v1486_v42 = vpack.c.bf16 %v2276_v36, %v2275_v38  ;;  %v1487_v43 = vpack.c.bf16 %v2281_v40, %v2280_v41  ;;  %v2326_v40 = vld [vmem:[%s2826_s12 + $0x8] sm:$0xff]  }
 0xacd   : > { %1999 = vmatpush3.bf16.msra.mxu1 %v1484_v34 }
 0xace   : > { %2000 = vmatprep.subr.bf16.mxu1 %v2371_v10 }
 0xad1   : > { %2001 = vmatpush3.bf16.msra.mxu1 %v1485_v37 }
 0xad2   : > { %2002 = vmatprep.subr.bf16.mxu1 %v2371_v10 }
 0xad5   : > { %2003 = vmatpush3.bf16.msra.mxu1 %v1486_v42 }
 0xad6   : > { %2004 = vmatprep.subr.bf16.mxu1 %v2371_v10 }
 0xad9   : > { %2005 = vmatpush3.bf16.msra.mxu1 %v1487_v43  ;;  %v1491_v45 = vpop.permute.xlu0 %1490  ;;  %v1496_v49 = vpop.permute.xlu1 %1495 }
 0xadc   : > { %2007 = vmatmul.mubr.msk.bf16.vlgmr.msra.gmra.mrb[20].mxu1 %vm1250_vm14, %v2325_v44 }
 0xbaf   : > { %v1540_v46 = vpop.f32.mrb[20].mxu1 }
 0xbb0   : > { %v1541_v47 = vadd.f32 %v1540_v46, %v1491_v45  ;;  %v2008_v48 = vpop.f32.mrb[21].mxu1 }
 0xbb1   : > { %v1543_v50 = vpop.f32.mrb[22].mxu1 }
 0xbb2   : > { %v1547_v51 = vmul.f32 0.5, %v1541_v47  ;;  %v1544_v52 = vadd.f32 %v1543_v50, %v1496_v49  ;;  %v2009_v54 = vpop.f32.mrb[23].mxu1 }
 0xbb4   : > { %2359 = vtanh.f32 %v1547_v51  ;;  %v1548_v55 = vmul.f32 0.5, %v1544_v52 }
 0xbb6   : > { %2361 = vtanh.f32 %v1548_v55 }
 0xbbe   : > { %v2360_v56 = vpop.eup %2359 }
 0xbbf   : > { %v1551_v59 = vadd.f32 1.0, %v2360_v56 }
 0xbc0   : > { %v2362_v60 = vpop.eup %2361 }
 0xbc1   : > { %v1552_v61 = vadd.f32 1.0, %v2362_v60  ;;  %v1553_v63 = vmul.f32 %v1551_v59, %v1547_v51 }
 0xbc3   : > { %v1554_v0 = vmul.f32 %v1552_v61, %v1548_v55 }
 0xbc5   : > { %v2282_v1 = vpack.i.bf16 %v1554_v0, %v1553_v63 }
 0xbc7   : > { %2283 = vrot.lane.b32.xlu0 %v2282_v1, %s2379_s15  ;;  %s2840_s15 = smov 123  }
 0xc39   : > { %v2284_v2 = vpop.permute.xlu0 %2283 }
 0xc3a   : > { %v2286_v3 = vunpack.i.h.bf16 %v2284_v2  ;;  %v2285_v4 = vunpack.i.l.bf16 %v2284_v2 }
 0xc3c   : > { %v1564_v5 = vsel %vm1000_vm11, 0.0, %v2286_v3  ;;  %v1563_v6 = vsel %vm1000_vm11, 0.0, %v2285_v4 }
 0xc3d   : > { %v1566_v53 = vsel %vm1003_vm12, %v1564_v5, 0.0  ;;  %v1565_v7 = vsel %vm1003_vm12, %v1563_v6, 0.0  ;;  %v1811_v8 = vpack.c.bf16 %v1564_v5, %v1563_v6 }
 0xc3e   : > { %v2292_v57 = vpack.i.bf16 %v1566_v53, %v1565_v7 }
 0xc3f   : > { %2011 = vmatpush3.bf16.msk.msra.mxu0 %vm2633_vm13, %v1811_v8 }
 0xc40   : > { %2293 = vrot.lane.b32.xlu0 %v2292_v57, %s2373_s24  ;;  %2288 = vrot.lane.b32.xlu1 %v2292_v57, %s2374_s25 }
 0xc41   : > { %2012 = vmatprep.subr.bf16.mxu0 %v2371_v10 }
 0xc44   : > { %2303 = vrot.lane.b32.xlu0 %v2292_v57, %s2838_s28  ;;  %2298 = vrot.lane.b32.xlu1 %v2292_v57, %s2839_s23 }
 0xc48   : > { %2313 = vrot.lane.b32.xlu0 %v2292_v57, %s2380_s18  ;;  %2308 = vrot.lane.b32.xlu1 %v2292_v57, %s2840_s15  ;;  %s484_s15 = scalar_lea.vmem %s2828_s14, %s1819_s16 }
 0xc4c   : > { %1126 = vperm.xlu0 %2115, %v509_v33   ;;  %1121 = vperm.xlu1 %2116, %v508_v30  }
 0xc50   : > { %1619 = vperm.xlu0 %2115, %v525_v9   ;;  %1614 = vperm.xlu1 %2116, %v524_v11  }
 0xcb2   : > { %v2294_v13 = vpop.permute.xlu0 %2293  ;;  %v2289_v14 = vpop.permute.xlu1 %2288 }
 0xcb3   : > { %v2291_v15 = vunpack.i.h.bf16 %v2289_v14  ;;  %v2290_v17 = vunpack.i.l.bf16 %v2289_v14  ;;  %v2296_v18 = vunpack.i.h.bf16 %v2294_v13  ;;  %v2295_v19 = vunpack.i.l.bf16 %v2294_v13 }
 0xcb5   : > { %v1606_v20 = vpack.c.bf16 %v2291_v15, %v2290_v17  ;;  %v1607_v22 = vpack.c.bf16 %v2296_v18, %v2295_v19 }
 0xcb6   : > { %v2299_v21 = vpop.permute.xlu1 %2298  ;;  %v2304_v25 = vpop.permute.xlu0 %2303 }
 0xcb7   : > { %2013 = vmatpush3.bf16.msra.mxu0 %v1606_v20  ;;  %v2301_v23 = vunpack.i.h.bf16 %v2299_v21  ;;  %v2300_v24 = vunpack.i.l.bf16 %v2299_v21  ;;  %v2306_v26 = vunpack.i.h.bf16 %v2304_v25  ;;  %v2305_v27 = vunpack.i.l.bf16 %v2304_v25 }
 0xcb8   : > { %2014 = vmatprep.subr.bf16.mxu0 %v2371_v10 }
 0xcb9   : > { %v1608_v28 = vpack.c.bf16 %v2301_v23, %v2300_v24  ;;  %v1609_v31 = vpack.c.bf16 %v2306_v26, %v2305_v27 }
 0xcba   : > { %v2309_v29 = vpop.permute.xlu1 %2308  ;;  %v2314_v35 = vpop.permute.xlu0 %2313 }
 0xcbb   : > { %2015 = vmatpush3.bf16.msra.mxu0 %v1607_v22  ;;  %v2311_v32 = vunpack.i.h.bf16 %v2309_v29  ;;  %v2310_v34 = vunpack.i.l.bf16 %v2309_v29  ;;  %v2316_v37 = vunpack.i.h.bf16 %v2314_v35  ;;  %v2315_v36 = vunpack.i.l.bf16 %v2314_v35 }
 0xcbc   : > { %2016 = vmatprep.subr.bf16.mxu0 %v2371_v10 }
 0xcbd   : > { %v1610_v38 = vpack.c.bf16 %v2311_v32, %v2310_v34  ;;  %v1611_v39 = vpack.c.bf16 %v2316_v37, %v2315_v36 }
 0xcbf   : > { %2017 = vmatpush3.bf16.msra.mxu0 %v1608_v28 }
 0xcc0   : > { %2018 = vmatprep.subr.bf16.mxu0 %v2371_v10 }
 0xcc3   : > { %2019 = vmatpush3.bf16.msra.mxu0 %v1609_v31 }
 0xcc4   : > { %2020 = vmatprep.subr.bf16.mxu0 %v2371_v10 }
 0xcc7   : > { %2021 = vmatpush3.bf16.msra.mxu0 %v1610_v38 }
 0xcc8   : > { %2022 = vmatprep.subr.bf16.mxu0 %v2371_v10 }
 0xccb   : > { %2023 = vmatpush3.bf16.msra.mxu0 %v1611_v39  ;;  %v1122_v41 = vpop.permute.xlu1 %1121  ;;  %v1127_v42 = vpop.permute.xlu0 %1126 }
 0xccc   : > { %v2028_v43 = vadd.f32 %v1122_v41, %v2621_v12  ;;  %v2032_v44 = vadd.f32 %v1127_v42, %v2625_v16 }
 0xcce   : > { %2025 = vmatmul.mubr.msk.bf16.vlgmr.msra.gmra.mrb[4].mxu0 %vm1250_vm14, %v2326_v40  ;;  %v2029_v45 = vadd.f32 %v2028_v43, %v2743_v58  ;;  %v2033_v10 = vadd.f32 %v2032_v44, %v2747_v62 }
 0xccf   : > { %v1615_v46 = vpop.permute.xlu1 %1614  ;;  %v1620_v47 = vpop.permute.xlu0 %1619 }
 0xcd0   : > { %v2030_v48 = vadd.f32 %v2029_v45, %v1615_v46  ;;  %v2034_v50 = vadd.f32 %v2033_v10, %v1620_v47 }
 0xda1   : > { %v1664_v49 = vpop.f32.mrb[4].mxu0 }
 0xda2   : > { %v2031_v51 = vadd.f32 %v2030_v48, %v1664_v49  ;;  %v2026_v52 = vpop.f32.mrb[5].mxu0 }
 0xda3   : > { %v1667_v54 = vpop.f32.mrb[6].mxu0 }
 0xda4   : > { %v1675_v55 = vmul.f32 0.5, %v2031_v51  ;;  %v2035_v56 = vadd.f32 %v2034_v50, %v1667_v54  ;;  %v2027_v59 = vpop.f32.mrb[7].mxu0 }
 0xda6   : > { %v1820_v12 = vpack.c.bf16 %v1675_v55, %v1675_v55  ;;  %v1676_v16 = vmul.f32 0.5, %v2035_v56 }
 0xda8   : > { %1686 = vst.msk [vmem:[%s484_s15] sm:$0xf] %vm1685_vm2, %v1820_v12  ;;  %v1821_v58 = vpack.c.bf16 %v1676_v16, %v1676_v16 }
 0xdaa   : > { %1687 = vst.msk [vmem:[%s484_s15 + $0x4] sm:$0xf] %vm1685_vm2, %v1821_v58 }
 0xdab PF: > { %s24_s29 = sadd.s32 1, %s2369_s29  }
 0xdac   : > { %p21_p4 = scmp.ge.s32.totalorder %s24_s29, 4  }
 0xdae   :  { %23 = sbr.rel (!%p21_p4) target bundleno = 1 (0x1), region = 109 }

// kernel: hifigan_forward.6
= control target key start
LH: loop header
LB: loop body
LE: loop exit
PB: predicated region body
PF: predicated region fallthrough
CT: control target
= control target key end

     0   :  { %s1735_s29 = smov 0   ;;  %s1984_s0 = inlined_call_operand.vmem [shape: bf16[2,16,31], index: 0, kind: input, shape index: {}]   ;;  %s1985_s1 = inlined_call_operand.vmem [shape: bf16[2,2,33], index: 1, kind: input, shape index: {}]   ;;  %s1986_s2 = inlined_call_operand.vmem [shape: bf16[8,64], index: 2, kind: input, shape index: {}]   ;;  %s1987_s3 = inlined_call_operand.vmem [shape: f32[8,1], index: 3, kind: input, shape index: {}]   ;;  %s1988_s4 = inlined_call_operand.vmem [shape: bf16[8,4], index: 4, kind: input, shape index: {}]   ;;  %s1989_s5 = inlined_call_operand.vmem [shape: f32[8,1], index: 5, kind: input, shape index: {}]   ;;  %s1990_s6 = inlined_call_operand.vmem [shape: bf16[2,8,24], index: 6, kind: input, shape index: {}]   ;;  %s1991_s7 = inlined_call_operand.vmem [shape: f32[2,8,1], index: 7, kind: input, shape index: {}]   ;;  %s1992_s8 = inlined_call_operand.vmem [shape: bf16[2,8,24], index: 8, kind: input, shape index: {}]   ;;  %s1993_s9 = inlined_call_operand.vmem [shape: f32[2,8,1], index: 9, kind: input, shape index: {}]   ;;  %s1994_s10 = inlined_call_operand.vmem [shape: bf16[2,8,56], index: 10, kind: input, shape index: {}]   ;;  %s1995_s11 = inlined_call_operand.vmem [shape: f32[2,8,1], index: 11, kind: input, shape index: {}]   ;;  %s1996_s12 = inlined_call_operand.vmem [shape: bf16[2,8,56], index: 12, kind: input, shape index: {}]   ;;  %s1997_s13 = inlined_call_operand.vmem [shape: f32[2,8,1], index: 13, kind: input, shape index: {}]   ;;  %s1998_s14 = inlined_call_operand.vmem [shape: bf16[2,8,32], index: 14, kind: output, shape index: {}]  }
   0x1 LB: > { %s1366_s30 = sadd.s32 4294967295, %s1640_s29   ;;  %p1370_p0 = scmp.ge.s32.totalorder %s1640_s29, 1  ;;  %s1640_s29 = sphi %s1735_s29, %s24_s29  }
   0x2   : > { %p420_p1 = scmp.lt.s32.totalorder %s1640_s29, 3 }
   0x4   : > { %p421_p2 = pnand %p1370_p0, %p420_p1 }
   0x5   : > { %p468_p3 = scmp.lt.s32.totalorder (!%p421_p2), %s1366_s30, 1  ;;  %v1642_v5 = vmov (!%p421_p2), 0.0   ;;  %s1643_s19 = smov (!%p421_p2), 2   ;;  %v603_v13 = vlaneseq (!%p421_p2)  ;;  %vm521_vm0 = vcmask (!%p421_p2), 15360   ;;  %vm524_vm1 = vcmask (!%p421_p2), 269312   ;;  %v482_v32 = vld [vmem:[%s1987_s3] sm:$0xff] (!%p421_p2) }
   0x6   : > { %424 = sbr.rel (%p421_p2) target bundleno = 3389 (0xd3d), region = 76  ;;  %1457 = vmatprep.subr.bf16.mxu0 (!%p421_p2), %v1642_v5  ;;  %1469 = vmatprep.subr.bf16.mxu1 (!%p421_p2), %v1642_v5  ;;  %vm1374_vm2 = vmpackc.low (!%p421_p2), %vm524_vm1, %vm524_vm1  ;;  %s1644_s23 = smov (!%p421_p2), 126   ;;  %vm1646_vm3 = vmmov (!%p421_p2), 0   ;;  %v1647_v31 = vmov (!%p421_p2), 0   ;;  %v484_v33 = vld [vmem:[%s1989_s5] sm:$0xff] (!%p421_p2)  ;;  %vm617_vm4 = vcmask (!%p421_p2), 1041408  }
   0x7   : > { %v604_v14 = vshrl.u32 (!%p421_p2), %v603_v13, 7  ;;  %s1645_s24 = smov (!%p421_p2), 127   ;;  %1471 = vmatprep.mubr.msk.bf16.mxu1 (!%p421_p2), %vm1646_vm3, %v1642_v5  ;;  %1465 = vmatprep.mubr.msk.bf16.mxu0 (!%p421_p2), %vm1646_vm3, %v1642_v5  ;;  %s1648_s25 = smov (!%p421_p2), 125   ;;  %vm619_vm5 = vcmask (!%p421_p2), 1042432   ;;  %v483_v53 = vld [vmem:[%s1988_s4] sm:$0xf] (!%p421_p2) }
   0x8   : > { %1614 = vset.pattern.permute.xlu1 (!%p421_p2), %v1647_v31  ;;  %1615 = vset.pattern.permute.xlu0 (!%p421_p2), %v1647_v31  ;;  %vm622_vm6 = vcmask (!%p421_p2), 31744   ;;  %v481_v54 = vld [vmem:[%s1986_s2] sm:$0xf] (!%p421_p2)  ;;  %vm556_vm7 = vcmask (!%p421_p2), 523264   ;;  %s1649_s20 = smov (!%p421_p2), 1   ;;  %vm684_vm8 = vcmask (!%p421_p2), 7168  }
   0x9   : > { %v605_v17 = vsub.s32 (!%p421_p2), 0, %v604_v14  ;;  %v612_v18 = vsub.s32 (!%p421_p2), 1, %v604_v14  ;;  %vm1650_vm9 = vmmov (!%p421_p2), 1   ;;  %vm705_vm11 = vcmask (!%p421_p2), 1043456   ;;  %s1651_s16 = smov (!%p421_p2), 3   ;;  %s1653_s21 = smov (!%p421_p2), 124  }
   0xa   : > { %vm1801_vm10 = vmpackc.low (!%p421_p2), %vm1650_vm9, %vm524_vm1  ;;  %vm701_vm12 = vcmask (!%p421_p2), 195584   ;;  %vm828_vm13 = vcmask (!%p421_p2), 23552   ;;  %vm830_vm14 = vcmask (!%p421_p2), 285696   ;;  %s1655_s27 = smov (!%p421_p2), 9   ;;  %s1657_s28 = smov (!%p421_p2), 119  }
   0xb   : > { %vm1861_vm15 = vmpackc.low (!%p421_p2), %vm1650_vm9, %vm830_vm14  ;;  %s1659_s17 = smov (!%p421_p2), 113  }
   0xd   : > { %s2004_s30 = smov (!%p468_p3, %s1366_s30), 1 }
   0xe   : > { %s1413_s15 = sshll.u32 %s2004_s30, 3  ;;  %s475_s22 = scalar_lea.vmem %s1985_s1, %s2004_s30 }
   0xf   : > { %s472_s18 = scalar_lea.vmem %s1984_s0, %s1413_s15  ;;  %v600_v15 = vld [vmem:[%s475_s22] sm:$0x1]  ;;  %s1654_s22 = smov 123  }
  0x10   : > { %v1415_v0 = vld [vmem:[%s472_s18] sm:$0xff]   ;;  %v601_v16 = vunpack.c.l.bf16 %v600_v15  ;;  %s1658_s15 = smov 110  }
  0x11   : > { %v1416_v1 = vunpack.c.l.bf16 %v1415_v0  ;;  %v1417_v2 = vunpack.c.h.bf16 %v1415_v0 }
  0x12   : > { %v606_v24 = vrot.slane %v601_v16, %v605_v17  ;;  %v613_v25 = vrot.slane %v601_v16, %v612_v18 }
  0x13   : > { %v505_v3 = vmul.f32 0.5, %v1416_v1  ;;  %v506_v4 = vmul.f32 0.5, %v1417_v2 }
  0x14   : > { %v1604_v30 = vpack.i.bf16 %v613_v25, %v606_v24 }
  0x15   : > { %1616 = vtanh.f32 %v505_v3 }
  0x16   : > { %1618 = vtanh.f32 %v506_v4 }
  0x1f   : > { %v1617_v6 = vpop.eup %1616 }
  0x20   : > { %v1619_v7 = vpop.eup %1618  ;;  %v509_v8 = vadd.f32 1.0, %v1617_v6 }
  0x21   : > { %v510_v9 = vadd.f32 1.0, %v1619_v7 }
  0x22   : > { %v511_v10 = vmul.f32 %v509_v8, %v505_v3 }
  0x23   : > { %v512_v11 = vmul.f32 %v510_v9, %v506_v4 }
  0x25   : > { %v1589_v12 = vpack.i.bf16 %v512_v11, %v511_v10 }
  0x27   : > { %1590 = vrot.lane.b32.xlu0 %v1589_v12, %s1643_s19  ;;  %v487_v12 = vld [vmem:[%s1991_s7] sm:$0xff]  ;;  %s1652_s19 = smov 122  }
  0x99   : > { %v1591_v19 = vpop.permute.xlu0 %1590 }
  0x9a   : > { %v1593_v20 = vunpack.i.h.bf16 %v1591_v19  ;;  %v1592_v21 = vunpack.i.l.bf16 %v1591_v19  ;;  %v485_v19 = vld [vmem:[%s1990_s6] sm:$0xf] }
  0x9c   : > { %v523_v22 = vsel %vm521_vm0, 0.0, %v1593_v20  ;;  %v522_v23 = vsel %vm521_vm0, 0.0, %v1592_v21  ;;  %vm996_vm0 = vcmask 457728  }
  0x9d   : > { %v1375_v26 = vpack.c.bf16 %v523_v22, %v522_v23  ;;  %v525_v27 = vsel %vm524_vm1, %v522_v23, 0.0  ;;  %v526_v28 = vsel %vm524_vm1, %v523_v22, 0.0 }
  0x9e   : > { %v1599_v29 = vpack.i.bf16 %v526_v28, %v525_v27 }
  0x9f   : > { %1458 = vmatpush3.bf16.msk.msra.mxu0 %vm1374_vm2, %v1375_v26  ;;  %vm1138_vm2 = vcmask 334848  }
  0xa0   : > { %1600 = vrot.lane.b32.xlu1 %v1599_v29, %s1644_s23  ;;  %1595 = vrot.lane.b32.xlu0 %v1599_v29, %s1645_s24 }
  0xa1   : > { %1459 = vmatprep.subr.bf16.mxu0 %v1642_v5 }
  0xa4   : > { %1605 = vrot.lane.b32.xlu1 %v1604_v30, %s1645_s24  ;;  %1610 = vrot.lane.b32.xlu0 %v1599_v29, %s1648_s25 }
  0xa8   : > { %553 = vperm.xlu1 %1614, %v482_v32   ;;  %672 = vperm.xlu0 %1615, %v484_v33   ;;  %v491_v33 = vld [vmem:[%s1993_s9] sm:$0xff] }
 0x112   : > { %v1601_v34 = vpop.permute.xlu1 %1600  ;;  %v1596_v35 = vpop.permute.xlu0 %1595 }
 0x113   : > { %v1598_v36 = vunpack.i.h.bf16 %v1596_v35  ;;  %v1597_v37 = vunpack.i.l.bf16 %v1596_v35  ;;  %v1603_v38 = vunpack.i.h.bf16 %v1601_v34  ;;  %v1602_v39 = vunpack.i.l.bf16 %v1601_v34 }
 0x115   : > { %v548_v40 = vpack.c.bf16 %v1598_v36, %v1597_v37  ;;  %v549_v45 = vpack.c.bf16 %v1603_v38, %v1602_v39  ;;  %v489_v39 = vld [vmem:[%s1992_s8] sm:$0xf] }
 0x116   : > { %v1606_v41 = vpop.permute.xlu1 %1605  ;;  %v1611_v42 = vpop.permute.xlu0 %1610 }
 0x117   : > { %v1608_v43 = vunpack.i.h.bf16 %v1606_v41  ;;  %v1607_v44 = vunpack.i.l.bf16 %v1606_v41  ;;  %1460 = vmatpush3.bf16.msra.mxu0 %v548_v40  ;;  %v1613_v46 = vunpack.i.h.bf16 %v1611_v42  ;;  %v1612_v47 = vunpack.i.l.bf16 %v1611_v42 }
 0x118   : > { %1461 = vmatprep.subr.bf16.mxu0 %v1642_v5 }
 0x119   : > { %v618_v48 = vsel %vm617_vm4, %v601_v16, %v1607_v44  ;;  %v550_v51 = vpack.c.bf16 %v1613_v46, %v1612_v47 }
 0x11a   : > { %v620_v49 = vsel %vm619_vm5, %v618_v48, %v1608_v43 }
 0x11b   : > { %1462 = vmatpush3.bf16.msra.mxu0 %v549_v45  ;;  %v621_v50 = vpack.c.bf16 %v620_v49, %v620_v49 }
 0x11c   : > { %1463 = vmatprep.subr.bf16.mxu0 %v1642_v5 }
 0x11d   : > { %v627_v52 = vsel %vm617_vm4, %v621_v50, 0  ;;  %vm1302_vm4 = vcmask 257024  }
 0x11e   : > { %1470 = vmatpush3.bf16.msra.mxu1 %v627_v52 }
 0x11f   : > { %1464 = vmatpush3.bf16.msra.mxu0 %v550_v51  ;;  %1475 = vmatprep.subr.bf16.mxu1 %v1642_v5 }
 0x120   : > { %1491 = vmatprep.subr.bf16.mxu0 %v1642_v5 }
 0x121   : > { %1472 = vmatmul.mubr.msk.bf16.vlgmr.msra.gmra.mrb[0].mxu1 %vm622_vm6, %v483_v53 }
 0x122   : > { %1466 = vmatmul.mubr.msk.bf16.vlgmr.msra.gmra.mrb[0].mxu0 %vm556_vm7, %v481_v54  ;;  %1479 = vmatprep.mubr.msk.bf16.mxu1 %vm1646_vm3, %v1642_v5 }
 0x123   : > { %1495 = vmatprep.mubr.msk.bf16.mxu0 %vm1646_vm3, %v1642_v5 }
 0x127   : > { %v554_v55 = vpop.permute.xlu1 %553  ;;  %v673_v57 = vpop.permute.xlu0 %672 }
 0x1f4   : > { %v663_v56 = vpop.f32.mrb[0].mxu1 }
 0x1f5   : > { %v594_v58 = vpop.f32.mrb[0].mxu0  ;;  %v1473_v59 = vpop.f32.mrb[1].mxu1 }
 0x1f6   : > { %v595_v60 = vadd.f32 %v594_v58, %v554_v55  ;;  %v1467_v61 = vpop.f32.mrb[1].mxu0  ;;  %v666_v62 = vpop.f32.mrb[2].mxu1  ;;  %v488_v58 = vld [vmem:[%s1991_s7 + $0x8] sm:$0xff] }
 0x1f7   : > { %v597_v63 = vpop.f32.mrb[2].mxu0  ;;  %v1474_v0 = vpop.f32.mrb[3].mxu1  ;;  %v498_v61 = vld [vmem:[%s1996_s12 + $0x4] sm:$0xf] }
 0x1f8   : > { %v1468_v1 = vpop.f32.mrb[3].mxu0  ;;  %v669_v2 = vadd.f32 %v663_v56, %v595_v60 }
 0x1fa   : > { %v1788_v3 = vadd.f32 %v673_v57, %v669_v2  ;;  %v495_v57 = vld [vmem:[%s1995_s11] sm:$0xff] }
 0x1fc   : > { %v676_v4 = vmul.f32 0.5, %v1788_v3 }
 0x1fe   : > { %1620 = vtanh.f32 %v676_v4 }
 0x208   : > { %v1621_v6 = vpop.eup %1620 }
 0x209   : > { %v678_v7 = vadd.f32 1.0, %v1621_v6 }
 0x20b   : > { %v679_v8 = vmul.f32 %v678_v7, %v676_v4  ;;  %v486_v4 = vld [vmem:[%s1990_s6 + $0x4] sm:$0xf] }
 0x20d   : > { %681 = vrot.lane.b32.xlu1 %v679_v8, %s1649_s20 }
 0x27f   : > { %v682_v9 = vpop.permute.xlu1 %681 }
 0x280   : > { %v685_v10 = vsel %vm684_vm8, 0.0, %v682_v9 }
 0x281   : > { %v686_v11 = vsel %vm524_vm1, %v685_v10, 0.0 }
 0x282   : > { %691 = vrot.lane.b32.xlu0 %v686_v11, %s1644_s23  ;;  %688 = vrot.lane.b32.xlu1 %v686_v11, %s1645_s24 }
 0x286   : > { %698 = vperm.xlu1 %1614, %v487_v12  }
 0x2f4   : > { %v692_v13 = vpop.permute.xlu0 %691  ;;  %v689_v14 = vpop.permute.xlu1 %688 }
 0x2f5   : > { %v1380_v16 = vpack.c.bf16 %v689_v14, %v685_v10  ;;  %v695_v17 = vpack.c.bf16 %v692_v13, %v692_v13 }
 0x2f7   : > { %1476 = vmatpush3.bf16.msk.msra.mxu1 %vm1801_vm10, %v1380_v16  ;;  %v707_v18 = vsel %vm705_vm11, %v695_v17, 0  ;;  %v493_v16 = vld [vmem:[%s1994_s10] sm:$0xf] }
 0x2f8   : > { %1477 = vmatprep.subr.bf16.mxu1 %v1642_v5 }
 0x2fb   : > { %1478 = vmatpush3.bf16.msra.mxu1 %v707_v18 }
 0x2fc   : > { %1483 = vmatprep.subr.bf16.mxu1 %v1642_v5 }
 0x2fe   : > { %1480 = vmatmul.mubr.msk.bf16.vlgmr.msra.gmra.mrb[4].mxu1 %vm701_vm12, %v485_v19 }
 0x2ff   : > { %1487 = vmatprep.mubr.msk.bf16.mxu1 %vm1646_vm3, %v1642_v5 }
 0x305   : > { %v699_v20 = vpop.permute.xlu1 %698 }
 0x3d1   : > { %v743_v21 = vpop.f32.mrb[4].mxu1 }
 0x3d2   : > { %v744_v22 = vadd.f32 %v743_v21, %v699_v20  ;;  %v1481_v23 = vpop.f32.mrb[5].mxu1 }
 0x3d3   : > { %v746_v24 = vpop.f32.mrb[6].mxu1 }
 0x3d4   : > { %v749_v25 = vmul.f32 0.5, %v744_v22  ;;  %v1482_v26 = vpop.f32.mrb[7].mxu1 }
 0x3d6   : > { %1622 = vtanh.f32 %v749_v25 }
 0x3e0   : > { %v1623_v27 = vpop.eup %1622 }
 0x3e1   : > { %v751_v28 = vadd.f32 1.0, %v1623_v27 }
 0x3e3   : > { %v752_v29 = vmul.f32 %v751_v28, %v749_v25 }
 0x3e5   : > { %754 = vrot.lane.b32.xlu0 %v752_v29, %s1649_s20 }
 0x457   : > { %v755_v30 = vpop.permute.xlu0 %754 }
 0x458   : > { %v757_v31 = vsel %vm684_vm8, 0.0, %v755_v30 }
 0x459   : > { %v758_v32 = vsel %vm524_vm1, %v757_v31, 0.0 }
 0x45a   : > { %763 = vrot.lane.b32.xlu0 %v758_v32, %s1644_s23  ;;  %760 = vrot.lane.b32.xlu1 %v758_v32, %s1645_s24 }
 0x45e   : > { %770 = vperm.xlu1 %1614, %v491_v33  }
 0x462   : > { %963 = vrot.lane.b32.xlu1 %v679_v8, %s1651_s16 }
 0x4cc   : > { %v764_v34 = vpop.permute.xlu0 %763  ;;  %v761_v35 = vpop.permute.xlu1 %760 }
 0x4cd   : > { %v1384_v36 = vpack.c.bf16 %v761_v35, %v757_v31  ;;  %v767_v37 = vpack.c.bf16 %v764_v34, %v764_v34 }
 0x4cf   : > { %1484 = vmatpush3.bf16.msk.msra.mxu1 %vm1801_vm10, %v1384_v36  ;;  %v777_v38 = vsel %vm705_vm11, %v767_v37, 0 }
 0x4d0   : > { %1485 = vmatprep.subr.bf16.mxu1 %v1642_v5 }
 0x4d3   : > { %1486 = vmatpush3.bf16.msra.mxu1 %v777_v38 }
 0x4d4   : > { %1499 = vmatprep.subr.bf16.mxu1 %v1642_v5 }
 0x4d6   : > { %1488 = vmatmul.mubr.msk.bf16.vlgmr.msra.gmra.mrb[8].mxu1 %vm701_vm12, %v489_v39 }
 0x4d7   : > { %1503 = vmatprep.mubr.msk.bf16.mxu1 %vm1646_vm3, %v1642_v5 }
 0x4dd   : > { %v771_v40 = vpop.permute.xlu1 %770 }
 0x4e1   : > { %v964_v51 = vpop.permute.xlu1 %963 }
 0x4e2   : > { %v966_v55 = vsel %vm828_vm13, 0.0, %v964_v51 }
 0x4e3   : > { %v967_v56 = vsel %vm830_vm14, %v966_v55, 0.0 }
 0x5a9   : > { %v813_v41 = vpop.f32.mrb[8].mxu1 }
 0x5aa   : > { %v814_v42 = vadd.f32 %v813_v41, %v771_v40  ;;  %v1489_v43 = vpop.f32.mrb[9].mxu1 }
 0x5ab   : > { %v816_v44 = vpop.f32.mrb[10].mxu1  ;;  %v499_v43 = vld [vmem:[%s1997_s13] sm:$0xff] }
 0x5ac   : > { %v1837_v45 = vadd.f32 %v814_v42, %v1788_v3  ;;  %v1490_v46 = vpop.f32.mrb[11].mxu1 }
 0x5ae   : > { %v820_v47 = vmul.f32 0.5, %v1837_v45 }
 0x5b0   : > { %1624 = vtanh.f32 %v820_v47 }
 0x5ba   : > { %v1625_v48 = vpop.eup %1624 }
 0x5bb   : > { %v822_v49 = vadd.f32 1.0, %v1625_v48 }
 0x5bd   : > { %v823_v50 = vmul.f32 %v822_v49, %v820_v47 }
 0x5bf   : > { %825 = vrot.lane.b32.xlu0 %v823_v50, %s1651_s16  ;;  %v490_v50 = vld [vmem:[%s1992_s8 + $0x4] sm:$0xf] }
 0x631   : > { %v826_v52 = vpop.permute.xlu0 %825 }
 0x632   : > { %v829_v53 = vsel %vm828_vm13, 0.0, %v826_v52 }
 0x633   : > { %v831_v54 = vsel %vm830_vm14, %v829_v53, 0.0 }
 0x634   : > { %836 = vrot.lane.b32.xlu1 %v831_v54, %s1652_s19  ;;  %833 = vrot.lane.b32.xlu0 %v831_v54, %s1648_s25 }
 0x638   : > { %972 = vrot.lane.b32.xlu1 %v967_v56, %s1644_s23  ;;  %969 = vrot.lane.b32.xlu0 %v967_v56, %s1645_s24 }
 0x63c   : > { %978 = vrot.lane.b32.xlu1 %v967_v56, %s1653_s21  ;;  %975 = vrot.lane.b32.xlu0 %v967_v56, %s1648_s25 }
 0x640   : > { %984 = vrot.lane.b32.xlu1 %v967_v56, %s1652_s19  ;;  %981 = vrot.lane.b32.xlu0 %v967_v56, %s1654_s22 }
 0x644   : > { %993 = vperm.xlu1 %1614, %v495_v57   ;;  %843 = vperm.xlu0 %1615, %v488_v58  }
 0x6a6   : > { %v834_v59 = vpop.permute.xlu0 %833  ;;  %v837_v60 = vpop.permute.xlu1 %836 }
 0x6a7   : > { %v1388_v62 = vpack.c.bf16 %v834_v59, %v829_v53  ;;  %v840_v63 = vpack.c.bf16 %v837_v60, %v837_v60 }
 0x6a9   : > { %1492 = vmatpush3.bf16.msk.msra.mxu0 %vm1861_vm15, %v1388_v62  ;;  %v850_v2 = vsel %vm705_vm11, %v840_v63, 0  ;;  %v497_v62 = vld [vmem:[%s1996_s12] sm:$0xf] }
 0x6aa   : > { %v970_v0 = vpop.permute.xlu0 %969  ;;  %v973_v1 = vpop.permute.xlu1 %972  ;;  %1493 = vmatprep.subr.bf16.mxu0 %v1642_v5 }
 0x6ab   : > { %v1396_v7 = vpack.c.bf16 %v970_v0, %v966_v55 }
 0x6ad   : > { %1494 = vmatpush3.bf16.msra.mxu0 %v850_v2 }
 0x6ae   : > { %v976_v6 = vpop.permute.xlu0 %975  ;;  %1507 = vmatprep.subr.bf16.mxu0 %v1642_v5  ;;  %v979_v8 = vpop.permute.xlu1 %978 }
 0x6af   : > { %v988_v9 = vpack.c.bf16 %v976_v6, %v973_v1 }
 0x6b0   : > { %1496 = vmatmul.mubr.msk.bf16.vlgmr.msra.gmra.mrb[4].mxu0 %vm701_vm12, %v486_v4 }
 0x6b1   : > { %1508 = vmatpush3.bf16.msk.msra.mxu0 %vm1861_vm15, %v1396_v7  ;;  %1515 = vmatprep.mubr.msk.bf16.mxu0 %vm1646_vm3, %v1642_v5 }
 0x6b2   : > { %1509 = vmatprep.subr.bf16.mxu0 %v1642_v5  ;;  %v982_v10 = vpop.permute.xlu0 %981  ;;  %v985_v11 = vpop.permute.xlu1 %984 }
 0x6b3   : > { %v989_v12 = vpack.c.bf16 %v982_v10, %v979_v8  ;;  %v990_v13 = vpack.c.bf16 %v985_v11, %v985_v11 }
 0x6b5   : > { %1510 = vmatpush3.bf16.msra.mxu0 %v988_v9  ;;  %v1001_v14 = vsel %vm705_vm11, %v990_v13, 0 }
 0x6b6   : > { %1511 = vmatprep.subr.bf16.mxu0 %v1642_v5 }
 0x6b9   : > { %1512 = vmatpush3.bf16.msra.mxu0 %v989_v12 }
 0x6ba   : > { %1513 = vmatprep.subr.bf16.mxu0 %v1642_v5 }
 0x6bd   : > { %1514 = vmatpush3.bf16.msra.mxu0 %v1001_v14 }
 0x6be   : > { %1531 = vmatprep.subr.bf16.mxu0 %v1642_v5 }
 0x6c0   : > { %1516 = vmatmul.mubr.msk.bf16.vlgmr.msra.gmra.mrb[8].mxu0 %vm996_vm0, %v493_v16 }
 0x6c1   : > { %1539 = vmatprep.mubr.msk.bf16.mxu0 %vm1646_vm3, %v1642_v5 }
 0x6c3   : > { %v844_v17 = vpop.permute.xlu0 %843  ;;  %v994_v25 = vpop.permute.xlu1 %993 }
 0x783   : > { %v886_v18 = vpop.f32.mrb[4].mxu0 }
 0x784   : > { %v887_v19 = vadd.f32 %v886_v18, %v844_v17  ;;  %v1497_v20 = vpop.f32.mrb[5].mxu0 }
 0x785   : > { %v889_v21 = vpop.f32.mrb[6].mxu0 }
 0x786   : > { %v892_v22 = vmul.f32 0.5, %v887_v19  ;;  %v1498_v23 = vpop.f32.mrb[7].mxu0 }
 0x788   : > { %1626 = vtanh.f32 %v892_v22 }
 0x792   : > { %v1627_v24 = vpop.eup %1626 }
 0x793   : > { %v894_v26 = vadd.f32 1.0, %v1627_v24  ;;  %v1037_v27 = vpop.f32.mrb[8].mxu0 }
 0x794   : > { %v1038_v28 = vadd.f32 %v1037_v27, %v994_v25  ;;  %v1517_v29 = vpop.f32.mrb[9].mxu0  ;;  %v494_v27 = vld [vmem:[%s1994_s10 + $0x4] sm:$0xf] }
 0x795   : > { %v895_v30 = vmul.f32 %v894_v26, %v892_v22  ;;  %v1040_v31 = vpop.f32.mrb[10].mxu0 }
 0x796   : > { %v1043_v32 = vmul.f32 0.5, %v1038_v28  ;;  %v1518_v33 = vpop.f32.mrb[11].mxu0 }
 0x797   : > { %897 = vrot.lane.b32.xlu0 %v895_v30, %s1649_s20  ;;  %s1656_s20 = smov 116  }
 0x798   : > { %1628 = vtanh.f32 %v1043_v32 }
 0x7a2   : > { %v1629_v34 = vpop.eup %1628 }
 0x7a3   : > { %v1045_v35 = vadd.f32 1.0, %v1629_v34 }
 0x7a5   : > { %v1046_v36 = vmul.f32 %v1045_v35, %v1043_v32 }
 0x7a7   : > { %1048 = vrot.lane.b32.xlu1 %v1046_v36, %s1651_s16 }
 0x809   : > { %v898_v37 = vpop.permute.xlu0 %897 }
 0x80a   : > { %v900_v38 = vsel %vm684_vm8, 0.0, %v898_v37 }
 0x80b   : > { %v901_v39 = vsel %vm524_vm1, %v900_v38, 0.0  ;;  %vm1136_vm1 = vcmask 72704  }
 0x80c   : > { %903 = vrot.lane.b32.xlu0 %v901_v39, %s1645_s24  ;;  %906 = vrot.lane.b32.xlu1 %v901_v39, %s1644_s23 }
 0x819   : > { %v1049_v40 = vpop.permute.xlu1 %1048 }
 0x81a   : > { %v1051_v41 = vsel %vm828_vm13, 0.0, %v1049_v40 }
 0x81b   : > { %v1052_v42 = vsel %vm830_vm14, %v1051_v41, 0.0 }
 0x81c   : > { %1057 = vrot.lane.b32.xlu1 %v1052_v42, %s1644_s23  ;;  %1054 = vrot.lane.b32.xlu0 %v1052_v42, %s1645_s24 }
 0x820   : > { %1063 = vrot.lane.b32.xlu1 %v1052_v42, %s1653_s21  ;;  %1060 = vrot.lane.b32.xlu0 %v1052_v42, %s1648_s25 }
 0x824   : > { %1069 = vrot.lane.b32.xlu1 %v1052_v42, %s1652_s19  ;;  %1066 = vrot.lane.b32.xlu0 %v1052_v42, %s1654_s22  ;;  %v492_v42 = vld [vmem:[%s1993_s9 + $0x8] sm:$0xff] }
 0x828   : > { %1078 = vperm.xlu0 %1615, %v499_v43  }
 0x87e   : > { %v904_v44 = vpop.permute.xlu0 %903  ;;  %v907_v46 = vpop.permute.xlu1 %906 }
 0x87f   : > { %v1392_v47 = vpack.c.bf16 %v904_v44, %v900_v38  ;;  %v910_v48 = vpack.c.bf16 %v907_v46, %v907_v46 }
 0x881   : > { %1500 = vmatpush3.bf16.msk.msra.mxu1 %vm1801_vm10, %v1392_v47  ;;  %v920_v49 = vsel %vm705_vm11, %v910_v48, 0 }
 0x882   : > { %1501 = vmatprep.subr.bf16.mxu1 %v1642_v5 }
 0x885   : > { %1502 = vmatpush3.bf16.msra.mxu1 %v920_v49 }
 0x886   : > { %1519 = vmatprep.subr.bf16.mxu1 %v1642_v5 }
 0x888   : > { %1504 = vmatmul.mubr.msk.bf16.vlgmr.msra.gmra.mrb[12].mxu1 %vm701_vm12, %v490_v50 }
 0x889   : > { %1527 = vmatprep.mubr.msk.bf16.mxu1 %vm1646_vm3, %v1642_v5 }
 0x88e   : > { %v1055_v51 = vpop.permute.xlu0 %1054  ;;  %v1058_v52 = vpop.permute.xlu1 %1057 }
 0x88f   : > { %v1400_v15 = vpack.c.bf16 %v1055_v51, %v1051_v41  ;;  %v500_v41 = vld [vmem:[%s1997_s13 + $0x8] sm:$0xff] }
 0x891   : > { %1520 = vmatpush3.bf16.msk.msra.mxu1 %vm1861_vm15, %v1400_v15 }
 0x892   : > { %v1061_v53 = vpop.permute.xlu0 %1060  ;;  %v1064_v54 = vpop.permute.xlu1 %1063  ;;  %1521 = vmatprep.subr.bf16.mxu1 %v1642_v5 }
 0x893   : > { %v1073_v55 = vpack.c.bf16 %v1061_v53, %v1058_v52 }
 0x895   : > { %1522 = vmatpush3.bf16.msra.mxu1 %v1073_v55 }
 0x896   : > { %v1067_v56 = vpop.permute.xlu0 %1066  ;;  %v1070_v57 = vpop.permute.xlu1 %1069  ;;  %1523 = vmatprep.subr.bf16.mxu1 %v1642_v5 }
 0x897   : > { %v1074_v58 = vpack.c.bf16 %v1067_v56, %v1064_v54  ;;  %v1075_v59 = vpack.c.bf16 %v1070_v57, %v1070_v57 }
 0x899   : > { %1524 = vmatpush3.bf16.msra.mxu1 %v1074_v58  ;;  %v1085_v60 = vsel %vm705_vm11, %v1075_v59, 0 }
 0x89a   : > { %1525 = vmatprep.subr.bf16.mxu1 %v1642_v5 }
 0x89d   : > { %1526 = vmatpush3.bf16.msra.mxu1 %v1085_v60 }
 0x89e   : > { %1543 = vmatprep.subr.bf16.mxu1 %v1642_v5 }
 0x8a0   : > { %1528 = vmatmul.mubr.msk.bf16.vlgmr.msra.gmra.mrb[16].mxu1 %vm996_vm0, %v497_v62 }
 0x8a1   : > { %1551 = vmatprep.mubr.msk.bf16.mxu1 %vm1646_vm3, %v1642_v5  ;;  %vm1403_vm3 = vmpackc.low %vm1650_vm9, %vm1138_vm2 }
 0x8a7   : > { %v1079_v63 = vpop.permute.xlu0 %1078 }
 0x973   : > { %v1121_v0 = vpop.f32.mrb[16].mxu1 }
 0x974   : > { %v1122_v1 = vadd.f32 %v1121_v0, %v1079_v63  ;;  %v1529_v2 = vpop.f32.mrb[17].mxu1 }
 0x975   : > { %v1124_v4 = vpop.f32.mrb[18].mxu1 }
 0x976   : > { %v1931_v6 = vadd.f32 %v1122_v1, %v1788_v3  ;;  %v1530_v7 = vpop.f32.mrb[19].mxu1  ;;  %v496_v3 = vld [vmem:[%s1995_s11 + $0x8] sm:$0xff] }
 0x978   : > { %v1128_v8 = vmul.f32 0.5, %v1931_v6 }
 0x97a   : > { %1630 = vtanh.f32 %v1128_v8 }
 0x984   : > { %v1631_v9 = vpop.eup %1630 }
 0x985   : > { %v1130_v10 = vadd.f32 1.0, %v1631_v9 }
 0x987   : > { %v1131_v11 = vmul.f32 %v1130_v10, %v1128_v8 }
 0x989   : > { %1133 = vrot.lane.b32.xlu1 %v1131_v11, %s1655_s27 }
 0x9fb   : > { %v1134_v12 = vpop.permute.xlu1 %1133 }
 0x9fc   : > { %v1137_v13 = vsel %vm1136_vm1, 0.0, %v1134_v12 }
 0x9fd   : > { %v1139_v14 = vsel %vm1138_vm2, %v1137_v13, 0.0 }
 0x9fe   : > { %1144 = vrot.lane.b32.xlu1 %v1139_v14, %s1652_s19  ;;  %1141 = vrot.lane.b32.xlu0 %v1139_v14, %s1648_s25 }
 0xa02   : > { %1150 = vrot.lane.b32.xlu1 %v1139_v14, %s1656_s20  ;;  %1147 = vrot.lane.b32.xlu0 %v1139_v14, %s1657_s28 }
 0xa06   : > { %1156 = vrot.lane.b32.xlu1 %v1139_v14, %s1658_s15  ;;  %1153 = vrot.lane.b32.xlu0 %v1139_v14, %s1659_s17 }
 0xa0a   : > { %1165 = vperm.xlu0 %1615, %v496_v3  }
 0xa70   : > { %v1145_v16 = vpop.permute.xlu1 %1144  ;;  %v1142_v17 = vpop.permute.xlu0 %1141 }
 0xa71   : > { %v1404_v18 = vpack.c.bf16 %v1142_v17, %v1137_v13 }
 0xa73   : > { %1532 = vmatpush3.bf16.msk.msra.mxu0 %vm1403_vm3, %v1404_v18 }
 0xa74   : > { %v1151_v19 = vpop.permute.xlu1 %1150  ;;  %v1148_v20 = vpop.permute.xlu0 %1147  ;;  %1533 = vmatprep.subr.bf16.mxu0 %v1642_v5 }
 0xa75   : > { %v1160_v21 = vpack.c.bf16 %v1148_v20, %v1145_v16 }
 0xa77   : > { %1534 = vmatpush3.bf16.msra.mxu0 %v1160_v21 }
 0xa78   : > { %v1157_v22 = vpop.permute.xlu1 %1156  ;;  %v1154_v23 = vpop.permute.xlu0 %1153  ;;  %1535 = vmatprep.subr.bf16.mxu0 %v1642_v5 }
 0xa79   : > { %v1161_v24 = vpack.c.bf16 %v1154_v23, %v1151_v19  ;;  %v1162_v25 = vpack.c.bf16 %v1157_v22, %v1157_v22 }
 0xa7b   : > { %1536 = vmatpush3.bf16.msra.mxu0 %v1161_v24  ;;  %v1172_v26 = vsel %vm705_vm11, %v1162_v25, 0 }
 0xa7c   : > { %1537 = vmatprep.subr.bf16.mxu0 %v1642_v5 }
 0xa7f   : > { %1538 = vmatpush3.bf16.msra.mxu0 %v1172_v26 }
 0xa82   : > { %1540 = vmatmul.mubr.msk.bf16.vlgmr.msra.gmra.mrb[12].mxu0 %vm996_vm0, %v494_v27 }
 0xa89   : > { %v1166_v28 = vpop.permute.xlu0 %1165 }
 0xb55   : > { %v1208_v29 = vpop.f32.mrb[12].mxu0 }
 0xb56   : > { %v1209_v30 = vadd.f32 %v1208_v29, %v1166_v28  ;;  %v1541_v31 = vpop.f32.mrb[13].mxu0 }
 0xb57   : > { %v1211_v32 = vpop.f32.mrb[14].mxu0 }
 0xb58   : > { %v1214_v33 = vmul.f32 0.5, %v1209_v30  ;;  %v1542_v34 = vpop.f32.mrb[15].mxu0 }
 0xb5a   : > { %1632 = vtanh.f32 %v1214_v33 }
 0xb64   : > { %v1633_v35 = vpop.eup %1632 }
 0xb65   : > { %v1216_v36 = vadd.f32 1.0, %v1633_v35 }
 0xb67   : > { %v1217_v37 = vmul.f32 %v1216_v36, %v1214_v33 }
 0xb69   : > { %1219 = vrot.lane.b32.xlu1 %v1217_v37, %s1651_s16 }
 0xbdb   : > { %v1220_v38 = vpop.permute.xlu1 %1219 }
 0xbdc   : > { %v1222_v39 = vsel %vm828_vm13, 0.0, %v1220_v38 }
 0xbdd   : > { %v1223_v40 = vsel %vm830_vm14, %v1222_v39, 0.0 }
 0xbde   : > { %1228 = vrot.lane.b32.xlu1 %v1223_v40, %s1644_s23  ;;  %1225 = vrot.lane.b32.xlu0 %v1223_v40, %s1645_s24 }
 0xbe2   : > { %1234 = vrot.lane.b32.xlu1 %v1223_v40, %s1653_s21  ;;  %1231 = vrot.lane.b32.xlu0 %v1223_v40, %s1648_s25  ;;  %s1373_s25 = sshll.u32 %s2004_s30, 2 }
 0xbe6   : > { %1240 = vrot.lane.b32.xlu1 %v1223_v40, %s1652_s19  ;;  %1237 = vrot.lane.b32.xlu0 %v1223_v40, %s1654_s22  ;;  %s479_s22 = scalar_lea.vmem %s1998_s14, %s1373_s25 }
 0xbea   : > { %1249 = vperm.xlu1 %1614, %v500_v41   ;;  %913 = vperm.xlu0 %1615, %v492_v42  }
 0xc50   : > { %v1229_v43 = vpop.permute.xlu1 %1228  ;;  %v1226_v44 = vpop.permute.xlu0 %1225 }
 0xc51   : > { %v1408_v46 = vpack.c.bf16 %v1226_v44, %v1222_v39 }
 0xc53   : > { %1544 = vmatpush3.bf16.msk.msra.mxu1 %vm1861_vm15, %v1408_v46 }
 0xc54   : > { %v1235_v47 = vpop.permute.xlu1 %1234  ;;  %v1232_v48 = vpop.permute.xlu0 %1231  ;;  %1545 = vmatprep.subr.bf16.mxu1 %v1642_v5 }
 0xc55   : > { %v1244_v49 = vpack.c.bf16 %v1232_v48, %v1229_v43 }
 0xc57   : > { %1546 = vmatpush3.bf16.msra.mxu1 %v1244_v49 }
 0xc58   : > { %v1241_v50 = vpop.permute.xlu1 %1240  ;;  %v1238_v51 = vpop.permute.xlu0 %1237  ;;  %1547 = vmatprep.subr.bf16.mxu1 %v1642_v5 }
 0xc59   : > { %v1245_v52 = vpack.c.bf16 %v1238_v51, %v1235_v47  ;;  %v1246_v15 = vpack.c.bf16 %v1241_v50, %v1241_v50 }
 0xc5b   : > { %1548 = vmatpush3.bf16.msra.mxu1 %v1245_v52  ;;  %v1256_v53 = vsel %vm705_vm11, %v1246_v15, 0 }
 0xc5c   : > { %1549 = vmatprep.subr.bf16.mxu1 %v1642_v5 }
 0xc5f   : > { %1550 = vmatpush3.bf16.msra.mxu1 %v1256_v53 }
 0xc62   : > { %1552 = vmatmul.mubr.msk.bf16.vlgmr.msra.gmra.mrb[12].mxu1 %vm996_vm0, %v498_v61 }
 0xc69   : > { %v914_v54 = vpop.permute.xlu0 %913  ;;  %v1250_v57 = vpop.permute.xlu1 %1249 }
 0xc6a   : > { %v1555_v55 = vadd.f32 %v914_v54, %v1837_v45 }
 0xc6c   : > { %v1556_v56 = vadd.f32 %v1555_v55, %v1931_v6 }
 0xc6e   : > { %v1557_v58 = vadd.f32 %v1556_v56, %v1250_v57 }
 0xd35   : > { %v1292_v59 = vpop.f32.mrb[12].mxu1 }
 0xd36   : > { %v1558_v60 = vadd.f32 %v1557_v58, %v1292_v59  ;;  %v1553_v5 = vpop.f32.mrb[13].mxu1 }
 0xd37   : > { %v1295_v62 = vpop.f32.mrb[14].mxu1 }
 0xd38   : > { %v1300_v63 = vmul.f32 0.5, %v1558_v60  ;;  %v1554_v0 = vpop.f32.mrb[15].mxu1 }
 0xd3a   : > { %v1301_v1 = vpack.c.bf16 %v1300_v63, %v1300_v63 }
 0xd3c   : > { %1303 = vst.msk [vmem:[%s479_s22] sm:$0xf] %vm1302_vm4, %v1301_v1 }
 0xd3d PF: > { %s24_s29 = sadd.s32 1, %s1640_s29  }
 0xd3e   : > { %p21_p4 = scmp.ge.s32.totalorder %s24_s29, 4  }
 0xd40   :  { %23 = sbr.rel (!%p21_p4) target bundleno = 1 (0x1), region = 109 }

// kernel: hifigan_forward.7
= control target key start
LH: loop header
LB: loop body
LE: loop exit
PB: predicated region body
PF: predicated region fallthrough
CT: control target
= control target key end

     0   :  { %s2208_s0 = inlined_call_operand.vmem [shape: bf16[2,8,63], index: 0, kind: input, shape index: {}]   ;;  %s2209_s1 = inlined_call_operand.vmem [shape: bf16[2,1,64], index: 1, kind: input, shape index: {}]   ;;  %s2210_s2 = inlined_call_operand.vmem [shape: bf16[4,32], index: 2, kind: input, shape index: {}]   ;;  %s2211_s3 = inlined_call_operand.vmem [shape: f32[4,1], index: 3, kind: input, shape index: {}]   ;;  %s2212_s4 = inlined_call_operand.vmem [shape: bf16[4,1], index: 4, kind: input, shape index: {}]   ;;  %s2213_s5 = inlined_call_operand.vmem [shape: f32[4,1], index: 5, kind: input, shape index: {}]   ;;  %s2214_s6 = inlined_call_operand.vmem [shape: bf16[2,4,12], index: 6, kind: input, shape index: {}]   ;;  %s2215_s7 = inlined_call_operand.vmem [shape: f32[2,4,1], index: 7, kind: input, shape index: {}]   ;;  %s2216_s8 = inlined_call_operand.vmem [shape: bf16[2,4,12], index: 8, kind: input, shape index: {}]   ;;  %s2217_s9 = inlined_call_operand.vmem [shape: f32[2,4,1], index: 9, kind: input, shape index: {}]   ;;  %s2218_s10 = inlined_call_operand.vmem [shape: bf16[2,4,28], index: 10, kind: input, shape index: {}]   ;;  %s2219_s11 = inlined_call_operand.vmem [shape: f32[2,4,1], index: 11, kind: input, shape index: {}]   ;;  %s2220_s12 = inlined_call_operand.vmem [shape: bf16[2,4,28], index: 12, kind: input, shape index: {}]   ;;  %s2221_s13 = inlined_call_operand.vmem [shape: f32[2,4,1], index: 13, kind: input, shape index: {}]   ;;  %s2222_s14 = inlined_call_operand.vmem [shape: bf16[1,28], index: 14, kind: input, shape index: {}]   ;;  %s2223_s15 = inlined_call_operand.<no memory space> [shape: f32[1,1], index: 15, kind: input, shape index: {}]   ;;  %s2224_s16 = inlined_call_operand.hbm [shape: f32[2,1,64], index: 16, kind: output, shape index: {}]  }
   0x1   :  { %2238 = sst [smem:[#allocation9_spill]] %s2208_s0  ;;  %v21_v0 = vstv %s2223_s15 }
   0x2   :  { %2239 = sst [smem:[#allocation10_spill]] %s2209_s1  ;;  %22 = vst [vmem:[#allocation2] sm:$0x1] %v21_v0 }
   0x3   :  { %23 = vsyncpa [#allocation4], 0 }
   0x4   :  { %25 = vsyncpa [#allocation4 + $0x1], 0  ;;  %s1891_s23 = smov 0   ;;  %s1893_s24 = smov 0  }
   0x5   :  { %s1895_s25 = smov 0   ;;  %s1897_s26 = smov 0  }
   0x6 LB: > { %2240 = sst [smem:[#allocation6_spill]] %s1778_s25  ;;  %s1912_s15 = sadd.s32 4294967295, %s1782_s26   ;;  %s1782_s26 = sphi %s1897_s26, %s2252_s26   ;;  %s1778_s25 = sphi %s1895_s25, %s2254_s25   ;;  %s1774_s24 = sphi %s1893_s24, %s2256_s24   ;;  %s1770_s23 = sphi %s1891_s23, %s2255_s23  }
   0x7   : > { %s1495_s27 = sadd.s32 4294967294, %s1782_s26   ;;  %s1916_s28 = sadd.s32 1, %s1782_s26  }
   0x8   : > { %2241 = sst [smem:[#allocation7_spill]] %s1916_s28  ;;  %s384_s29 = sadd.s32 1, %s1778_s25 }
   0x9   : > { %s381_s30 = ssub.s32 %s1782_s26, %s1916_s28  ;;  %p394_p0 = scmp.ne.s32.totalorder %s1778_s25, %s1774_s24 }
   0xa   : > { %p382_p1 = scmp.eq.s32.totalorder %s381_s30, 0  ;;  %p395_p2 = scmp.eq.s32.totalorder %s1912_s15, 1 }
   0xb   : > { %p400_p3 = scmp.ne.s32.totalorder %s1774_s24, %s1770_s23  ;;  %p401_p4 = scmp.eq.s32.totalorder %s1495_s27, 1 }
   0xc   : > { %s1927_s0 = scalar_select %p382_p1, %s1778_s25, %s384_s29  }
   0xd   : > { %p1929_p5 = por %p395_p2, %p394_p0  ;;  %p1933_p6 = por %p401_p4, %p400_p3 }
   0xe   : > { %2242 = sst [smem:[#allocation8_spill]] %s1927_s0  ;;  %p1498_p7 = scmp.ge.s32.totalorder %s1782_s26, 1 }
   0xf   : > { %p474_p8 = scmp.lt.s32.totalorder %s1782_s26, 3 }
  0x11   : > { %p475_p9 = pnand %p1498_p7, %p474_p8 }
  0x12   : > { %p525_p10 = scmp.lt.s32.totalorder (!%p475_p9), %s1912_s15, 1  ;;  %s2245_s27 = sld [smem:[#allocation9_spill]] (!%p475_p9)  ;;  %v1785_v7 = vmov (!%p475_p9), 0.0   ;;  %vm635_vm0 = vcmask (!%p475_p9), 1040384   ;;  %v1786_v9 = vmov (!%p475_p9), 0   ;;  %vm631_vm1 = vcmask (!%p475_p9), 7168  }
  0x13   : > { %478 = sbr.rel (%p475_p9) target bundleno = 3888 (0xf30), region = 84  ;;  %s1784_s30 = smov (!%p475_p9), 2   ;;  %1545 = vmatprep.subr.bf16.mxu0 (!%p475_p9), %v1785_v7  ;;  %1553 = vmatprep.subr.bf16.mxu1 (!%p475_p9), %v1785_v7  ;;  %v637_v10 = vsel (!%p475_p9), %vm635_vm0, 65535, %v1786_v9  ;;  %v535_v12 = vld [vmem:[%s2212_s4] sm:$0x3] (!%p475_p9)  ;;  %vm1787_vm2 = vmmov (!%p475_p9), 0  }
  0x14   : > { %s2246_s1 = sld [smem:[#allocation10_spill]] (!%p475_p9)  ;;  %1688 = vset.pattern.permute.xlu0 (!%p475_p9), %v1786_v9  ;;  %1689 = vset.pattern.permute.xlu1 (!%p475_p9), %v1786_v9  ;;  %vm565_vm3 = vcmask (!%p475_p9), 15360   ;;  %vm567_vm4 = vcmask (!%p475_p9), 531456   ;;  %s2230_s25 = smov (!%p475_p9), 126   ;;  %v534_v16 = vld [vmem:[%s2211_s3] sm:$0xf] (!%p475_p9) }
  0x15   : > { %1555 = vmatprep.mubr.msk.bf16.mxu1 (!%p475_p9), %vm1787_vm2, %v1785_v7  ;;  %1549 = vmatprep.mubr.msk.bf16.mxu0 (!%p475_p9), %vm1787_vm2, %v1785_v7  ;;  %s1790_s22 = smov (!%p475_p9), 125   ;;  %v536_v17 = vld [vmem:[%s2213_s5] sm:$0xf] (!%p475_p9)  ;;  %vm1791_vm5 = vmmov (!%p475_p9), 1   ;;  %vm586_vm7 = vcmask (!%p475_p9), 261120   ;;  %s1792_s21 = smov (!%p475_p9), 1  }
  0x16   : > { %vm1500_vm6 = vmpackc.low (!%p475_p9), %vm1791_vm5, %vm567_vm4  ;;  %v533_v23 = vld [vmem:[%s2210_s2] sm:$0x3] (!%p475_p9)  ;;  %vm706_vm8 = vcmask (!%p475_p9), 1043456   ;;  %vm718_vm9 = vcmask (!%p475_p9), 1045504   ;;  %vm714_vm10 = vcmask (!%p475_p9), 97280   ;;  %s2236_s0 = smov (!%p475_p9), 3  }
  0x17   : > { %v539_v45 = vld [vmem:[%s2215_s7] sm:$0xf] (!%p475_p9)  ;;  %vm842_vm11 = vcmask (!%p475_p9), 23552   ;;  %vm844_vm12 = vcmask (!%p475_p9), 547840   ;;  %vm1014_vm13 = vcmask (!%p475_p9), 228352   ;;  %vm1156_vm14 = vcmask (!%p475_p9), 72704  }
  0x18   : > { %v537_v51 = vld [vmem:[%s2214_s6] sm:$0x3] (!%p475_p9)  ;;  %vm1158_vm15 = vcmask (!%p475_p9), 596992   ;;  %vm1416_vm0 = vcmask (!%p475_p9), 516096  }
  0x19   : > { %v541_v9 = vld [vmem:[%s2216_s8] sm:$0x3] (!%p475_p9) }
  0x1a   : > { %s526_s19 = scalar_select %p525_p10, %s1912_s15, 1 }
  0x1c   : > { %s1499_s20 = sshll.u32 %s526_s19, 2  ;;  %s531_s28 = scalar_lea.vmem %s2246_s1, %s526_s19 }
  0x1d   : > { %s528_s29 = scalar_lea.vmem %s2245_s27, %s1499_s20  ;;  %v630_v8 = vld [vmem:[%s531_s28] sm:$0x1]  ;;  %s2228_s28 = smov 127  }
  0x1e   : > { %v555_v1 = vld [vmem:[%s528_s29] sm:$0xf]  ;;  %v639_v11 = vand.u32 %v637_v10, %v630_v8  ;;  %s1794_s29 = smov 122   ;;  %s2232_s27 = smov 123  }
  0x1f   : > { %v556_v2 = vunpack.c.l.bf16 %v555_v1  ;;  %s1798_s20 = smov 116   ;;  %s1799_s19 = smov 119  }
  0x20   : > { %1554 = vmatpush3.bf16.msra.mxu1 %v639_v11 }
  0x21   : > { %v557_v3 = vmul.f32 0.5, %v556_v2  ;;  %1559 = vmatprep.subr.bf16.mxu1 %v1785_v7  ;;  %v543_v2 = vld [vmem:[%s2217_s9] sm:$0xf] }
  0x23   : > { %1700 = vtanh.f32 %v557_v3  ;;  %1556 = vmatmul.mubr.msk.bf16.vlgmr.msra.gmra.mrb[0].mxu1 %vm631_vm1, %v535_v12 }
  0x24   : > { %1561 = vmatprep.mubr.msk.bf16.mxu1 %vm1787_vm2, %v1785_v7 }
  0x2d   : > { %v1701_v4 = vpop.eup %1700 }
  0x2e   : > { %v559_v5 = vadd.f32 1.0, %v1701_v4 }
  0x30   : > { %v560_v6 = vmul.f32 %v559_v5, %v557_v3 }
  0x32   : > { %562 = vrot.lane.b32.xlu0 %v560_v6, %s1784_s30  ;;  %s2234_s30 = smov 124  }
  0xa4   : > { %v563_v13 = vpop.permute.xlu0 %562 }
  0xa5   : > { %v566_v14 = vsel %vm565_vm3, 0.0, %v563_v13 }
  0xa6   : > { %v568_v15 = vsel %vm567_vm4, %v566_v14, 0.0 }
  0xa7   : > { %573 = vrot.lane.b32.xlu1 %v568_v15, %s2230_s25  ;;  %570 = vrot.lane.b32.xlu0 %v568_v15, %s2228_s28 }
  0xab   : > { %576 = vrot.lane.b32.xlu1 %v568_v15, %s1790_s22  ;;  %583 = vperm.xlu0 %1688, %v534_v16  }
  0xaf   : > { %684 = vperm.xlu1 %1689, %v536_v17  }
  0xf6   : > { %v675_v24 = vpop.f32.mrb[0].mxu1 }
  0xf7   : > { %v1557_v25 = vpop.f32.mrb[1].mxu1 }
  0xf8   : > { %v678_v26 = vpop.f32.mrb[2].mxu1 }
  0xf9   : > { %v1558_v27 = vpop.f32.mrb[3].mxu1 }
 0x119   : > { %v574_v18 = vpop.permute.xlu1 %573  ;;  %v571_v19 = vpop.permute.xlu0 %570 }
 0x11a   : > { %v1501_v20 = vpack.c.bf16 %v571_v19, %v566_v14 }
 0x11c   : > { %1546 = vmatpush3.bf16.msk.msra.mxu0 %vm1500_vm6, %v1501_v20 }
 0x11d   : > { %v577_v21 = vpop.permute.xlu1 %576  ;;  %1547 = vmatprep.subr.bf16.mxu0 %v1785_v7 }
 0x11e   : > { %v580_v22 = vpack.c.bf16 %v577_v21, %v574_v18 }
 0x120   : > { %1548 = vmatpush3.bf16.msra.mxu0 %v580_v22 }
 0x121   : > { %1565 = vmatprep.subr.bf16.mxu0 %v1785_v7 }
 0x123   : > { %1550 = vmatmul.mubr.msk.bf16.vlgmr.msra.gmra.mrb[0].mxu0 %vm586_vm7, %v533_v23 }
 0x124   : > { %1567 = vmatprep.mubr.msk.bf16.mxu0 %vm1787_vm2, %v1785_v7 }
 0x12a   : > { %v584_v28 = vpop.permute.xlu0 %583 }
 0x12e   : > { %v685_v33 = vpop.permute.xlu1 %684 }
 0x1f6   : > { %v624_v29 = vpop.f32.mrb[0].mxu0 }
 0x1f7   : > { %v625_v30 = vadd.f32 %v624_v29, %v584_v28  ;;  %v1551_v31 = vpop.f32.mrb[1].mxu0  ;;  %v547_v29 = vld [vmem:[%s2219_s11] sm:$0xf] }
 0x1f8   : > { %v627_v32 = vpop.f32.mrb[2].mxu0 }
 0x1f9   : > { %v1552_v34 = vpop.f32.mrb[3].mxu0  ;;  %v681_v35 = vadd.f32 %v675_v24, %v625_v30  ;;  %v540_v30 = vld [vmem:[%s2215_s7 + $0x4] sm:$0xf] }
 0x1fb   : > { %v1978_v36 = vadd.f32 %v685_v33, %v681_v35 }
 0x1fd   : > { %v688_v37 = vmul.f32 0.5, %v1978_v36 }
 0x1ff   : > { %1702 = vtanh.f32 %v688_v37 }
 0x209   : > { %v1703_v38 = vpop.eup %1702 }
 0x20a   : > { %v690_v39 = vadd.f32 1.0, %v1703_v38 }
 0x20c   : > { %v691_v40 = vmul.f32 %v690_v39, %v688_v37 }
 0x20e   : > { %693 = vrot.lane.b32.xlu1 %v691_v40, %s1792_s21 }
 0x280   : > { %v694_v41 = vpop.permute.xlu1 %693 }
 0x281   : > { %v696_v42 = vsel %vm631_vm1, 0.0, %v694_v41 }
 0x282   : > { %v697_v43 = vsel %vm567_vm4, %v696_v42, 0.0 }
 0x283   : > { %v699_v44 = vrot.slane %v697_v43, 4  ;;  %703 = vrot.lane.b32.xlu1 %v697_v43, %s2230_s25 }
 0x285   : > { %700 = vrot.lane.b32.xlu0 %v699_v44, %s2228_s28 }
 0x289   : > { %711 = vperm.xlu0 %1688, %v539_v45  }
 0x2f5   : > { %v704_v47 = vpop.permute.xlu1 %703 }
 0x2f7   : > { %v701_v46 = vpop.permute.xlu0 %700 }
 0x2f8   : > { %v707_v48 = vsel %vm706_vm8, %v697_v43, %v701_v46  ;;  %v538_v43 = vld [vmem:[%s2214_s6 + $0x2] sm:$0x3] }
 0x2f9   : > { %v708_v49 = vpack.c.bf16 %v704_v47, %v707_v48 }
 0x2fb   : > { %v720_v50 = vsel %vm718_vm9, %v708_v49, 0 }
 0x2fc   : > { %1560 = vmatpush3.bf16.msra.mxu1 %v720_v50  ;;  %v545_v50 = vld [vmem:[%s2218_s10] sm:$0x3] }
 0x2fd   : > { %1571 = vmatprep.subr.bf16.mxu1 %v1785_v7 }
 0x2ff   : > { %1562 = vmatmul.mubr.msk.bf16.vlgmr.msra.gmra.mrb[4].mxu1 %vm714_vm10, %v537_v51 }
 0x300   : > { %1573 = vmatprep.mubr.msk.bf16.mxu1 %vm1787_vm2, %v1785_v7 }
 0x308   : > { %v712_v52 = vpop.permute.xlu0 %711 }
 0x3d2   : > { %v756_v53 = vpop.f32.mrb[4].mxu1 }
 0x3d3   : > { %v757_v54 = vadd.f32 %v756_v53, %v712_v52  ;;  %v1563_v55 = vpop.f32.mrb[5].mxu1 }
 0x3d4   : > { %v759_v56 = vpop.f32.mrb[6].mxu1 }
 0x3d5   : > { %v762_v57 = vmul.f32 0.5, %v757_v54  ;;  %v1564_v58 = vpop.f32.mrb[7].mxu1 }
 0x3d7   : > { %1704 = vtanh.f32 %v762_v57 }
 0x3e1   : > { %v1705_v59 = vpop.eup %1704 }
 0x3e2   : > { %v764_v60 = vadd.f32 1.0, %v1705_v59 }
 0x3e4   : > { %v765_v61 = vmul.f32 %v764_v60, %v762_v57 }
 0x3e6   : > { %767 = vrot.lane.b32.xlu1 %v765_v61, %s1792_s21 }
 0x458   : > { %v768_v62 = vpop.permute.xlu1 %767 }
 0x459   : > { %v770_v63 = vsel %vm631_vm1, 0.0, %v768_v62 }
 0x45a   : > { %v771_v0 = vsel %vm567_vm4, %v770_v63, 0.0 }
 0x45b   : > { %v773_v1 = vrot.slane %v771_v0, 4  ;;  %777 = vrot.lane.b32.xlu1 %v771_v0, %s2230_s25 }
 0x45d   : > { %774 = vrot.lane.b32.xlu0 %v773_v1, %s2228_s28 }
 0x461   : > { %784 = vperm.xlu0 %1688, %v543_v2  }
 0x465   : > { %979 = vrot.lane.b32.xlu0 %v691_v40, %s2236_s0 }
 0x4cd   : > { %v778_v4 = vpop.permute.xlu1 %777 }
 0x4cf   : > { %v775_v3 = vpop.permute.xlu0 %774 }
 0x4d0   : > { %v780_v5 = vsel %vm706_vm8, %v771_v0, %v775_v3 }
 0x4d1   : > { %v781_v6 = vpack.c.bf16 %v778_v4, %v780_v5 }
 0x4d3   : > { %v791_v8 = vsel %vm718_vm9, %v781_v6, 0 }
 0x4d4   : > { %1566 = vmatpush3.bf16.msra.mxu0 %v791_v8 }
 0x4d5   : > { %1577 = vmatprep.subr.bf16.mxu0 %v1785_v7 }
 0x4d7   : > { %1568 = vmatmul.mubr.msk.bf16.vlgmr.msra.gmra.mrb[4].mxu0 %vm714_vm10, %v541_v9 }
 0x4d8   : > { %1579 = vmatprep.mubr.msk.bf16.mxu0 %vm1787_vm2, %v1785_v7 }
 0x4e0   : > { %v785_v10 = vpop.permute.xlu0 %784 }
 0x4e4   : > { %v980_v11 = vpop.permute.xlu0 %979 }
 0x4e5   : > { %v982_v12 = vsel %vm842_vm11, 0.0, %v980_v11 }
 0x4e6   : > { %v983_v13 = vsel %vm844_vm12, %v982_v12, 0.0 }
 0x4e7   : > { %989 = vrot.lane.b32.xlu0 %v983_v13, %s2230_s25  ;;  %v985_v24 = vrot.slane %v983_v13, 4  ;;  %s2247_s25 = smov 126  }
 0x559   : > { %v990_v31 = vpop.permute.xlu0 %989 }
 0x5aa   : > { %v827_v14 = vpop.f32.mrb[4].mxu0 }
 0x5ab   : > { %v828_v15 = vadd.f32 %v827_v14, %v785_v10  ;;  %v1569_v16 = vpop.f32.mrb[5].mxu0 }
 0x5ac   : > { %v830_v17 = vpop.f32.mrb[6].mxu0 }
 0x5ad   : > { %v2020_v18 = vadd.f32 %v828_v15, %v1978_v36  ;;  %v1570_v19 = vpop.f32.mrb[7].mxu0 }
 0x5ae   : > { %v551_v19 = vld [vmem:[%s2221_s13] sm:$0xf] }
 0x5af   : > { %v834_v20 = vmul.f32 0.5, %v2020_v18 }
 0x5b1   : > { %1706 = vtanh.f32 %v834_v20 }
 0x5bb   : > { %v1707_v21 = vpop.eup %1706 }
 0x5bc   : > { %v836_v22 = vadd.f32 1.0, %v1707_v21 }
 0x5be   : > { %v837_v23 = vmul.f32 %v836_v22, %v834_v20 }
 0x5c0   : > { %839 = vrot.lane.b32.xlu1 %v837_v23, %s2236_s0 }
 0x5c4   : > { %986 = vrot.lane.b32.xlu1 %v985_v24, %s2228_s28  ;;  %s1797_s28 = smov 9  }
 0x632   : > { %v840_v25 = vpop.permute.xlu1 %839 }
 0x633   : > { %v843_v26 = vsel %vm842_vm11, 0.0, %v840_v25 }
 0x634   : > { %v845_v27 = vsel %vm844_vm12, %v843_v26, 0.0 }
 0x635   : > { %v847_v28 = vrot.slane %v845_v27, 4  ;;  %851 = vrot.lane.b32.xlu0 %v845_v27, %s1794_s29 }
 0x636   : > { %v987_v32 = vpop.permute.xlu1 %986 }
 0x637   : > { %848 = vrot.lane.b32.xlu1 %v847_v28, %s1790_s22  ;;  %v1004_v41 = vsel %vm706_vm8, %v983_v13, %v987_v32  ;;  %v542_v32 = vld [vmem:[%s2216_s8 + $0x2] sm:$0x3] }
 0x639   : > { %995 = vrot.lane.b32.xlu0 %v983_v13, %s2234_s30 }
 0x63b   : > { %992 = vrot.lane.b32.xlu1 %v985_v24, %s1790_s22 }
 0x63d   : > { %1001 = vrot.lane.b32.xlu0 %v983_v13, %s1794_s29 }
 0x63f   : > { %998 = vrot.lane.b32.xlu1 %v985_v24, %s2232_s27 }
 0x641   : > { %1011 = vperm.xlu0 %1688, %v547_v29  }
 0x643   : > { %858 = vperm.xlu1 %1689, %v540_v30  }
 0x6a7   : > { %v852_v33 = vpop.permute.xlu0 %851 }
 0x6a9   : > { %v849_v34 = vpop.permute.xlu1 %848 }
 0x6aa   : > { %v854_v35 = vsel %vm706_vm8, %v845_v27, %v849_v34 }
 0x6ab   : > { %v855_v37 = vpack.c.bf16 %v852_v33, %v854_v35  ;;  %v996_v38 = vpop.permute.xlu0 %995 }
 0x6ad   : > { %v993_v39 = vpop.permute.xlu1 %992  ;;  %v865_v40 = vsel %vm718_vm9, %v855_v37, 0 }
 0x6ae   : > { %v1005_v42 = vsel %vm706_vm8, %v990_v31, %v993_v39  ;;  %1572 = vmatpush3.bf16.msra.mxu1 %v865_v40 }
 0x6af   : > { %v1007_v44 = vpack.c.bf16 %v1005_v42, %v1004_v41  ;;  %1583 = vmatprep.subr.bf16.mxu1 %v1785_v7  ;;  %v1002_v46 = vpop.permute.xlu0 %1001  ;;  %v549_v41 = vld [vmem:[%s2220_s12] sm:$0x3] }
 0x6b1   : > { %1574 = vmatmul.mubr.msk.bf16.vlgmr.msra.gmra.mrb[8].mxu1 %vm714_vm10, %v538_v43  ;;  %v999_v45 = vpop.permute.xlu1 %998 }
 0x6b2   : > { %v1006_v47 = vsel %vm706_vm8, %v996_v38, %v999_v45  ;;  %1584 = vmatpush3.bf16.msra.mxu1 %v1007_v44  ;;  %1587 = vmatprep.mubr.msk.bf16.mxu1 %vm1787_vm2, %v1785_v7 }
 0x6b3   : > { %v1008_v48 = vpack.c.bf16 %v1002_v46, %v1006_v47  ;;  %1585 = vmatprep.subr.bf16.mxu1 %v1785_v7 }
 0x6b5   : > { %v1019_v49 = vsel %vm718_vm9, %v1008_v48, 0 }
 0x6b6   : > { %1586 = vmatpush3.bf16.msra.mxu1 %v1019_v49 }
 0x6b7   : > { %1599 = vmatprep.subr.bf16.mxu1 %v1785_v7 }
 0x6b9   : > { %1588 = vmatmul.mubr.msk.bf16.vlgmr.msra.gmra.mrb[12].mxu1 %vm1014_vm13, %v545_v50 }
 0x6ba   : > { %1603 = vmatprep.mubr.msk.bf16.mxu1 %vm1787_vm2, %v1785_v7 }
 0x6c0   : > { %v1012_v58 = vpop.permute.xlu0 %1011 }
 0x6c2   : > { %v859_v51 = vpop.permute.xlu1 %858 }
 0x784   : > { %v901_v52 = vpop.f32.mrb[8].mxu1 }
 0x785   : > { %v902_v53 = vadd.f32 %v901_v52, %v859_v51  ;;  %v1575_v54 = vpop.f32.mrb[9].mxu1 }
 0x786   : > { %v904_v55 = vpop.f32.mrb[10].mxu1 }
 0x787   : > { %v907_v56 = vmul.f32 0.5, %v902_v53  ;;  %v1576_v57 = vpop.f32.mrb[11].mxu1 }
 0x789   : > { %1708 = vtanh.f32 %v907_v56 }
 0x78c   : > { %v1055_v59 = vpop.f32.mrb[12].mxu1 }
 0x78d   : > { %v1056_v60 = vadd.f32 %v1055_v59, %v1012_v58  ;;  %v1589_v61 = vpop.f32.mrb[13].mxu1 }
 0x78e   : > { %v1058_v62 = vpop.f32.mrb[14].mxu1 }
 0x78f   : > { %v1061_v63 = vmul.f32 0.5, %v1056_v60  ;;  %v1590_v0 = vpop.f32.mrb[15].mxu1 }
 0x791   : > { %1710 = vtanh.f32 %v1061_v63 }
 0x793   : > { %v1709_v1 = vpop.eup %1708 }
 0x794   : > { %v909_v2 = vadd.f32 1.0, %v1709_v1 }
 0x796   : > { %v910_v3 = vmul.f32 %v909_v2, %v907_v56 }
 0x798   : > { %912 = vrot.lane.b32.xlu1 %v910_v3, %s1792_s21  ;;  %s2248_s21 = smov 127  }
 0x79b   : > { %v1711_v4 = vpop.eup %1710 }
 0x79c   : > { %v1063_v5 = vadd.f32 1.0, %v1711_v4 }
 0x79e   : > { %v1064_v6 = vmul.f32 %v1063_v5, %v1061_v63  ;;  %v546_v5 = vld [vmem:[%s2218_s10 + $0x2] sm:$0x3] }
 0x7a0   : > { %1066 = vrot.lane.b32.xlu0 %v1064_v6, %s2236_s0  ;;  %s2251_s0 = smov 123  }
 0x80a   : > { %v913_v8 = vpop.permute.xlu1 %912 }
 0x80b   : > { %v915_v9 = vsel %vm631_vm1, 0.0, %v913_v8 }
 0x80c   : > { %v916_v10 = vsel %vm567_vm4, %v915_v9, 0.0 }
 0x80d   : > { %v918_v14 = vrot.slane %v916_v10, 4 }
 0x812   : > { %v1067_v11 = vpop.permute.xlu0 %1066 }
 0x813   : > { %v1069_v12 = vsel %vm842_vm11, 0.0, %v1067_v11 }
 0x814   : > { %v1070_v13 = vsel %vm844_vm12, %v1069_v12, 0.0 }
 0x815   : > { %v1072_v15 = vrot.slane %v1070_v13, 4  ;;  %v1690_v16 = vpack.i.bf16 %v1070_v13, %v916_v10 }
 0x817   : > { %1691 = vrot.lane.b32.xlu0 %v1690_v16, %s2247_s25  ;;  %v1695_v17 = vpack.i.bf16 %v1072_v15, %v918_v14 }
 0x819   : > { %1696 = vrot.lane.b32.xlu1 %v1695_v17, %s2248_s21 }
 0x81b   : > { %1082 = vrot.lane.b32.xlu0 %v1070_v13, %s2234_s30  ;;  %s1801_s30 = smov 113  }
 0x81d   : > { %1079 = vrot.lane.b32.xlu1 %v1072_v15, %s1790_s22 }
 0x81f   : > { %1088 = vrot.lane.b32.xlu0 %v1070_v13, %s1794_s29 }
 0x821   : > { %1085 = vrot.lane.b32.xlu1 %v1072_v15, %s2232_s27  ;;  %s1800_s27 = smov 110  }
 0x825   : > { %1098 = vperm.xlu1 %1689, %v551_v19  }
 0x889   : > { %v1692_v20 = vpop.permute.xlu0 %1691 }
 0x88a   : > { %v1693_v23 = vunpack.i.l.bf16 %v1692_v20  ;;  %v1694_v26 = vunpack.i.h.bf16 %v1692_v20 }
 0x88b   : > { %v1697_v21 = vpop.permute.xlu1 %1696 }
 0x88c   : > { %v1698_v22 = vunpack.i.l.bf16 %v1697_v21  ;;  %v1699_v27 = vunpack.i.h.bf16 %v1697_v21 }
 0x88d   : > { %v1083_v25 = vpop.permute.xlu0 %1082 }
 0x88e   : > { %v925_v24 = vsel %vm706_vm8, %v916_v10, %v1698_v22  ;;  %v1091_v33 = vsel %vm706_vm8, %v1070_v13, %v1699_v27  ;;  %v552_v22 = vld [vmem:[%s2221_s13 + $0x4] sm:$0xf] }
 0x88f   : > { %v1080_v28 = vpop.permute.xlu1 %1079  ;;  %v926_v29 = vpack.c.bf16 %v1693_v23, %v925_v24  ;;  %v544_v23 = vld [vmem:[%s2217_s9 + $0x4] sm:$0xf] }
 0x890   : > { %v1092_v30 = vsel %vm706_vm8, %v1694_v26, %v1080_v28 }
 0x891   : > { %v936_v31 = vsel %vm718_vm9, %v926_v29, 0  ;;  %v1094_v35 = vpack.c.bf16 %v1092_v30, %v1091_v33  ;;  %v1089_v37 = vpop.permute.xlu0 %1088 }
 0x892   : > { %1578 = vmatpush3.bf16.msra.mxu0 %v936_v31 }
 0x893   : > { %v1086_v34 = vpop.permute.xlu1 %1085  ;;  %1591 = vmatprep.subr.bf16.mxu0 %v1785_v7 }
 0x894   : > { %v1093_v38 = vsel %vm706_vm8, %v1083_v25, %v1086_v34 }
 0x895   : > { %v1095_v39 = vpack.c.bf16 %v1089_v37, %v1093_v38  ;;  %1580 = vmatmul.mubr.msk.bf16.vlgmr.msra.gmra.mrb[8].mxu0 %vm714_vm10, %v542_v32  ;;  %v550_v37 = vld [vmem:[%s2220_s12 + $0x2] sm:$0x3] }
 0x896   : > { %1592 = vmatpush3.bf16.msra.mxu0 %v1094_v35  ;;  %1595 = vmatprep.mubr.msk.bf16.mxu0 %vm1787_vm2, %v1785_v7 }
 0x897   : > { %1593 = vmatprep.subr.bf16.mxu0 %v1785_v7  ;;  %v1105_v40 = vsel %vm718_vm9, %v1095_v39, 0 }
 0x89a   : > { %1594 = vmatpush3.bf16.msra.mxu0 %v1105_v40 }
 0x89b   : > { %1607 = vmatprep.subr.bf16.mxu0 %v1785_v7 }
 0x89d   : > { %1596 = vmatmul.mubr.msk.bf16.vlgmr.msra.gmra.mrb[12].mxu0 %vm1014_vm13, %v549_v41 }
 0x89e   : > { %1611 = vmatprep.mubr.msk.bf16.mxu0 %vm1787_vm2, %v1785_v7 }
 0x8a4   : > { %v1099_v42 = vpop.permute.xlu1 %1098 }
 0x970   : > { %v1141_v43 = vpop.f32.mrb[12].mxu0 }
 0x971   : > { %v1142_v44 = vadd.f32 %v1141_v43, %v1099_v42  ;;  %v1597_v45 = vpop.f32.mrb[13].mxu0 }
 0x972   : > { %v1144_v46 = vpop.f32.mrb[14].mxu0 }
 0x973   : > { %v2097_v47 = vadd.f32 %v1142_v44, %v1978_v36  ;;  %v1598_v48 = vpop.f32.mrb[15].mxu0  ;;  %v548_v36 = vld [vmem:[%s2219_s11 + $0x4] sm:$0xf] }
 0x975   : > { %v1148_v49 = vmul.f32 0.5, %v2097_v47 }
 0x977   : > { %1712 = vtanh.f32 %v1148_v49 }
 0x981   : > { %v1713_v50 = vpop.eup %1712 }
 0x982   : > { %v1150_v51 = vadd.f32 1.0, %v1713_v50 }
 0x984   : > { %v1151_v52 = vmul.f32 %v1150_v51, %v1148_v49 }
 0x986   : > { %1153 = vrot.lane.b32.xlu0 %v1151_v52, %s1797_s28 }
 0x9f8   : > { %v1154_v53 = vpop.permute.xlu0 %1153 }
 0x9f9   : > { %v1157_v54 = vsel %vm1156_vm14, 0.0, %v1154_v53 }
 0x9fa   : > { %v1159_v55 = vsel %vm1158_vm15, %v1157_v54, 0.0 }
 0x9fb   : > { %1165 = vrot.lane.b32.xlu0 %v1159_v55, %s1794_s29  ;;  %v1161_v56 = vrot.slane %v1159_v55, 4 }
 0x9fd   : > { %1162 = vrot.lane.b32.xlu1 %v1161_v56, %s1790_s22 }
 0x9ff   : > { %1171 = vrot.lane.b32.xlu0 %v1159_v55, %s1798_s20  ;;  %s2250_s20 = smov 124  }
 0xa01   : > { %1168 = vrot.lane.b32.xlu1 %v1161_v56, %s1799_s19 }
 0xa03   : > { %1177 = vrot.lane.b32.xlu0 %v1159_v55, %s1800_s27  ;;  %s2249_s27 = smov 3  }
 0xa05   : > { %1174 = vrot.lane.b32.xlu1 %v1161_v56, %s1801_s30  ;;  %v554_v56 = vld [vmem:[#allocation2] sm:$0x1] }
 0xa09   : > { %1187 = vperm.xlu1 %1689, %v548_v36  }
 0xa6d   : > { %v1166_v57 = vpop.permute.xlu0 %1165 }
 0xa6f   : > { %v1163_v58 = vpop.permute.xlu1 %1162 }
 0xa70   : > { %v1180_v61 = vsel %vm706_vm8, %v1159_v55, %v1163_v58 }
 0xa71   : > { %v1172_v59 = vpop.permute.xlu0 %1171 }
 0xa73   : > { %v1169_v60 = vpop.permute.xlu1 %1168 }
 0xa74   : > { %v1181_v62 = vsel %vm706_vm8, %v1166_v57, %v1169_v60 }
 0xa75   : > { %v1183_v63 = vpack.c.bf16 %v1181_v62, %v1180_v61  ;;  %v1178_v1 = vpop.permute.xlu0 %1177 }
 0xa77   : > { %1600 = vmatpush3.bf16.msra.mxu1 %v1183_v63  ;;  %v1175_v0 = vpop.permute.xlu1 %1174 }
 0xa78   : > { %v1182_v2 = vsel %vm706_vm8, %v1172_v59, %v1175_v0  ;;  %1601 = vmatprep.subr.bf16.mxu1 %v1785_v7 }
 0xa79   : > { %v1184_v3 = vpack.c.bf16 %v1178_v1, %v1182_v2 }
 0xa7b   : > { %v1194_v4 = vsel %vm718_vm9, %v1184_v3, 0 }
 0xa7c   : > { %1602 = vmatpush3.bf16.msra.mxu1 %v1194_v4  ;;  %v553_v4 = vld [vmem:[%s2222_s14] sm:$0x1] }
 0xa7d   : > { %1615 = vmatprep.subr.bf16.mxu1 %v1785_v7 }
 0xa7f   : > { %1604 = vmatmul.mubr.msk.bf16.vlgmr.msra.gmra.mrb[16].mxu1 %vm1014_vm13, %v546_v5  ;;  %v1365_v5 = vlaneseq }
 0xa80   : > { %1619 = vmatprep.mubr.msk.bf16.mxu1 %vm1787_vm2, %v1785_v7 }
 0xa88   : > { %v1188_v6 = vpop.permute.xlu1 %1187 }
 0xb52   : > { %v1230_v8 = vpop.f32.mrb[16].mxu1 }
 0xb53   : > { %v1231_v9 = vadd.f32 %v1230_v8, %v1188_v6  ;;  %v1605_v10 = vpop.f32.mrb[17].mxu1  ;;  %v1366_v6 = vshrl.u32 %v1365_v5, 7 }
 0xb54   : > { %v1233_v11 = vpop.f32.mrb[18].mxu1 }
 0xb55   : > { %v1236_v12 = vmul.f32 0.5, %v1231_v9  ;;  %v1606_v13 = vpop.f32.mrb[19].mxu1  ;;  %v1367_v8 = vsub.s32 0, %v1366_v6 }
 0xb57   : > { %1714 = vtanh.f32 %v1236_v12 }
 0xb61   : > { %v1715_v14 = vpop.eup %1714 }
 0xb62   : > { %v1238_v15 = vadd.f32 1.0, %v1715_v14 }
 0xb64   : > { %v1239_v16 = vmul.f32 %v1238_v15, %v1236_v12 }
 0xb66   : > { %1241 = vrot.lane.b32.xlu0 %v1239_v16, %s2249_s27 }
 0xbd8   : > { %v1242_v17 = vpop.permute.xlu0 %1241 }
 0xbd9   : > { %v1244_v19 = vsel %vm842_vm11, 0.0, %v1242_v17 }
 0xbda   : > { %v1245_v20 = vsel %vm844_vm12, %v1244_v19, 0.0 }
 0xbdb   : > { %1251 = vrot.lane.b32.xlu0 %v1245_v20, %s2247_s25  ;;  %v1247_v21 = vrot.slane %v1245_v20, 4 }
 0xbdd   : > { %1248 = vrot.lane.b32.xlu1 %v1247_v21, %s2248_s21 }
 0xbdf   : > { %1257 = vrot.lane.b32.xlu0 %v1245_v20, %s2250_s20 }
 0xbe1   : > { %1254 = vrot.lane.b32.xlu1 %v1247_v21, %s1790_s22 }
 0xbe3   : > { %1263 = vrot.lane.b32.xlu0 %v1245_v20, %s1794_s29 }
 0xbe5   : > { %1260 = vrot.lane.b32.xlu1 %v1247_v21, %s2251_s0 }
 0xbe7   : > { %1273 = vperm.xlu0 %1688, %v552_v22  }
 0xbe9   : > { %929 = vperm.xlu1 %1689, %v544_v23  }
 0xc4d   : > { %v1252_v24 = vpop.permute.xlu0 %1251 }
 0xc4f   : > { %v1249_v25 = vpop.permute.xlu1 %1248 }
 0xc50   : > { %v1266_v28 = vsel %vm706_vm8, %v1245_v20, %v1249_v25 }
 0xc51   : > { %v1258_v26 = vpop.permute.xlu0 %1257 }
 0xc53   : > { %v1255_v27 = vpop.permute.xlu1 %1254 }
 0xc54   : > { %v1267_v29 = vsel %vm706_vm8, %v1252_v24, %v1255_v27 }
 0xc55   : > { %v1269_v30 = vpack.c.bf16 %v1267_v29, %v1266_v28  ;;  %v1264_v32 = vpop.permute.xlu0 %1263 }
 0xc57   : > { %1608 = vmatpush3.bf16.msra.mxu0 %v1269_v30  ;;  %v1261_v31 = vpop.permute.xlu1 %1260 }
 0xc58   : > { %v1268_v33 = vsel %vm706_vm8, %v1258_v26, %v1261_v31  ;;  %1609 = vmatprep.subr.bf16.mxu0 %v1785_v7 }
 0xc59   : > { %v1270_v34 = vpack.c.bf16 %v1264_v32, %v1268_v33 }
 0xc5b   : > { %v1280_v35 = vsel %vm718_vm9, %v1270_v34, 0 }
 0xc5c   : > { %1610 = vmatpush3.bf16.msra.mxu0 %v1280_v35 }
 0xc5f   : > { %1612 = vmatmul.mubr.msk.bf16.vlgmr.msra.gmra.mrb[8].mxu0 %vm1014_vm13, %v550_v37 }
 0xc66   : > { %v1274_v41 = vpop.permute.xlu0 %1273 }
 0xc68   : > { %v930_v38 = vpop.permute.xlu1 %929 }
 0xc69   : > { %v1623_v39 = vadd.f32 %v930_v38, %v2020_v18 }
 0xc6b   : > { %v1624_v40 = vadd.f32 %v1623_v39, %v2097_v47 }
 0xc6d   : > { %v1625_v42 = vadd.f32 %v1624_v40, %v1274_v41 }
 0xd32   : > { %v1316_v43 = vpop.f32.mrb[8].mxu0 }
 0xd33   : > { %v1626_v44 = vadd.f32 %v1625_v42, %v1316_v43  ;;  %v1613_v45 = vpop.f32.mrb[9].mxu0 }
 0xd34   : > { %v1319_v46 = vpop.f32.mrb[10].mxu0 }
 0xd35   : > { %v1324_v48 = vmul.f32 0.5, %v1626_v44  ;;  %v1614_v49 = vpop.f32.mrb[11].mxu0 }
 0xd37   : > { %v1325_v50 = vmul.f32 0.5, %v1324_v48 }
 0xd39   : > { %1716 = vtanh.f32 %v1325_v50 }
 0xd43   : > { %v1717_v51 = vpop.eup %1716 }
 0xd44   : > { %v1327_v52 = vadd.f32 1.0, %v1717_v51 }
 0xd46   : > { %v1328_v53 = vmul.f32 %v1327_v52, %v1325_v50 }
 0xd48   : > { %1330 = vrot.lane.b32.xlu1 %v1328_v53, %s2249_s27 }
 0xdba   : > { %v1331_v54 = vpop.permute.xlu1 %1330 }
 0xdbb   : > { %v1333_v18 = vsel %vm842_vm11, 0.0, %v1331_v54 }
 0xdbc   : > { %v1334_v47 = vsel %vm844_vm12, %v1333_v18, 0.0 }
 0xdbd   : > { %1340 = vrot.lane.b32.xlu1 %v1334_v47, %s2247_s25  ;;  %v1336_v55 = vrot.slane %v1334_v47, 4  ;;  %s523_s25 = sand.u32 1, %s1774_s24  }
 0xdbe   : > { %s524_s27 = scalar_lea.vmem [#allocation3], %s523_s25  ;;  %s1419_s1 = scalar_lea.sflag [#allocation4], %s523_s25 }
 0xdbf   : > { %1337 = vrot.lane.b32.xlu0 %v1336_v55, %s2248_s21  ;;  %s1514_s21 = sshll.u32 %s1912_s15, 4  ;;  %s1802_s15 = smov [#allocation3]  }
 0xdc0   : > { %s2166_s30 = scalar_lea.hbm %s2224_s16, %s1514_s21 }
 0xdc1   : > { %1346 = vrot.lane.b32.xlu1 %v1334_v47, %s2250_s20  ;;  %s1431_s20 = sshll.u32 %s524_s27, 4  ;;  %s2168_s20 = int_to_ptr.vmem [resolvable:$true] %s1431_s20 }
 0xdc2   : > { %s1720_s19 = scalar_lea.vmem %s2168_s20, 16 }
 0xdc3   : > { %1343 = vrot.lane.b32.xlu0 %v1336_v55, %s1790_s22  ;;  %p1721_p11 = scmp.ne.s32.totalorder %s2168_s20, %s1720_s19  ;;  %s1724_s22 = sshll.u32 %s1802_s15, 4  ;;  %s1725_s22 = int_to_ptr.vmem [resolvable:$false] %s1724_s22 }
 0xdc4   : > { %p1727_p0 = scmp.lt.s32.totalorder %s2168_s20, %s1725_s22 }
 0xdc5   : > { %1352 = vrot.lane.b32.xlu1 %v1334_v47, %s1794_s29  ;;  %p1722_p12 = pnand %p1721_p11, %p1929_p5  ;;  %s1726_s29 = scalar_lea.vmem %s1725_s22, 32 }
 0xdc6   : > { %p1728_p1 = scmp.lt.s32.totalorder %s1726_s29, %s1720_s19 }
 0xdc7   : > { %1349 = vrot.lane.b32.xlu0 %v1336_v55, %s2251_s0  ;;  %p1723_p13 = pneg %p1722_p12 }
 0xdc8   : > { %p1729_p2 = por %p1728_p1, %p1727_p0 }
 0xdca   : > { %p1730_p3 = pnand %p1729_p2, %p1723_p13 }
 0xdcb   : > { %1362 = vperm.xlu0 %1688, %v554_v56  }
 0xe2f   : > { %v1341_v36 = vpop.permute.xlu1 %1340 }
 0xe31   : > { %v1338_v57 = vpop.permute.xlu0 %1337 }
 0xe32   : > { %v1355_v60 = vsel %vm706_vm8, %v1334_v47, %v1338_v57 }
 0xe33   : > { %v1347_v58 = vpop.permute.xlu1 %1346 }
 0xe35   : > { %v1344_v59 = vpop.permute.xlu0 %1343 }
 0xe36   : > { %v1356_v61 = vsel %vm706_vm8, %v1341_v36, %v1344_v59 }
 0xe37   : > { %v1358_v62 = vpack.c.bf16 %v1356_v61, %v1355_v60  ;;  %v1353_v0 = vpop.permute.xlu1 %1352 }
 0xe39   : > { %1616 = vmatpush3.bf16.msra.mxu1 %v1358_v62  ;;  %v1350_v63 = vpop.permute.xlu0 %1349 }
 0xe3a   : > { %v1357_v1 = vsel %vm706_vm8, %v1347_v58, %v1350_v63  ;;  %1617 = vmatprep.subr.bf16.mxu1 %v1785_v7 }
 0xe3b   : > { %v1359_v2 = vpack.c.bf16 %v1353_v0, %v1357_v1 }
 0xe3d   : > { %v1373_v3 = vsel %vm718_vm9, %v1359_v2, 0 }
 0xe3e   : > { %1618 = vmatpush3.bf16.msra.mxu1 %v1373_v3 }
 0xe41   : > { %1620 = vmatmul.mubr.msk.bf16.vlgmr.msra.gmra.mrb[20].mxu1 %vm1014_vm13, %v553_v4 }
 0xe4a   : > { %v1363_v9 = vpop.permute.xlu0 %1362 }
 0xe4b   : > { %v1368_v10 = vrot.slane %v1363_v9, %v1367_v8 }
 0xf14   : > { %v1409_v11 = vpop.f32.mrb[20].mxu1 }
 0xf15   : > { %v1410_v12 = vadd.f32 %v1409_v11, %v1368_v10  ;;  %v1621_v7 = vpop.f32.mrb[21].mxu1 }
 0xf16   : > { %v1412_v13 = vpop.f32.mrb[22].mxu1 }
 0xf17   : > { %1718 = vtanh.f32 %v1410_v12  ;;  %v1622_v14 = vpop.f32.mrb[23].mxu1 }
 0xf21   : > { %v1719_v15 = vpop.eup %1718 }
 0xf22   : > { %1417 = vst.msk [vmem:[%s524_s27] sm:$0x1] %vm1416_vm0, %v1719_v15 }
 0xf23   : > { %1733 = shalt.err (!%p1730_p3)
}
 0xf24   : > { %s1734_s25 = scalar_lea.hbm %s2166_s30, 16  ;;  %s1738_s28 = scalar_lea.hbm %s2224_s16, 32 }
 0xf25   : > { %p1735_p4 = scmp.ne.s32.totalorder %s2166_s30, %s1734_s25  ;;  %p1739_p9 = scmp.lt.u32.totalorder %s2166_s30, %s2224_s16 }
 0xf26   : > { %p1740_p10 = scmp.lt.u32.totalorder %s1738_s28, %s1734_s25  ;;  %p1742_p12 = scmp.lt.u32.totalorder %s1734_s25, %s2166_s30 }
 0xf27   : > { %p1736_p7 = pnand %p1735_p4, %p1929_p5 }
 0xf28   : > { %p1741_p11 = por %p1740_p10, %p1739_p9 }
 0xf29   : > { %p1737_p8 = pneg %p1736_p7 }
 0xf2a   : > { %p1743_p13 = por %p1742_p12, %p1741_p11 }
 0xf2c   : > { %p1744_p0 = pnand %p1743_p13, %p1737_p8 }
 0xf2e   : > { %1747 = shalt.err (!%p1744_p0)
}
 0xf2f   : > { %1631 = dma.vmem_to_hbm [thread:$0]  (%p1929_p5), %s2168_s20, 16, %s2166_s30, %s1419_s1  }
 0xf30 PF: > { %p1637_p1 = scmp.ge.s32.totalorder %s1782_s26, 2  ;;  %s1443_s19 = sand.u32 1, %s1770_s23  }
 0xf31   : > { %s1444_s22 = scalar_lea.sflag [#allocation4], %s1443_s19 }
 0xf32   : > { %p1634_p2 = pnand %p1637_p1, %p1933_p6 }
 0xf34   : > { %1765 = dma.done.wait (!%p1634_p2), %s1444_s22, 16  }
 0xf35   : > { %1767 = vsyncadd (!%p1634_p2), %s1444_s22, 4294967280  ;;  %s2252_s26 = sld [smem:[#allocation7_spill]]  ;;  %s2253_s29 = sld [smem:[#allocation6_spill]] }
 0xf36   : > { %s2254_s25 = sld [smem:[#allocation8_spill]]  ;;  %s2255_s23 = smov %s1774_s24 }
 0xf3b   : > { %p28_p3 = scmp.ge.s32.totalorder %s2252_s26, 4   ;;  %s2256_s24 = smov %s2253_s29 }
 0xf3d   :  { %30 = sbr.rel (!%p28_p3) target bundleno = 6 (0x6), region = 122 }
 0xf44   :  { %1448 = vsyncpa [#allocation4], 1 }
 0xf45   :  { %1450 = vsyncpa [#allocation4 + $0x1], 1 }

</bundles_post_ra>
